<compile_context>
chip_gen: v5e
topology: v5e:2x2
jax: 0.10.0
libtpu: 0.0.40
codegen_flags: <defaults>
</compile_context>

<pallas_src>
import functools

import jax
import jax.numpy as jnp
from jax import lax
from jax.experimental import pallas as pl

LANE = 128                       # lane width: stored output channels padded to this
ENC_COUT = (256, 128, 64, 32)    # true output channels of enc1..enc4 (from the module)


def _round_up(n, m):
    return ((n + m - 1) // m) * m


def _pad_axis(a, size, axis):
    pad = [(0, 0)] * a.ndim
    pad[axis] = (0, size - a.shape[axis])
    return jnp.pad(a, pad)


# ----------------------------- Pallas kernels -----------------------------

def _conv_pool_kernel(p_ref, w_ref, b_ref, o_ref, *, mg):
    """Fused conv-matmul + bias + ReLU + 2x2 max-pool.

    p: (4*mg, K) bf16 - 3x3 patches, grouped as 4 contiguous row-blocks of mg
       rows, one block per position (ph, pw) of the 2x2 pooling window.
    w: (K, N) bf16    b: (1, N) f32    o: (mg, N) bf16 (pooled rows only).
    """
    acc = jnp.dot(p_ref[...], w_ref[...], preferred_element_type=jnp.float32)
    pooled = jnp.maximum(
        jnp.maximum(acc[0 * mg:1 * mg], acc[1 * mg:2 * mg]),
        jnp.maximum(acc[2 * mg:3 * mg], acc[3 * mg:4 * mg]))
    # max/bias/ReLU commute here (shared bias, monotone ReLU) -> pool first.
    o_ref[...] = jnp.maximum(pooled + b_ref[...], 0.0).astype(o_ref.dtype)


def _matmul_bias_kernel(x_ref, w_ref, b_ref, o_ref, *, relu):
    # x: (M, K) bf16   w: (K, N) bf16   b: (1, N) f32   o: (M, N)
    acc = jnp.dot(x_ref[...], w_ref[...], preferred_element_type=jnp.float32)
    acc = acc + b_ref[...]
    if relu:
        acc = jnp.maximum(acc, 0.0)
    o_ref[...] = acc.astype(o_ref.dtype)


# ------------------------------ layer wrappers ------------------------------
# TODO(synk): patch extraction / dilation / depth-to-space transposes stay as
# XLA data-movement glue; an in-kernel shifted-dot im2col would need
# sublane-offset loads and is not worth the risk at these tiny shapes.

def _conv3x3_pool_layer(x, wm, b):
    """conv3x3(pad=1) + bias + ReLU + maxpool2x2 as ONE pallas_call.

    x: (B, H, W, Cin) bf16 (true channels) -> (B, H//2, W//2, N) bf16.
    """
    bsz, h, w, cin = x.shape
    ho, wo = h // 2, w // 2
    n = wm.shape[1]
    xp = jnp.pad(x, ((0, 0), (1, 1), (1, 1), (0, 0)))
    taps = [lax.slice(xp, (0, ki, kj, 0), (bsz, ki + h, kj + w, cin))
            for ki in range(3) for kj in range(3)]
    p = jnp.stack(taps, axis=3).reshape(bsz, ho, 2, wo, 2, 9 * cin)
    p = jnp.transpose(p, (2, 4, 0, 1, 3, 5))            # (ph, pw, B, Ho, Wo, 9*Cin)
    m_out = bsz * ho * wo
    mg = max(8, _round_up(m_out, 8))                    # 8-aligned rows per pool group
    p = p.reshape(4, m_out, 9 * cin)
    if mg != m_out:
        p = jnp.pad(p, ((0, 0), (0, mg - m_out), (0, 0)))
    p = p.reshape(4 * mg, 9 * cin)

    out = pl.pallas_call(
        functools.partial(_conv_pool_kernel, mg=mg),
        out_shape=jax.ShapeDtypeStruct((mg, n), jnp.bfloat16),
    )(p, wm, b)
    return out[:m_out].reshape(bsz, ho, wo, n)


def _convT2x2_layer(x, wm, b, cout, *, relu):
    """ConvTranspose2d(kernel=2, stride=2) == matmul Cin -> (2,2,Cout) + depth-to-space."""
    bsz, hi, wi, cin = x.shape
    m = bsz * hi * wi
    n = wm.shape[1]
    y = pl.pallas_call(
        functools.partial(_matmul_bias_kernel, relu=relu),
        out_shape=jax.ShapeDtypeStruct((m, n), jnp.bfloat16),
    )(x.reshape(m, cin), wm, b)
    y = y[:, :4 * cout].reshape(bsz, hi, wi, 2, 2, cout)
    return jnp.transpose(y, (0, 1, 3, 2, 4, 5)).reshape(bsz, 2 * hi, 2 * wi, cout)


def _convT_dilated_layer(x, wm, b, kh, kw, sh, sw, *, relu):
    """General ConvTranspose2d via zero-insertion dilation + flipped conv (im2col + matmul)."""
    bsz, _, _, cin = x.shape
    xd = lax.pad(x, jnp.zeros((), x.dtype),
                 ((0, 0, 0),
                  (kh - 1, kh - 1, sh - 1),
                  (kw - 1, kw - 1, sw - 1),
                  (0, 0, 0)))
    hd, wd = xd.shape[1], xd.shape[2]
    ho, wo = hd - kh + 1, wd - kw + 1
    taps = [lax.slice(xd, (0, ki, kj, 0), (bsz, ki + ho, kj + wo, cin))
            for ki in range(kh) for kj in range(kw)]
    p = jnp.stack(taps, axis=3).reshape(bsz * ho * wo, kh * kw * cin)
    n = wm.shape[1]
    y = pl.pallas_call(
        functools.partial(_matmul_bias_kernel, relu=relu),
        out_shape=jax.ShapeDtypeStruct((bsz * ho * wo, n), jnp.bfloat16),
    )(p, wm, b)
    return y.reshape(bsz, ho, wo, n)


# --------------------------- one-time weight packing ---------------------------

def pack_params(params):
    """Pack PyTorch-layout weights into matmul form ONCE (hoisted out of forward)."""
    packed = {}
    # Encoder 3x3 convs: (Cout, Cin, 3, 3) -> (9*Cin, Cout_pad); bias -> (1, Cout_pad).
    for name in ("enc1", "enc2", "enc3", "enc4"):
        w, bias = params[name + "_w"], params[name + "_b"]
        cout = w.shape[0]
        n = _round_up(cout, LANE)
        wm = jnp.transpose(w, (2, 3, 1, 0)).reshape(-1, cout)        # rows = (ki, kj, cin)
        packed[name + "_w"] = _pad_axis(wm, n, 1).astype(jnp.bfloat16)
        packed[name + "_b"] = _pad_axis(bias.reshape(1, -1), n, 1).astype(jnp.float32)
    # dec1/dec3/dec4: kernel == stride == 2 -> pixel-shuffle matmul Cin -> (ph, pw, Cout).
    for name in ("dec1", "dec3", "dec4"):
        w, bias = params[name + "_w"], params[name + "_b"]           # (Cin, Cout, 2, 2)
        cin, cout = w.shape[0], w.shape[1]
        n = _round_up(4 * cout, LANE)
        wm = jnp.transpose(w, (0, 2, 3, 1)).reshape(cin, 4 * cout)
        bm = jnp.tile(bias, 4).reshape(1, 4 * cout)
        packed[name + "_w"] = _pad_axis(wm, n, 1).astype(jnp.bfloat16)
        packed[name + "_b"] = _pad_axis(bm, n, 1).astype(jnp.float32)
    # dec2: kernel (2,3), stride 2 -> flipped-kernel dilated-conv matrix (2*3*Cin, Cout).
    w, bias = params["dec2_w"], params["dec2_b"]                     # (64, 128, 2, 3)
    cout = w.shape[1]
    wm = jnp.transpose(w[:, :, ::-1, ::-1], (2, 3, 0, 1)).reshape(-1, cout)
    packed["dec2_w"] = wm.astype(jnp.bfloat16)
    packed["dec2_b"] = bias.reshape(1, -1).astype(jnp.float32)
    return packed


# ------------------------------- forward pass -------------------------------

def autoencoder_forward(x_nchw, packed):
    """Forward pass of Autoencoder_conv; `packed` comes from pack_params (done once)."""
    x = jnp.transpose(x_nchw, (0, 2, 3, 1)).astype(jnp.bfloat16)     # NCHW -> NHWC
    cin = x.shape[-1]

    # encoder: 4 fused (conv3x3 + bias + ReLU + maxpool2x2) pallas_calls
    for name, cout in zip(("enc1", "enc2", "enc3", "enc4"), ENC_COUT):
        x = _conv3x3_pool_layer(x[..., :cin], packed[name + "_w"], packed[name + "_b"])
        cin = cout
    x = x[..., :cin]                                                 # 32 true channels

    # decoder
    x = _convT2x2_layer(x, packed["dec1_w"], packed["dec1_b"], 64, relu=True)
    x = _convT_dilated_layer(x, packed["dec2_w"], packed["dec2_b"], 2, 3, 2, 2, relu=True)
    x = _convT2x2_layer(x, packed["dec3_w"], packed["dec3_b"], 256, relu=True)
    x = _convT2x2_layer(x, packed["dec4_w"], packed["dec4_b"], 1, relu=False)

    return jnp.transpose(x.astype(jnp.float32), (0, 3, 1, 2))        # NHWC -> NCHW


# ------------------------ params / reference / main ------------------------

def init_params(key, n_channels):
    def conv_w(k, cout, cin, kh, kw):
        k1, k2 = jax.random.split(k)
        bound = 1.0 / (cin * kh * kw) ** 0.5
        w = jax.random.uniform(k1, (cout, cin, kh, kw), jnp.float32, -bound, bound)
        b = jax.random.uniform(k2, (cout,), jnp.float32, -bound, bound)
        return w, b

    def convT_w(k, cin, cout, kh, kw):
        k1, k2 = jax.random.split(k)
        bound = 1.0 / (cin * kh * kw) ** 0.5
        w = jax.random.uniform(k1, (cin, cout, kh, kw), jnp.float32, -bound, bound)
        b = jax.random.uniform(k2, (cout,), jnp.float32, -bound, bound)
        return w, b

    ks = jax.random.split(key, 8)
    p = {}
    p["enc1_w"], p["enc1_b"] = conv_w(ks[0], 256, n_channels, 3, 3)
    p["enc2_w"], p["enc2_b"] = conv_w(ks[1], 128, 256, 3, 3)
    p["enc3_w"], p["enc3_b"] = conv_w(ks[2], 64, 128, 3, 3)
    p["enc4_w"], p["enc4_b"] = conv_w(ks[3], 32, 64, 3, 3)
    p["dec1_w"], p["dec1_b"] = convT_w(ks[4], 32, 64, 2, 2)
    p["dec2_w"], p["dec2_b"] = convT_w(ks[5], 64, 128, 2, 3)
    p["dec3_w"], p["dec3_b"] = convT_w(ks[6], 128, 256, 2, 2)
    p["dec4_w"], p["dec4_b"] = convT_w(ks[7], 256, 1, 2, 2)
    return p


def reference_forward(x_nchw, params):
    """Pure-JAX reference (XLA convs / reduce_window) for validation."""
    def conv(x, w, b, pad):
        y = lax.conv_general_dilated(
            x, jnp.transpose(w, (2, 3, 1, 0)),
            window_strides=(1, 1), padding=[(pad, pad), (pad, pad)],
            dimension_numbers=("NHWC", "HWIO", "NHWC"))
        return y + b.reshape(1, 1, 1, -1)

    def convT(x, w, b, sh, sw):
        kh, kw = w.shape[2], w.shape[3]
        wf = jnp.transpose(w[:, :, ::-1, ::-1], (2, 3, 0, 1))
        y = lax.conv_general_dilated(
            x, wf, window_strides=(1, 1),
            padding=[(kh - 1, kh - 1), (kw - 1, kw - 1)],
            lhs_dilation=(sh, sw),
            dimension_numbers=("NHWC", "HWIO", "NHWC"))
        return y + b.reshape(1, 1, 1, -1)

    def pool(x):
        return lax.reduce_window(x, -jnp.inf, lax.max,
                                 (1, 2, 2, 1), (1, 2, 2, 1), "VALID")

    x = jnp.transpose(x_nchw, (0, 2, 3, 1)).astype(jnp.float32)
    x = pool(jax.nn.relu(conv(x, params["enc1_w"], params["enc1_b"], 1)))
    x = pool(jax.nn.relu(conv(x, params["enc2_w"], params["enc2_b"], 1)))
    x = pool(jax.nn.relu(conv(x, params["enc3_w"], params["enc3_b"], 1)))
    x = pool(jax.nn.relu(conv(x, params["enc4_w"], params["enc4_b"], 1)))
    x = jax.nn.relu(convT(x, params["dec1_w"], params["dec1_b"], 2, 2))
    x = jax.nn.relu(convT(x, params["dec2_w"], params["dec2_b"], 2, 2))
    x = jax.nn.relu(convT(x, params["dec3_w"], params["dec3_b"], 2, 2))
    x = convT(x, params["dec4_w"], params["dec4_b"], 2, 2)
    return jnp.transpose(x, (0, 3, 1, 2))


if __name__ == "__main__":
    key = jax.random.PRNGKey(0)
    kx, kp = jax.random.split(key)
    n_channels = 4
    x = jax.random.normal(kx, (2, n_channels, 16, 16), jnp.float32)
    params = init_params(kp, n_channels)

    packed = pack_params(params)          # one-time weight packing, outside the forward

    fwd = jax.jit(autoencoder_forward)
    out = jax.block_until_ready(fwd(x, packed))
    assert out.shape == (2, 1, 16, 20), out.shape

    ref = jax.block_until_ready(jax.jit(reference_forward)(x, params))
    max_err = float(jnp.max(jnp.abs(out - ref)))
    assert jnp.allclose(out, ref, rtol=3e-2, atol=3e-2), f"max_err={max_err}"

    print("KERNEL_OK")
</pallas_src>

<mosaic_0001>
module attributes {stable_mosaic.version = 11 : i64} {
  func.func @_conv_pool_kernel(%arg0: memref<512x36xbf16, #tpu.memory_space<vmem>>, %arg1: memref<36x256xbf16, #tpu.memory_space<vmem>>, %arg2: memref<1x256xf32, #tpu.memory_space<vmem>>, %arg3: memref<128x256xbf16, #tpu.memory_space<vmem>>) attributes {dimension_semantics = [], scalar_prefetch = 0 : i64, scratch_operands = 0 : i64, tpu.core_type = #tpu.core_type<tc>} {
    %c0 = arith.constant 0 : index
    %c0_0 = arith.constant 0 : index
    %0 = vector.load %arg0[%c0, %c0_0] : memref<512x36xbf16, #tpu.memory_space<vmem>>, vector<512x36xbf16>
    %c0_1 = arith.constant 0 : index
    %c0_2 = arith.constant 0 : index
    %1 = vector.load %arg1[%c0_1, %c0_2] : memref<36x256xbf16, #tpu.memory_space<vmem>>, vector<36x256xbf16>
    %cst = arith.constant dense<0.000000e+00> : vector<512x256xf32>
    %2 = tpu.matmul %0, %1, %cst {dimension_numbers = #tpu.dot_dimension_numbers<[1], [0], [0], [1], [0, 0, 1, 1], [], []>} : vector<512x36xbf16>, vector<36x256xbf16>, vector<512x256xf32> -> vector<512x256xf32>
    %3 = vector.extract_strided_slice %2 {offsets = [0, 0], sizes = [128, 256], strides = [1, 1]} : vector<512x256xf32> to vector<128x256xf32>
    %4 = vector.extract_strided_slice %2 {offsets = [128, 0], sizes = [128, 256], strides = [1, 1]} : vector<512x256xf32> to vector<128x256xf32>
    %5 = arith.maximumf %3, %4 : vector<128x256xf32>
    %6 = vector.extract_strided_slice %2 {offsets = [256, 0], sizes = [128, 256], strides = [1, 1]} : vector<512x256xf32> to vector<128x256xf32>
    %7 = vector.extract_strided_slice %2 {offsets = [384, 0], sizes = [128, 256], strides = [1, 1]} : vector<512x256xf32> to vector<128x256xf32>
    %8 = arith.maximumf %6, %7 : vector<128x256xf32>
    %9 = arith.maximumf %5, %8 : vector<128x256xf32>
    %c0_3 = arith.constant 0 : index
    %c0_4 = arith.constant 0 : index
    %10 = vector.load %arg2[%c0_3, %c0_4] : memref<1x256xf32, #tpu.memory_space<vmem>>, vector<1x256xf32>
    %11 = vector.broadcast %10 : vector<1x256xf32> to vector<128x256xf32>
    %12 = arith.addf %9, %11 : vector<128x256xf32>
    %cst_5 = arith.constant 0.000000e+00 : f32
    %13 = vector.broadcast %cst_5 : f32 to vector<128x256xf32>
    %14 = arith.maximumf %12, %13 : vector<128x256xf32>
    %15 = arith.truncf %14 : vector<128x256xf32> to vector<128x256xbf16>
    %c0_6 = arith.constant 0 : index
    %c0_7 = arith.constant 0 : index
    %16 = vector.load %arg3[%c0_6, %c0_7] : memref<128x256xbf16, #tpu.memory_space<vmem>>, vector<128x256xbf16>
    tpu.vector_store %arg3[%c0_6, %c0_7], %15 {strides = array<i32>} : memref<128x256xbf16, #tpu.memory_space<vmem>>, vector<128x256xbf16>,
    return
  }
}

module attributes {stable_mosaic.version = 11 : i64} {
  func.func @_conv_pool_kernel(%arg0: memref<128x2304xbf16, #tpu.memory_space<vmem>>, %arg1: memref<2304x128xbf16, #tpu.memory_space<vmem>>, %arg2: memref<1x128xf32, #tpu.memory_space<vmem>>, %arg3: memref<32x128xbf16, #tpu.memory_space<vmem>>) attributes {dimension_semantics = [], scalar_prefetch = 0 : i64, scratch_operands = 0 : i64, tpu.core_type = #tpu.core_type<tc>} {
    %c0 = arith.constant 0 : index
    %c0_0 = arith.constant 0 : index
    %0 = vector.load %arg0[%c0, %c0_0] : memref<128x2304xbf16, #tpu.memory_space<vmem>>, vector<128x2304xbf16>
    %c0_1 = arith.constant 0 : index
    %c0_2 = arith.constant 0 : index
    %1 = vector.load %arg1[%c0_1, %c0_2] : memref<2304x128xbf16, #tpu.memory_space<vmem>>, vector<2304x128xbf16>
    %cst = arith.constant dense<0.000000e+00> : vector<128x128xf32>
    %2 = tpu.matmul %0, %1, %cst {dimension_numbers = #tpu.dot_dimension_numbers<[1], [0], [0], [1], [0, 0, 1, 1], [], []>} : vector<128x2304xbf16>, vector<2304x128xbf16>, vector<128x128xf32> -> vector<128x128xf32>
    %3 = vector.extract_strided_slice %2 {offsets = [0, 0], sizes = [32, 128], strides = [1, 1]} : vector<128x128xf32> to vector<32x128xf32>
    %4 = vector.extract_strided_slice %2 {offsets = [32, 0], sizes = [32, 128], strides = [1, 1]} : vector<128x128xf32> to vector<32x128xf32>
    %5 = arith.maximumf %3, %4 : vector<32x128xf32>
    %6 = vector.extract_strided_slice %2 {offsets = [64, 0], sizes = [32, 128], strides = [1, 1]} : vector<128x128xf32> to vector<32x128xf32>
    %7 = vector.extract_strided_slice %2 {offsets = [96, 0], sizes = [32, 128], strides = [1, 1]} : vector<128x128xf32> to vector<32x128xf32>
    %8 = arith.maximumf %6, %7 : vector<32x128xf32>
    %9 = arith.maximumf %5, %8 : vector<32x128xf32>
    %c0_3 = arith.constant 0 : index
    %c0_4 = arith.constant 0 : index
    %10 = vector.load %arg2[%c0_3, %c0_4] : memref<1x128xf32, #tpu.memory_space<vmem>>, vector<1x128xf32>
    %11 = vector.broadcast %10 : vector<1x128xf32> to vector<32x128xf32>
    %12 = arith.addf %9, %11 : vector<32x128xf32>
    %cst_5 = arith.constant 0.000000e+00 : f32
    %13 = vector.broadcast %cst_5 : f32 to vector<32x128xf32>
    %14 = arith.maximumf %12, %13 : vector<32x128xf32>
    %15 = arith.truncf %14 : vector<32x128xf32> to vector<32x128xbf16>
    %c0_6 = arith.constant 0 : index
    %c0_7 = arith.constant 0 : index
    %16 = vector.load %arg3[%c0_6, %c0_7] : memref<32x128xbf16, #tpu.memory_space<vmem>>, vector<32x128xbf16>
    tpu.vector_store %arg3[%c0_6, %c0_7], %15 {strides = array<i32>} : memref<32x128xbf16, #tpu.memory_space<vmem>>, vector<32x128xbf16>,
    return
  }
}

module attributes {stable_mosaic.version = 11 : i64} {
  func.func @_conv_pool_kernel(%arg0: memref<32x1152xbf16, #tpu.memory_space<vmem>>, %arg1: memref<1152x128xbf16, #tpu.memory_space<vmem>>, %arg2: memref<1x128xf32, #tpu.memory_space<vmem>>, %arg3: memref<8x128xbf16, #tpu.memory_space<vmem>>) attributes {dimension_semantics = [], scalar_prefetch = 0 : i64, scratch_operands = 0 : i64, tpu.core_type = #tpu.core_type<tc>} {
    %c0 = arith.constant 0 : index
    %c0_0 = arith.constant 0 : index
    %0 = vector.load %arg0[%c0, %c0_0] : memref<32x1152xbf16, #tpu.memory_space<vmem>>, vector<32x1152xbf16>
    %c0_1 = arith.constant 0 : index
    %c0_2 = arith.constant 0 : index
    %1 = vector.load %arg1[%c0_1, %c0_2] : memref<1152x128xbf16, #tpu.memory_space<vmem>>, vector<1152x128xbf16>
    %cst = arith.constant dense<0.000000e+00> : vector<32x128xf32>
    %2 = tpu.matmul %0, %1, %cst {dimension_numbers = #tpu.dot_dimension_numbers<[1], [0], [0], [1], [0, 0, 1, 1], [], []>} : vector<32x1152xbf16>, vector<1152x128xbf16>, vector<32x128xf32> -> vector<32x128xf32>
    %3 = vector.extract_strided_slice %2 {offsets = [0, 0], sizes = [8, 128], strides = [1, 1]} : vector<32x128xf32> to vector<8x128xf32>
    %4 = vector.extract_strided_slice %2 {offsets = [8, 0], sizes = [8, 128], strides = [1, 1]} : vector<32x128xf32> to vector<8x128xf32>
    %5 = arith.maximumf %3, %4 : vector<8x128xf32>
    %6 = vector.extract_strided_slice %2 {offsets = [16, 0], sizes = [8, 128], strides = [1, 1]} : vector<32x128xf32> to vector<8x128xf32>
    %7 = vector.extract_strided_slice %2 {offsets = [24, 0], sizes = [8, 128], strides = [1, 1]} : vector<32x128xf32> to vector<8x128xf32>
    %8 = arith.maximumf %6, %7 : vector<8x128xf32>
    %9 = arith.maximumf %5, %8 : vector<8x128xf32>
    %c0_3 = arith.constant 0 : index
    %c0_4 = arith.constant 0 : index
    %10 = vector.load %arg2[%c0_3, %c0_4] : memref<1x128xf32, #tpu.memory_space<vmem>>, vector<1x128xf32>
    %11 = vector.broadcast %10 : vector<1x128xf32> to vector<8x128xf32>
    %12 = arith.addf %9, %11 : vector<8x128xf32>
    %cst_5 = arith.constant 0.000000e+00 : f32
    %13 = vector.broadcast %cst_5 : f32 to vector<8x128xf32>
    %14 = arith.maximumf %12, %13 : vector<8x128xf32>
    %15 = arith.truncf %14 : vector<8x128xf32> to vector<8x128xbf16>
    %c0_6 = arith.constant 0 : index
    %c0_7 = arith.constant 0 : index
    %16 = vector.load %arg3[%c0_6, %c0_7] : memref<8x128xbf16, #tpu.memory_space<vmem>>, vector<8x128xbf16>
    tpu.vector_store %arg3[%c0_6, %c0_7], %15 {strides = array<i32>} : memref<8x128xbf16, #tpu.memory_space<vmem>>, vector<8x128xbf16>,
    return
  }
}

module attributes {stable_mosaic.version = 11 : i64} {
  func.func @_conv_pool_kernel(%arg0: memref<32x576xbf16, #tpu.memory_space<vmem>>, %arg1: memref<576x128xbf16, #tpu.memory_space<vmem>>, %arg2: memref<1x128xf32, #tpu.memory_space<vmem>>, %arg3: memref<8x128xbf16, #tpu.memory_space<vmem>>) attributes {dimension_semantics = [], scalar_prefetch = 0 : i64, scratch_operands = 0 : i64, tpu.core_type = #tpu.core_type<tc>} {
    %c0 = arith.constant 0 : index
    %c0_0 = arith.constant 0 : index
    %0 = vector.load %arg0[%c0, %c0_0] : memref<32x576xbf16, #tpu.memory_space<vmem>>, vector<32x576xbf16>
    %c0_1 = arith.constant 0 : index
    %c0_2 = arith.constant 0 : index
    %1 = vector.load %arg1[%c0_1, %c0_2] : memref<576x128xbf16, #tpu.memory_space<vmem>>, vector<576x128xbf16>
    %cst = arith.constant dense<0.000000e+00> : vector<32x128xf32>
    %2 = tpu.matmul %0, %1, %cst {dimension_numbers = #tpu.dot_dimension_numbers<[1], [0], [0], [1], [0, 0, 1, 1], [], []>} : vector<32x576xbf16>, vector<576x128xbf16>, vector<32x128xf32> -> vector<32x128xf32>
    %3 = vector.extract_strided_slice %2 {offsets = [0, 0], sizes = [8, 128], strides = [1, 1]} : vector<32x128xf32> to vector<8x128xf32>
    %4 = vector.extract_strided_slice %2 {offsets = [8, 0], sizes = [8, 128], strides = [1, 1]} : vector<32x128xf32> to vector<8x128xf32>
    %5 = arith.maximumf %3, %4 : vector<8x128xf32>
    %6 = vector.extract_strided_slice %2 {offsets = [16, 0], sizes = [8, 128], strides = [1, 1]} : vector<32x128xf32> to vector<8x128xf32>
    %7 = vector.extract_strided_slice %2 {offsets = [24, 0], sizes = [8, 128], strides = [1, 1]} : vector<32x128xf32> to vector<8x128xf32>
    %8 = arith.maximumf %6, %7 : vector<8x128xf32>
    %9 = arith.maximumf %5, %8 : vector<8x128xf32>
    %c0_3 = arith.constant 0 : index
    %c0_4 = arith.constant 0 : index
    %10 = vector.load %arg2[%c0_3, %c0_4] : memref<1x128xf32, #tpu.memory_space<vmem>>, vector<1x128xf32>
    %11 = vector.broadcast %10 : vector<1x128xf32> to vector<8x128xf32>
    %12 = arith.addf %9, %11 : vector<8x128xf32>
    %cst_5 = arith.constant 0.000000e+00 : f32
    %13 = vector.broadcast %cst_5 : f32 to vector<8x128xf32>
    %14 = arith.maximumf %12, %13 : vector<8x128xf32>
    %15 = arith.truncf %14 : vector<8x128xf32> to vector<8x128xbf16>
    %c0_6 = arith.constant 0 : index
    %c0_7 = arith.constant 0 : index
    %16 = vector.load %arg3[%c0_6, %c0_7] : memref<8x128xbf16, #tpu.memory_space<vmem>>, vector<8x128xbf16>
    tpu.vector_store %arg3[%c0_6, %c0_7], %15 {strides = array<i32>} : memref<8x128xbf16, #tpu.memory_space<vmem>>, vector<8x128xbf16>,
    return
  }
}

module attributes {stable_mosaic.version = 11 : i64} {
  func.func @_matmul_bias_kernel(%arg0: memref<2x32xbf16, #tpu.memory_space<vmem>>, %arg1: memref<32x256xbf16, #tpu.memory_space<vmem>>, %arg2: memref<1x256xf32, #tpu.memory_space<vmem>>, %arg3: memref<2x256xbf16, #tpu.memory_space<vmem>>) attributes {dimension_semantics = [], scalar_prefetch = 0 : i64, scratch_operands = 0 : i64, tpu.core_type = #tpu.core_type<tc>} {
    %c0 = arith.constant 0 : index
    %c0_0 = arith.constant 0 : index
    %0 = vector.load %arg0[%c0, %c0_0] : memref<2x32xbf16, #tpu.memory_space<vmem>>, vector<2x32xbf16>
    %c0_1 = arith.constant 0 : index
    %c0_2 = arith.constant 0 : index
    %1 = vector.load %arg1[%c0_1, %c0_2] : memref<32x256xbf16, #tpu.memory_space<vmem>>, vector<32x256xbf16>
    %cst = arith.constant dense<0.000000e+00> : vector<2x256xf32>
    %2 = tpu.matmul %0, %1, %cst {dimension_numbers = #tpu.dot_dimension_numbers<[1], [0], [0], [1], [0, 0, 1, 1], [], []>} : vector<2x32xbf16>, vector<32x256xbf16>, vector<2x256xf32> -> vector<2x256xf32>
    %c0_3 = arith.constant 0 : index
    %c0_4 = arith.constant 0 : index
    %3 = vector.load %arg2[%c0_3, %c0_4] : memref<1x256xf32, #tpu.memory_space<vmem>>, vector<1x256xf32>
    %4 = vector.broadcast %3 : vector<1x256xf32> to vector<2x256xf32>
    %5 = arith.addf %2, %4 : vector<2x256xf32>
    %cst_5 = arith.constant 0.000000e+00 : f32
    %6 = vector.broadcast %cst_5 : f32 to vector<2x256xf32>
    %7 = arith.maximumf %5, %6 : vector<2x256xf32>
    %8 = arith.truncf %7 : vector<2x256xf32> to vector<2x256xbf16>
    %c0_6 = arith.constant 0 : index
    %c0_7 = arith.constant 0 : index
    %9 = vector.load %arg3[%c0_6, %c0_7] : memref<2x256xbf16, #tpu.memory_space<vmem>>, vector<2x256xbf16>
    tpu.vector_store %arg3[%c0_6, %c0_7], %8 {strides = array<i32>} : memref<2x256xbf16, #tpu.memory_space<vmem>>, vector<2x256xbf16>,
    return
  }
}

module attributes {stable_mosaic.version = 11 : i64} {
  func.func @_matmul_bias_kernel(%arg0: memref<40x128xbf16, #tpu.memory_space<vmem>>, %arg1: memref<128x1024xbf16, #tpu.memory_space<vmem>>, %arg2: memref<1x1024xf32, #tpu.memory_space<vmem>>, %arg3: memref<40x1024xbf16, #tpu.memory_space<vmem>>) attributes {dimension_semantics = [], scalar_prefetch = 0 : i64, scratch_operands = 0 : i64, tpu.core_type = #tpu.core_type<tc>} {
    %c0 = arith.constant 0 : index
    %c0_0 = arith.constant 0 : index
    %0 = vector.load %arg0[%c0, %c0_0] : memref<40x128xbf16, #tpu.memory_space<vmem>>, vector<40x128xbf16>
    %c0_1 = arith.constant 0 : index
    %c0_2 = arith.constant 0 : index
    %1 = vector.load %arg1[%c0_1, %c0_2] : memref<128x1024xbf16, #tpu.memory_space<vmem>>, vector<128x1024xbf16>
    %cst = arith.constant dense<0.000000e+00> : vector<40x1024xf32>
    %2 = tpu.matmul %0, %1, %cst {dimension_numbers = #tpu.dot_dimension_numbers<[1], [0], [0], [1], [0, 0, 1, 1], [], []>} : vector<40x128xbf16>, vector<128x1024xbf16>, vector<40x1024xf32> -> vector<40x1024xf32>
    %c0_3 = arith.constant 0 : index
    %c0_4 = arith.constant 0 : index
    %3 = vector.load %arg2[%c0_3, %c0_4] : memref<1x1024xf32, #tpu.memory_space<vmem>>, vector<1x1024xf32>
    %4 = vector.broadcast %3 : vector<1x1024xf32> to vector<40x1024xf32>
    %5 = arith.addf %2, %4 : vector<40x1024xf32>
    %cst_5 = arith.constant 0.000000e+00 : f32
    %6 = vector.broadcast %cst_5 : f32 to vector<40x1024xf32>
    %7 = arith.maximumf %5, %6 : vector<40x1024xf32>
    %8 = arith.truncf %7 : vector<40x1024xf32> to vector<40x1024xbf16>
    %c0_6 = arith.constant 0 : index
    %c0_7 = arith.constant 0 : index
    %9 = vector.load %arg3[%c0_6, %c0_7] : memref<40x1024xbf16, #tpu.memory_space<vmem>>, vector<40x1024xbf16>
    tpu.vector_store %arg3[%c0_6, %c0_7], %8 {strides = array<i32>} : memref<40x1024xbf16, #tpu.memory_space<vmem>>, vector<40x1024xbf16>,
    return
  }
}

module attributes {stable_mosaic.version = 11 : i64} {
  func.func @_matmul_bias_kernel(%arg0: memref<40x384xbf16, #tpu.memory_space<vmem>>, %arg1: memref<384x128xbf16, #tpu.memory_space<vmem>>, %arg2: memref<1x128xf32, #tpu.memory_space<vmem>>, %arg3: memref<40x128xbf16, #tpu.memory_space<vmem>>) attributes {dimension_semantics = [], scalar_prefetch = 0 : i64, scratch_operands = 0 : i64, tpu.core_type = #tpu.core_type<tc>} {
    %c0 = arith.constant 0 : index
    %c0_0 = arith.constant 0 : index
    %0 = vector.load %arg0[%c0, %c0_0] : memref<40x384xbf16, #tpu.memory_space<vmem>>, vector<40x384xbf16>
    %c0_1 = arith.constant 0 : index
    %c0_2 = arith.constant 0 : index
    %1 = vector.load %arg1[%c0_1, %c0_2] : memref<384x128xbf16, #tpu.memory_space<vmem>>, vector<384x128xbf16>
    %cst = arith.constant dense<0.000000e+00> : vector<40x128xf32>
    %2 = tpu.matmul %0, %1, %cst {dimension_numbers = #tpu.dot_dimension_numbers<[1], [0], [0], [1], [0, 0, 1, 1], [], []>} : vector<40x384xbf16>, vector<384x128xbf16>, vector<40x128xf32> -> vector<40x128xf32>
    %c0_3 = arith.constant 0 : index
    %c0_4 = arith.constant 0 : index
    %3 = vector.load %arg2[%c0_3, %c0_4] : memref<1x128xf32, #tpu.memory_space<vmem>>, vector<1x128xf32>
    %4 = vector.broadcast %3 : vector<1x128xf32> to vector<40x128xf32>
    %5 = arith.addf %2, %4 : vector<40x128xf32>
    %cst_5 = arith.constant 0.000000e+00 : f32
    %6 = vector.broadcast %cst_5 : f32 to vector<40x128xf32>
    %7 = arith.maximumf %5, %6 : vector<40x128xf32>
    %8 = arith.truncf %7 : vector<40x128xf32> to vector<40x128xbf16>
    %c0_6 = arith.constant 0 : index
    %c0_7 = arith.constant 0 : index
    %9 = vector.load %arg3[%c0_6, %c0_7] : memref<40x128xbf16, #tpu.memory_space<vmem>>, vector<40x128xbf16>
    tpu.vector_store %arg3[%c0_6, %c0_7], %8 {strides = array<i32>} : memref<40x128xbf16, #tpu.memory_space<vmem>>, vector<40x128xbf16>,
    return
  }
}

module attributes {stable_mosaic.version = 11 : i64} {
  func.func @_matmul_bias_kernel(%arg0: memref<160x256xbf16, #tpu.memory_space<vmem>>, %arg1: memref<256x128xbf16, #tpu.memory_space<vmem>>, %arg2: memref<1x128xf32, #tpu.memory_space<vmem>>, %arg3: memref<160x128xbf16, #tpu.memory_space<vmem>>) attributes {dimension_semantics = [], scalar_prefetch = 0 : i64, scratch_operands = 0 : i64, tpu.core_type = #tpu.core_type<tc>} {
    %c0 = arith.constant 0 : index
    %c0_0 = arith.constant 0 : index
    %0 = vector.load %arg0[%c0, %c0_0] : memref<160x256xbf16, #tpu.memory_space<vmem>>, vector<160x256xbf16>
    %c0_1 = arith.constant 0 : index
    %c0_2 = arith.constant 0 : index
    %1 = vector.load %arg1[%c0_1, %c0_2] : memref<256x128xbf16, #tpu.memory_space<vmem>>, vector<256x128xbf16>
    %cst = arith.constant dense<0.000000e+00> : vector<160x128xf32>
    %2 = tpu.matmul %0, %1, %cst {dimension_numbers = #tpu.dot_dimension_numbers<[1], [0], [0], [1], [0, 0, 1, 1], [], []>} : vector<160x256xbf16>, vector<256x128xbf16>, vector<160x128xf32> -> vector<160x128xf32>
    %c0_3 = arith.constant 0 : index
    %c0_4 = arith.constant 0 : index
    %3 = vector.load %arg2[%c0_3, %c0_4] : memref<1x128xf32, #tpu.memory_space<vmem>>, vector<1x128xf32>
    %4 = vector.broadcast %3 : vector<1x128xf32> to vector<160x128xf32>
    %5 = arith.addf %2, %4 : vector<160x128xf32>
    %6 = arith.truncf %5 : vector<160x128xf32> to vector<160x128xbf16>
    %c0_5 = arith.constant 0 : index
    %c0_6 = arith.constant 0 : index
    %7 = vector.load %arg3[%c0_5, %c0_6] : memref<160x128xbf16, #tpu.memory_space<vmem>>, vector<160x128xbf16>
    tpu.vector_store %arg3[%c0_5, %c0_6], %6 {strides = array<i32>} : memref<160x128xbf16, #tpu.memory_space<vmem>>, vector<160x128xbf16>,
    return
  }
}

</mosaic_0001>

<bundles_post_ra>
// kernel: autoencoder_forward.8
= control target key start
LH: loop header
LB: loop body
LE: loop exit
PB: predicated region body
PF: predicated region fallthrough
CT: control target
= control target key end

     0   :  { %vm366_vm0 = vcmask 1041408   ;;  %vm269_vm1 = vcmask 293888   ;;  %s1649_s1 = inlined_call_operand.vmem [shape: bf16[36,256], index: 1, kind: input, shape index: {}]   ;;  %s1650_s0 = inlined_call_operand.vmem [shape: bf16[512,36], index: 0, kind: input, shape index: {}]   ;;  %s1651_s2 = inlined_call_operand.vmem [shape: f32[1,256], index: 2, kind: input, shape index: {}]   ;;  %s1652_s3 = inlined_call_operand.vmem [shape: bf16[128,256], index: 3, kind: output, shape index: {}]  }
   0x1   :  { %v83_v0 = vld [vmem:[%s1649_s1 + $0x20] sm:$0x33]  ;;  %v1051_v5 = vld [vmem:[%s1649_s1 + $0x10] sm:$0xf]  ;;  %v1156_v6 = vld [vmem:[%s1649_s1 + $0x14] sm:$0xf0] }
   0x2   :  { %v257_v1 = vunpack.c.l.b16 %v83_v0  ;;  %v258_v2 = vunpack.c.h.b16 %v83_v0  ;;  %v1155_v7 = vld [vmem:[%s1649_s1 + $0x14] sm:$0xf]  ;;  %v1053_v8 = vld [vmem:[%s1649_s1 + $0x18] sm:$0xf0]  ;;  %v1052_v11 = vor.u32 %v1156_v6, %v1051_v5  ;;  %v1043_v13 = vld [vmem:[%s1649_s1] sm:$0xf] }
   0x3   :  { %v1056_v12 = vor.u32 %v1155_v7, %v1053_v8  ;;  %v1154_v14 = vld [vmem:[%s1649_s1 + $0x4] sm:$0xf0]  ;;  %v1153_v15 = vld [vmem:[%s1649_s1 + $0x4] sm:$0xf]  ;;  %v1045_v16 = vld [vmem:[%s1649_s1 + $0x8] sm:$0xf0] }
   0x4   :  { %v263_v3 = vpack.c.b16 %v257_v1, %v257_v1  ;;  %v264_v4 = vpack.c.b16 %v258_v2, %v258_v2  ;;  %v1044_v17 = vor.u32 %v1154_v14, %v1043_v13  ;;  %v1048_v18 = vor.u32 %v1153_v15, %v1045_v16  ;;  %v1121_v19 = vld [vmem:[%s1650_s0] sm:$0xff]  ;;  %v1122_v21 = vld [vmem:[%s1650_s0 + $0x8] sm:$0xff]  ;;  %v1123_v23 = vld [vmem:[%s1650_s0 + $0x10] sm:$0xff] }
   0x5   :  { %v1137_v20 = vld [vmem:[%s1650_s0 + $0x80] sm:$0xff]  ;;  %v1138_v22 = vld [vmem:[%s1650_s0 + $0x88] sm:$0xff]  ;;  %v1139_v24 = vld [vmem:[%s1650_s0 + $0x90] sm:$0xff] }
   0x6   :  { %v368_v9 = vsel %vm366_vm0, %v263_v3, 0  ;;  %v371_v10 = vsel %vm366_vm0, %v264_v4, 0  ;;  %v1124_v25 = vld [vmem:[%s1650_s0 + $0x18] sm:$0xff]  ;;  %v1125_v27 = vld [vmem:[%s1650_s0 + $0x20] sm:$0xff]  ;;  %v1126_v29 = vld [vmem:[%s1650_s0 + $0x28] sm:$0xff] }
   0x7   :  { %378 = vmatpush.bf16.msra.mxu0 %v368_v9  ;;  %1157 = vmatpush.bf16.msra.mxu2 %v368_v9  ;;  %v1140_v26 = vld [vmem:[%s1650_s0 + $0x98] sm:$0xff]  ;;  %v1141_v28 = vld [vmem:[%s1650_s0 + $0xa0] sm:$0xff]  ;;  %v1142_v30 = vld [vmem:[%s1650_s0 + $0xa8] sm:$0xff] }
   0x8   :  { %547 = vmatpush.bf16.msra.mxu1 %v371_v10  ;;  %1160 = vmatpush.bf16.msra.mxu3 %v371_v10  ;;  %v1127_v31 = vld [vmem:[%s1650_s0 + $0x30] sm:$0xff]  ;;  %v1128_v33 = vld [vmem:[%s1650_s0 + $0x38] sm:$0xff]  ;;  %v1129_v35 = vld [vmem:[%s1650_s0 + $0x40] sm:$0xff] }
   0x9   :  { %v1143_v32 = vld [vmem:[%s1650_s0 + $0xb0] sm:$0xff]  ;;  %v1144_v34 = vld [vmem:[%s1650_s0 + $0xb8] sm:$0xff]  ;;  %v1145_v36 = vld [vmem:[%s1650_s0 + $0xc0] sm:$0xff] }
   0xa   :  { %v1130_v45 = vld [vmem:[%s1650_s0 + $0x48] sm:$0xff]  ;;  %v1131_v55 = vld [vmem:[%s1650_s0 + $0x50] sm:$0xff]  ;;  %v1132_v1 = vld [vmem:[%s1650_s0 + $0x58] sm:$0xff] }
   0xb   :  { %379 = vmatpush.bf16.msra.mxu0 %v1052_v11  ;;  %1158 = vmatpush.bf16.msra.mxu2 %v1052_v11  ;;  %v1146_v46 = vld [vmem:[%s1650_s0 + $0xc8] sm:$0xff]  ;;  %v1147_v56 = vld [vmem:[%s1650_s0 + $0xd0] sm:$0xff]  ;;  %v1148_v2 = vld [vmem:[%s1650_s0 + $0xd8] sm:$0xff] }
   0xc   :  { %548 = vmatpush.bf16.msra.mxu1 %v1056_v12  ;;  %1161 = vmatpush.bf16.msra.mxu3 %v1056_v12  ;;  %v1133_v11 = vld [vmem:[%s1650_s0 + $0x60] sm:$0xff] }
   0xd   :  { %v1149_v12 = vld [vmem:[%s1650_s0 + $0xe0] sm:$0xff] }
   0xf   :  { %380 = vmatpush.bf16.msra.mxu0 %v1044_v17  ;;  %1159 = vmatpush.bf16.msra.mxu2 %v1044_v17 }
  0x10   :  { %549 = vmatpush.bf16.msra.mxu1 %v1048_v18  ;;  %1162 = vmatpush.bf16.msra.mxu3 %v1048_v18 }
  0x12   :  { %1057 = vmatmul.msk.bf16.vlgmr.msra.gmra.mxu0 %vm269_vm1, %v1121_v19  ;;  %1073 = vmatmul.msk.bf16.vlgmr.msra.gmra.mxu2 %vm269_vm1, %v1137_v20 }
  0x13   :  { %1089 = vmatmul.msk.bf16.vlgmr.msra.gmra.mxu1 %vm269_vm1, %v1121_v19  ;;  %1105 = vmatmul.msk.bf16.vlgmr.msra.gmra.mxu3 %vm269_vm1, %v1137_v20 }
  0x22   :  { %1058 = vmatmul.msk.bf16.gmra.mxu0 %vm269_vm1, %v1122_v21  ;;  %1074 = vmatmul.msk.bf16.gmra.mxu2 %vm269_vm1, %v1138_v22 }
  0x23   :  { %1090 = vmatmul.msk.bf16.gmra.mxu1 %vm269_vm1, %v1122_v21  ;;  %1106 = vmatmul.msk.bf16.gmra.mxu3 %vm269_vm1, %v1138_v22  ;;  %v1134_v21 = vld [vmem:[%s1650_s0 + $0x68] sm:$0xff] }
  0x24   :  { %v1150_v22 = vld [vmem:[%s1650_s0 + $0xe8] sm:$0xff] }
  0x32   :  { %1059 = vmatmul.msk.bf16.gmra.mxu0 %vm269_vm1, %v1123_v23  ;;  %1075 = vmatmul.msk.bf16.gmra.mxu2 %vm269_vm1, %v1139_v24 }
  0x33   :  { %1091 = vmatmul.msk.bf16.gmra.mxu1 %vm269_vm1, %v1123_v23  ;;  %1107 = vmatmul.msk.bf16.gmra.mxu3 %vm269_vm1, %v1139_v24 }
  0x42   :  { %1060 = vmatmul.msk.bf16.gmra.mxu0 %vm269_vm1, %v1124_v25  ;;  %1076 = vmatmul.msk.bf16.gmra.mxu2 %vm269_vm1, %v1140_v26 }
  0x43   :  { %1092 = vmatmul.msk.bf16.gmra.mxu1 %vm269_vm1, %v1124_v25  ;;  %1108 = vmatmul.msk.bf16.gmra.mxu3 %vm269_vm1, %v1140_v26 }
  0x52   :  { %1061 = vmatmul.msk.bf16.gmra.mxu0 %vm269_vm1, %v1125_v27  ;;  %1077 = vmatmul.msk.bf16.gmra.mxu2 %vm269_vm1, %v1141_v28 }
  0x53   :  { %1093 = vmatmul.msk.bf16.gmra.mxu1 %vm269_vm1, %v1125_v27  ;;  %1109 = vmatmul.msk.bf16.gmra.mxu3 %vm269_vm1, %v1141_v28 }
  0x62   :  { %1062 = vmatmul.msk.bf16.gmra.mxu0 %vm269_vm1, %v1126_v29  ;;  %1078 = vmatmul.msk.bf16.gmra.mxu2 %vm269_vm1, %v1142_v30 }
  0x63   :  { %1094 = vmatmul.msk.bf16.gmra.mxu1 %vm269_vm1, %v1126_v29  ;;  %1110 = vmatmul.msk.bf16.gmra.mxu3 %vm269_vm1, %v1142_v30 }
  0x72   :  { %1063 = vmatmul.msk.bf16.gmra.mxu0 %vm269_vm1, %v1127_v31  ;;  %1079 = vmatmul.msk.bf16.gmra.mxu2 %vm269_vm1, %v1143_v32 }
  0x73   :  { %1095 = vmatmul.msk.bf16.gmra.mxu1 %vm269_vm1, %v1127_v31  ;;  %1111 = vmatmul.msk.bf16.gmra.mxu3 %vm269_vm1, %v1143_v32  ;;  %v1135_v31 = vld [vmem:[%s1650_s0 + $0x70] sm:$0xff] }
  0x74   :  { %v1151_v32 = vld [vmem:[%s1650_s0 + $0xf0] sm:$0xff] }
  0x82   :  { %1064 = vmatmul.msk.bf16.gmra.mxu0 %vm269_vm1, %v1128_v33  ;;  %1080 = vmatmul.msk.bf16.gmra.mxu2 %vm269_vm1, %v1144_v34 }
  0x83   :  { %1096 = vmatmul.msk.bf16.gmra.mxu1 %vm269_vm1, %v1128_v33  ;;  %1112 = vmatmul.msk.bf16.gmra.mxu3 %vm269_vm1, %v1144_v34 }
  0x8f   :  { %v1296_v37 = vpop.f32.mrf.mxu0 }
  0x90   :  { %v1298_v38 = vpop.f32.mrf.mxu1 }
  0x92   :  { %1065 = vmatmul.msk.bf16.gmra.mxu0 %vm269_vm1, %v1129_v35  ;;  %1081 = vmatmul.msk.bf16.gmra.mxu2 %vm269_vm1, %v1145_v36 }
  0x93   :  { %1097 = vmatmul.msk.bf16.gmra.mxu1 %vm269_vm1, %v1129_v35  ;;  %1113 = vmatmul.msk.bf16.gmra.mxu3 %vm269_vm1, %v1145_v36 }
  0x95   :  { %v1304_v39 = vpop.f32.mrf.mxu2 }
  0x96   :  { %v1306_v40 = vpop.f32.mrf.mxu3 }
  0x97   :  { %v1308_v41 = vpop.f32.mrf.mxu0 }
  0x98   :  { %v1310_v42 = vpop.f32.mrf.mxu1 }
  0x9d   :  { %v1312_v43 = vpop.f32.mrf.mxu2 }
  0x9e   :  { %v1314_v44 = vpop.f32.mrf.mxu3 }
  0x9f   :  { %v1322_v47 = vpop.f32.mrf.mxu0 }
  0xa0   :  { %v1324_v48 = vpop.f32.mrf.mxu1 }
  0xa2   :  { %1066 = vmatmul.msk.bf16.gmra.mxu0 %vm269_vm1, %v1130_v45  ;;  %1082 = vmatmul.msk.bf16.gmra.mxu2 %vm269_vm1, %v1146_v46 }
  0xa3   :  { %1098 = vmatmul.msk.bf16.gmra.mxu1 %vm269_vm1, %v1130_v45  ;;  %1114 = vmatmul.msk.bf16.gmra.mxu3 %vm269_vm1, %v1146_v46 }
  0xa5   :  { %v1330_v49 = vpop.f32.mrf.mxu2 }
  0xa6   :  { %v1332_v50 = vpop.f32.mrf.mxu3 }
  0xa7   :  { %v1334_v51 = vpop.f32.mrf.mxu0 }
  0xa8   :  { %v1336_v52 = vpop.f32.mrf.mxu1 }
  0xad   :  { %v1338_v53 = vpop.f32.mrf.mxu2 }
  0xae   :  { %v1340_v54 = vpop.f32.mrf.mxu3 }
  0xaf   :  { %v1348_v57 = vpop.f32.mrf.mxu0 }
  0xb0   :  { %v1350_v58 = vpop.f32.mrf.mxu1 }
  0xb2   :  { %1067 = vmatmul.msk.bf16.gmra.mxu0 %vm269_vm1, %v1131_v55  ;;  %1083 = vmatmul.msk.bf16.gmra.mxu2 %vm269_vm1, %v1147_v56 }
  0xb3   :  { %1099 = vmatmul.msk.bf16.gmra.mxu1 %vm269_vm1, %v1131_v55  ;;  %1115 = vmatmul.msk.bf16.gmra.mxu3 %vm269_vm1, %v1147_v56 }
  0xb5   :  { %v1356_v59 = vpop.f32.mrf.mxu2 }
  0xb6   :  { %v1358_v60 = vpop.f32.mrf.mxu3 }
  0xb7   :  { %v1360_v61 = vpop.f32.mrf.mxu0 }
  0xb8   :  { %v1362_v62 = vpop.f32.mrf.mxu1 }
  0xbd   :  { %v1364_v63 = vpop.f32.mrf.mxu2 }
  0xbe   :  { %v1366_v0 = vpop.f32.mrf.mxu3 }
  0xbf   :  { %v1374_v3 = vpop.f32.mrf.mxu0 }
  0xc0   :  { %v1376_v4 = vpop.f32.mrf.mxu1 }
  0xc2   :  { %1068 = vmatmul.msk.bf16.gmra.mxu0 %vm269_vm1, %v1132_v1  ;;  %1084 = vmatmul.msk.bf16.gmra.mxu2 %vm269_vm1, %v1148_v2 }
  0xc3   :  { %1100 = vmatmul.msk.bf16.gmra.mxu1 %vm269_vm1, %v1132_v1  ;;  %1116 = vmatmul.msk.bf16.gmra.mxu3 %vm269_vm1, %v1148_v2  ;;  %v1136_v1 = vld [vmem:[%s1650_s0 + $0x78] sm:$0xff] }
  0xc4   :  { %v1152_v2 = vld [vmem:[%s1650_s0 + $0xf8] sm:$0xff] }
  0xc5   :  { %v1382_v5 = vpop.f32.mrf.mxu2 }
  0xc6   :  { %v1384_v6 = vpop.f32.mrf.mxu3 }
  0xc7   :  { %v1386_v7 = vpop.f32.mrf.mxu0 }
  0xc8   :  { %v1388_v8 = vpop.f32.mrf.mxu1 }
  0xcd   :  { %v1390_v9 = vpop.f32.mrf.mxu2 }
  0xce   :  { %v1392_v10 = vpop.f32.mrf.mxu3 }
  0xcf   :  { %v1400_v13 = vpop.f32.mrf.mxu0 }
  0xd0   :  { %v1402_v14 = vpop.f32.mrf.mxu1 }
  0xd2   :  { %1069 = vmatmul.msk.bf16.gmra.mxu0 %vm269_vm1, %v1133_v11  ;;  %1085 = vmatmul.msk.bf16.gmra.mxu2 %vm269_vm1, %v1149_v12 }
  0xd3   :  { %1101 = vmatmul.msk.bf16.gmra.mxu1 %vm269_vm1, %v1133_v11  ;;  %1117 = vmatmul.msk.bf16.gmra.mxu3 %vm269_vm1, %v1149_v12 }
  0xd5   :  { %v1408_v15 = vpop.f32.mrf.mxu2 }
  0xd6   :  { %v1410_v16 = vpop.f32.mrf.mxu3 }
  0xd7   :  { %v1412_v17 = vpop.f32.mrf.mxu0 }
  0xd8   :  { %v1414_v18 = vpop.f32.mrf.mxu1 }
  0xdd   :  { %v1416_v19 = vpop.f32.mrf.mxu2 }
  0xde   :  { %v1418_v20 = vpop.f32.mrf.mxu3 }
  0xdf   :  { %v1426_v23 = vpop.f32.mrf.mxu0 }
  0xe0   :  { %v1428_v24 = vpop.f32.mrf.mxu1 }
  0xe2   :  { %1070 = vmatmul.msk.bf16.gmra.mxu0 %vm269_vm1, %v1134_v21  ;;  %1086 = vmatmul.msk.bf16.gmra.mxu2 %vm269_vm1, %v1150_v22 }
  0xe3   :  { %1102 = vmatmul.msk.bf16.gmra.mxu1 %vm269_vm1, %v1134_v21  ;;  %1118 = vmatmul.msk.bf16.gmra.mxu3 %vm269_vm1, %v1150_v22 }
  0xe5   :  { %v1434_v25 = vpop.f32.mrf.mxu2 }
  0xe6   :  { %v1436_v26 = vpop.f32.mrf.mxu3 }
  0xe7   :  { %v1438_v27 = vpop.f32.mrf.mxu0 }
  0xe8   :  { %v1440_v28 = vpop.f32.mrf.mxu1 }
  0xe9   :  { %1653 = vst [vmem:[#allocation2_spill] sm:$0xff] %v1440_v28 }
  0xed   :  { %v1442_v29 = vpop.f32.mrf.mxu2 }
  0xee   :  { %v1444_v30 = vpop.f32.mrf.mxu3 }
  0xef   :  { %1654 = vst [vmem:[#allocation3_spill] sm:$0xff] %v1444_v30  ;;  %v1452_v33 = vpop.f32.mrf.mxu0 }
  0xf0   :  { %1655 = vst [vmem:[#allocation4_spill] sm:$0xff] %v1452_v33  ;;  %v1454_v34 = vpop.f32.mrf.mxu1 }
  0xf1   :  { %1656 = vst [vmem:[#allocation5_spill] sm:$0xff] %v1454_v34 }
  0xf2   :  { %1071 = vmatmul.msk.bf16.gmra.mxu0 %vm269_vm1, %v1135_v31  ;;  %1087 = vmatmul.msk.bf16.gmra.mxu2 %vm269_vm1, %v1151_v32 }
  0xf3   :  { %1103 = vmatmul.msk.bf16.gmra.mxu1 %vm269_vm1, %v1135_v31  ;;  %1119 = vmatmul.msk.bf16.gmra.mxu3 %vm269_vm1, %v1151_v32 }
  0xf5   :  { %v1460_v35 = vpop.f32.mrf.mxu2 }
  0xf6   :  { %1657 = vst [vmem:[#allocation6_spill] sm:$0xff] %v1460_v35  ;;  %v1462_v36 = vpop.f32.mrf.mxu3 }
  0xf7   :  { %1658 = vst [vmem:[#allocation7_spill] sm:$0xff] %v1462_v36  ;;  %v1464_v45 = vpop.f32.mrf.mxu0 }
  0xf8   :  { %1659 = vst [vmem:[#allocation8_spill] sm:$0xff] %v1464_v45  ;;  %v1466_v46 = vpop.f32.mrf.mxu1 }
  0xf9   :  { %1660 = vst [vmem:[#allocation9_spill] sm:$0xff] %v1466_v46 }
  0xfd   :  { %v1468_v55 = vpop.f32.mrf.mxu2 }
  0xfe   :  { %1661 = vst [vmem:[#allocation10_spill] sm:$0xff] %v1468_v55  ;;  %v1470_v56 = vpop.f32.mrf.mxu3 }
  0xff   :  { %1662 = vst [vmem:[#allocation11_spill] sm:$0xff] %v1470_v56  ;;  %v1478_v11 = vpop.f32.mrf.mxu0 }
 0x100   :  { %1663 = vst [vmem:[#allocation12_spill] sm:$0xff] %v1478_v11  ;;  %v1480_v12 = vpop.f32.mrf.mxu1 }
 0x101   :  { %1664 = vst [vmem:[#allocation13_spill] sm:$0xff] %v1480_v12 }
 0x102   :  { %1072 = vmatmul.msk.bf16.gmra.mxu0 %vm269_vm1, %v1136_v1  ;;  %1088 = vmatmul.msk.bf16.gmra.mxu2 %vm269_vm1, %v1152_v2 }
 0x103   :  { %1104 = vmatmul.msk.bf16.gmra.mxu1 %vm269_vm1, %v1136_v1  ;;  %1120 = vmatmul.msk.bf16.gmra.mxu3 %vm269_vm1, %v1152_v2  ;;  %v807_v1 = vld [vmem:[%s1651_s2] sm:$0x3] }
 0x104   :  { %v1507_v45 = vperm.slane %v807_v1, 1 }
 0x105   :  { %v1486_v21 = vpop.f32.mrf.mxu2 }
 0x106   :  { %1665 = vst [vmem:[#allocation14_spill] sm:$0xff] %v1486_v21  ;;  %v1488_v22 = vpop.f32.mrf.mxu3 }
 0x107   :  { %1666 = vst [vmem:[#allocation15_spill] sm:$0xff] %v1488_v22  ;;  %v1490_v31 = vpop.f32.mrf.mxu0  ;;  %v1503_v22 = vperm.slane %v807_v1, 0 }
 0x108   :  { %1667 = vst [vmem:[#allocation16_spill] sm:$0xff] %v1490_v31  ;;  %v1492_v32 = vpop.f32.mrf.mxu1 }
 0x109   :  { %1668 = vst [vmem:[#allocation17_spill] sm:$0xff] %v1492_v32 }
 0x10d   :  { %v1494_v56 = vpop.f32.mrf.mxu2 }
 0x10e   :  { %1669 = vst [vmem:[#allocation18_spill] sm:$0xff] %v1494_v56  ;;  %v1496_v11 = vpop.f32.mrf.mxu3 }
 0x10f   :  { %1670 = vst [vmem:[#allocation19_spill] sm:$0xff] %v1496_v11  ;;  %v422_v12 = vpop.f32.mrf.mxu0 }
 0x110   :  { %v591_v46 = vpop.f32.mrf.mxu1  ;;  %v711_v2 = vmax.f32 %v1296_v37, %v422_v12 }
 0x111   :  { %v712_v32 = vmax.f32 %v1298_v38, %v591_v46 }
 0x115   :  { %v502_v55 = vpop.f32.mrf.mxu2 }
 0x116   :  { %v743_v21 = vmax.f32 %v1304_v39, %v502_v55  ;;  %v671_v31 = vpop.f32.mrf.mxu3 }
 0x117   :  { %v744_v56 = vmax.f32 %v1306_v40, %v671_v31  ;;  %v424_v11 = vpop.f32.mrf.mxu0 }
 0x118   :  { %v775_v36 = vmax.f32 %v711_v2, %v743_v21  ;;  %v593_v34 = vpop.f32.mrf.mxu1  ;;  %v713_v55 = vmax.f32 %v1308_v41, %v424_v11 }
 0x119   :  { %v776_v35 = vmax.f32 %v712_v32, %v744_v56  ;;  %v714_v40 = vmax.f32 %v1310_v42, %v593_v34 }
 0x11a   :  { %v813_v33 = vadd.f32 %v1503_v22, %v775_v36 }
 0x11b   :  { %v814_v30 = vadd.f32 %v1507_v45, %v776_v35 }
 0x11c   :  { %v845_v37 = vmax.f32 %v813_v33, 0.0 }
 0x11d   :  { %v846_v12 = vmax.f32 %v814_v30, 0.0  ;;  %v504_v39 = vpop.f32.mrf.mxu2 }
 0x11e   :  { %v745_v28 = vmax.f32 %v1312_v43, %v504_v39  ;;  %v673_v38 = vpop.f32.mrf.mxu3 }
 0x11f   :  { %v877_v46 = vpack.c.bf16 %v846_v12, %v845_v37  ;;  %v746_v31 = vmax.f32 %v1314_v44, %v673_v38  ;;  %v427_v21 = vpop.f32.mrf.mxu0 }
 0x120   :  { %v777_v1 = vmax.f32 %v713_v55, %v745_v28  ;;  %v596_v56 = vpop.f32.mrf.mxu1  ;;  %v715_v11 = vmax.f32 %v1322_v47, %v427_v21 }
 0x121   :  { %893 = vst [vmem:[%s1652_s3] sm:$0xff] %v877_v46  ;;  %v778_v33 = vmax.f32 %v714_v40, %v746_v31  ;;  %v716_v28 = vmax.f32 %v1324_v48, %v596_v56 }
 0x122   :  { %v815_v30 = vadd.f32 %v1503_v22, %v777_v1 }
 0x123   :  { %v816_v41 = vadd.f32 %v1507_v45, %v778_v33 }
 0x124   :  { %v847_v35 = vmax.f32 %v815_v30, 0.0 }
 0x125   :  { %v848_v43 = vmax.f32 %v816_v41, 0.0  ;;  %v507_v36 = vpop.f32.mrf.mxu2 }
 0x126   :  { %v747_v42 = vmax.f32 %v1330_v49, %v507_v36  ;;  %v676_v44 = vpop.f32.mrf.mxu3 }
 0x127   :  { %v878_v34 = vpack.c.bf16 %v848_v43, %v847_v35  ;;  %v748_v32 = vmax.f32 %v1332_v50, %v676_v44  ;;  %v429_v2 = vpop.f32.mrf.mxu0 }
 0x128   :  { %v779_v37 = vmax.f32 %v715_v11, %v747_v42  ;;  %v598_v12 = vpop.f32.mrf.mxu1  ;;  %v717_v40 = vmax.f32 %v1334_v51, %v429_v2 }
 0x129   :  { %894 = vst [vmem:[%s1652_s3 + $0x8] sm:$0xff] %v878_v34  ;;  %v780_v39 = vmax.f32 %v716_v28, %v748_v32  ;;  %v718_v21 = vmax.f32 %v1336_v52, %v598_v12 }
 0x12a   :  { %v817_v55 = vadd.f32 %v1503_v22, %v779_v37 }
 0x12b   :  { %v818_v47 = vadd.f32 %v1507_v45, %v780_v39 }
 0x12c   :  { %v849_v38 = vmax.f32 %v817_v55, 0.0 }
 0x12d   :  { %v850_v49 = vmax.f32 %v818_v47, 0.0  ;;  %v509_v46 = vpop.f32.mrf.mxu2 }
 0x12e   :  { %v749_v48 = vmax.f32 %v1338_v53, %v509_v46  ;;  %v678_v50 = vpop.f32.mrf.mxu3 }
 0x12f   :  { %v879_v31 = vpack.c.bf16 %v850_v49, %v849_v38  ;;  %v750_v1 = vmax.f32 %v1340_v54, %v678_v50  ;;  %v432_v56 = vpop.f32.mrf.mxu0 }
 0x130   :  { %v781_v33 = vmax.f32 %v717_v40, %v749_v48  ;;  %v601_v30 = vpop.f32.mrf.mxu1  ;;  %v719_v11 = vmax.f32 %v1348_v57, %v432_v56 }
 0x131   :  { %895 = vst [vmem:[%s1652_s3 + $0x10] sm:$0xff] %v879_v31  ;;  %v782_v41 = vmax.f32 %v718_v21, %v750_v1  ;;  %v720_v44 = vmax.f32 %v1350_v58, %v601_v30 }
 0x132   :  { %v819_v35 = vadd.f32 %v1503_v22, %v781_v33 }
 0x133   :  { %v820_v51 = vadd.f32 %v1507_v45, %v782_v41 }
 0x134   :  { %v851_v43 = vmax.f32 %v819_v35, 0.0 }
 0x135   :  { %v852_v53 = vmax.f32 %v820_v51, 0.0  ;;  %v512_v36 = vpop.f32.mrf.mxu2 }
 0x136   :  { %v751_v52 = vmax.f32 %v1356_v59, %v512_v36  ;;  %v681_v54 = vpop.f32.mrf.mxu3 }
 0x137   :  { %v880_v42 = vpack.c.bf16 %v852_v53, %v851_v43  ;;  %v752_v34 = vmax.f32 %v1358_v60, %v681_v54  ;;  %v434_v28 = vpop.f32.mrf.mxu0 }
 0x138   :  { %v783_v32 = vmax.f32 %v719_v11, %v751_v52  ;;  %v603_v2 = vpop.f32.mrf.mxu1  ;;  %v721_v47 = vmax.f32 %v1360_v61, %v434_v28 }
 0x139   :  { %896 = vst [vmem:[%s1652_s3 + $0x18] sm:$0xff] %v880_v42  ;;  %v784_v37 = vmax.f32 %v720_v44, %v752_v34  ;;  %v722_v49 = vmax.f32 %v1362_v62, %v603_v2 }
 0x13a   :  { %v821_v12 = vadd.f32 %v1503_v22, %v783_v32 }
 0x13b   :  { %v822_v57 = vadd.f32 %v1507_v45, %v784_v37 }
 0x13c   :  { %v853_v39 = vmax.f32 %v821_v12, 0.0 }
 0x13d   :  { %v854_v59 = vmax.f32 %v822_v57, 0.0  ;;  %v514_v55 = vpop.f32.mrf.mxu2 }
 0x13e   :  { %v753_v58 = vmax.f32 %v1364_v63, %v514_v55  ;;  %v683_v60 = vpop.f32.mrf.mxu3 }
 0x13f   :  { %v881_v38 = vpack.c.bf16 %v854_v59, %v853_v39  ;;  %v754_v46 = vmax.f32 %v1366_v0, %v683_v60  ;;  %v437_v40 = vpop.f32.mrf.mxu0 }
 0x140   :  { %v785_v48 = vmax.f32 %v721_v47, %v753_v58  ;;  %v606_v50 = vpop.f32.mrf.mxu1  ;;  %v723_v33 = vmax.f32 %v1374_v3, %v437_v40 }
 0x141   :  { %897 = vst [vmem:[%s1652_s3 + $0x20] sm:$0xff] %v881_v38  ;;  %v786_v31 = vmax.f32 %v722_v49, %v754_v46  ;;  %v724_v41 = vmax.f32 %v1376_v4, %v606_v50 }
 0x142   :  { %v823_v21 = vadd.f32 %v1503_v22, %v785_v48 }
 0x143   :  { %v824_v61 = vadd.f32 %v1507_v45, %v786_v31 }
 0x144   :  { %v855_v1 = vmax.f32 %v823_v21, 0.0 }
 0x145   :  { %v856_v63 = vmax.f32 %v824_v61, 0.0  ;;  %v517_v56 = vpop.f32.mrf.mxu2 }
 0x146   :  { %v755_v62 = vmax.f32 %v1382_v5, %v517_v56  ;;  %v686_v0 = vpop.f32.mrf.mxu3 }
 0x147   :  { %v882_v30 = vpack.c.bf16 %v856_v63, %v855_v1  ;;  %v756_v35 = vmax.f32 %v1384_v6, %v686_v0  ;;  %v439_v51 = vpop.f32.mrf.mxu0 }
 0x148   :  { %v787_v43 = vmax.f32 %v723_v33, %v755_v62  ;;  %v608_v53 = vpop.f32.mrf.mxu1  ;;  %v725_v42 = vmax.f32 %v1386_v7, %v439_v51 }
 0x149   :  { %898 = vst [vmem:[%s1652_s3 + $0x28] sm:$0xff] %v882_v30  ;;  %v788_v36 = vmax.f32 %v724_v41, %v756_v35  ;;  %v726_v34 = vmax.f32 %v1388_v8, %v608_v53 }
 0x14a   :  { %v825_v11 = vadd.f32 %v1503_v22, %v787_v43 }
 0x14b   :  { %v826_v3 = vadd.f32 %v1507_v45, %v788_v36 }
 0x14c   :  { %v857_v52 = vmax.f32 %v825_v11, 0.0 }
 0x14d   :  { %v858_v5 = vmax.f32 %v826_v3, 0.0  ;;  %v519_v54 = vpop.f32.mrf.mxu2 }
 0x14e   :  { %v757_v4 = vmax.f32 %v1390_v9, %v519_v54  ;;  %v688_v6 = vpop.f32.mrf.mxu3 }
 0x14f   :  { %v883_v44 = vpack.c.bf16 %v858_v5, %v857_v52  ;;  %v758_v28 = vmax.f32 %v1392_v10, %v688_v6  ;;  %v442_v32 = vpop.f32.mrf.mxu0 }
 0x150   :  { %v789_v2 = vmax.f32 %v725_v42, %v757_v4  ;;  %v611_v37 = vpop.f32.mrf.mxu1  ;;  %v727_v55 = vmax.f32 %v1400_v13, %v442_v32  ;;  %v1672_v32 = vld [vmem:[#allocation3_spill] sm:$0xff] }
 0x151   :  { %899 = vst [vmem:[%s1652_s3 + $0x30] sm:$0xff] %v883_v44  ;;  %v790_v12 = vmax.f32 %v726_v34, %v758_v28  ;;  %v728_v58 = vmax.f32 %v1402_v14, %v611_v37  ;;  %v1671_v34 = vld [vmem:[#allocation2_spill] sm:$0xff] }
 0x152   :  { %v827_v57 = vadd.f32 %v1503_v22, %v789_v2 }
 0x153   :  { %v828_v7 = vadd.f32 %v1507_v45, %v790_v12 }
 0x154   :  { %v859_v39 = vmax.f32 %v827_v57, 0.0 }
 0x155   :  { %v860_v9 = vmax.f32 %v828_v7, 0.0  ;;  %v522_v59 = vpop.f32.mrf.mxu2 }
 0x156   :  { %v759_v8 = vmax.f32 %v1408_v15, %v522_v59  ;;  %v691_v10 = vpop.f32.mrf.mxu3 }
 0x157   :  { %v884_v47 = vpack.c.bf16 %v860_v9, %v859_v39  ;;  %v760_v60 = vmax.f32 %v1410_v16, %v691_v10  ;;  %v444_v38 = vpop.f32.mrf.mxu0  ;;  %v1674_v10 = vld [vmem:[#allocation6_spill] sm:$0xff] }
 0x158   :  { %v791_v49 = vmax.f32 %v727_v55, %v759_v8  ;;  %v613_v46 = vpop.f32.mrf.mxu1  ;;  %v729_v21 = vmax.f32 %v1412_v17, %v444_v38  ;;  %v1673_v55 = vld [vmem:[#allocation4_spill] sm:$0xff]  ;;  %v1675_v38 = vld [vmem:[#allocation5_spill] sm:$0xff] }
 0x159   :  { %900 = vst [vmem:[%s1652_s3 + $0x38] sm:$0xff] %v884_v47  ;;  %v792_v40 = vmax.f32 %v728_v58, %v760_v60  ;;  %v730_v1 = vmax.f32 %v1414_v18, %v613_v46  ;;  %v1676_v46 = vld [vmem:[#allocation7_spill] sm:$0xff] }
 0x15a   :  { %v829_v48 = vadd.f32 %v1503_v22, %v791_v49 }
 0x15b   :  { %v830_v13 = vadd.f32 %v1507_v45, %v792_v40 }
 0x15c   :  { %v861_v50 = vmax.f32 %v829_v48, 0.0 }
 0x15d   :  { %v862_v15 = vmax.f32 %v830_v13, 0.0  ;;  %v524_v31 = vpop.f32.mrf.mxu2 }
 0x15e   :  { %v761_v14 = vmax.f32 %v1416_v19, %v524_v31  ;;  %v693_v16 = vpop.f32.mrf.mxu3 }
 0x15f   :  { %v885_v61 = vpack.c.bf16 %v862_v15, %v861_v50  ;;  %v762_v63 = vmax.f32 %v1418_v20, %v693_v16  ;;  %v447_v56 = vpop.f32.mrf.mxu0 }
 0x160   :  { %v793_v33 = vmax.f32 %v729_v21, %v761_v14  ;;  %v616_v62 = vpop.f32.mrf.mxu1  ;;  %v731_v51 = vmax.f32 %v1426_v23, %v447_v56  ;;  %v1678_v56 = vld [vmem:[#allocation10_spill] sm:$0xff] }
 0x161   :  { %901 = vst [vmem:[%s1652_s3 + $0x40] sm:$0xff] %v885_v61  ;;  %v794_v0 = vmax.f32 %v730_v1, %v762_v63  ;;  %v732_v53 = vmax.f32 %v1428_v24, %v616_v62  ;;  %v1677_v1 = vld [vmem:[#allocation8_spill] sm:$0xff] }
 0x162   :  { %v831_v30 = vadd.f32 %v1503_v22, %v793_v33 }
 0x163   :  { %v832_v17 = vadd.f32 %v1507_v45, %v794_v0 }
 0x164   :  { %v863_v41 = vmax.f32 %v831_v30, 0.0  ;;  %v1679_v30 = vld [vmem:[#allocation9_spill] sm:$0xff] }
 0x165   :  { %v864_v19 = vmax.f32 %v832_v17, 0.0  ;;  %v527_v35 = vpop.f32.mrf.mxu2 }
 0x166   :  { %v763_v18 = vmax.f32 %v1434_v25, %v527_v35  ;;  %v696_v20 = vpop.f32.mrf.mxu3 }
 0x167   :  { %v886_v43 = vpack.c.bf16 %v864_v19, %v863_v41  ;;  %v764_v36 = vmax.f32 %v1436_v26, %v696_v20  ;;  %v449_v11 = vpop.f32.mrf.mxu0  ;;  %v1680_v41 = vld [vmem:[#allocation11_spill] sm:$0xff] }
 0x168   :  { %v795_v3 = vmax.f32 %v731_v51, %v763_v18  ;;  %v618_v52 = vpop.f32.mrf.mxu1  ;;  %v733_v6 = vmax.f32 %v1438_v27, %v449_v11 }
 0x169   :  { %902 = vst [vmem:[%s1652_s3 + $0x48] sm:$0xff] %v886_v43  ;;  %v796_v5 = vmax.f32 %v732_v53, %v764_v36  ;;  %v734_v28 = vmax.f32 %v1671_v34, %v618_v52  ;;  %v1681_v52 = vld [vmem:[#allocation12_spill] sm:$0xff] }
 0x16a   :  { %v833_v54 = vadd.f32 %v1503_v22, %v795_v3 }
 0x16b   :  { %v834_v23 = vadd.f32 %v1507_v45, %v796_v5 }
 0x16c   :  { %v865_v42 = vmax.f32 %v833_v54, 0.0  ;;  %v1682_v54 = vld [vmem:[#allocation14_spill] sm:$0xff] }
 0x16d   :  { %v866_v25 = vmax.f32 %v834_v23, 0.0  ;;  %v529_v4 = vpop.f32.mrf.mxu2 }
 0x16e   :  { %v765_v24 = vmax.f32 %v1442_v29, %v529_v4  ;;  %v698_v26 = vpop.f32.mrf.mxu3  ;;  %v1683_v4 = vld [vmem:[#allocation13_spill] sm:$0xff] }
 0x16f   :  { %v887_v44 = vpack.c.bf16 %v866_v25, %v865_v42  ;;  %v766_v2 = vmax.f32 %v1672_v32, %v698_v26  ;;  %v452_v37 = vpop.f32.mrf.mxu0 }
 0x170   :  { %v797_v12 = vmax.f32 %v733_v6, %v765_v24  ;;  %v621_v57 = vpop.f32.mrf.mxu1  ;;  %v735_v8 = vmax.f32 %v1673_v55, %v452_v37  ;;  %v1684_v24 = vld [vmem:[#allocation15_spill] sm:$0xff] }
 0x171   :  { %903 = vst [vmem:[%s1652_s3 + $0x50] sm:$0xff] %v887_v44  ;;  %v798_v7 = vmax.f32 %v734_v28, %v766_v2  ;;  %v736_v49 = vmax.f32 %v1675_v38, %v621_v57 }
 0x172   :  { %v835_v39 = vadd.f32 %v1503_v22, %v797_v12 }
 0x173   :  { %v836_v27 = vadd.f32 %v1507_v45, %v798_v7 }
 0x174   :  { %v867_v9 = vmax.f32 %v835_v39, 0.0  ;;  %v1685_v39 = vld [vmem:[#allocation16_spill] sm:$0xff] }
 0x175   :  { %v868_v29 = vmax.f32 %v836_v27, 0.0  ;;  %v532_v59 = vpop.f32.mrf.mxu2 }
 0x176   :  { %v767_v47 = vmax.f32 %v1674_v10, %v532_v59  ;;  %v701_v58 = vpop.f32.mrf.mxu3 }
 0x177   :  { %v888_v60 = vpack.c.bf16 %v868_v29, %v867_v9  ;;  %v768_v40 = vmax.f32 %v1676_v46, %v701_v58  ;;  %v454_v48 = vpop.f32.mrf.mxu0  ;;  %v1686_v9 = vld [vmem:[#allocation18_spill] sm:$0xff] }
 0x178   :  { %v799_v13 = vmax.f32 %v735_v8, %v767_v47  ;;  %v623_v50 = vpop.f32.mrf.mxu1  ;;  %v737_v63 = vmax.f32 %v1677_v1, %v454_v48  ;;  %v1687_v8 = vld [vmem:[#allocation17_spill] sm:$0xff]  ;;  %v1688_v47 = vld [vmem:[#allocation19_spill] sm:$0xff] }
 0x179   :  { %904 = vst [vmem:[%s1652_s3 + $0x58] sm:$0xff] %v888_v60  ;;  %v800_v15 = vmax.f32 %v736_v49, %v768_v40  ;;  %v738_v17 = vmax.f32 %v1679_v30, %v623_v50 }
 0x17a   :  { %v837_v31 = vadd.f32 %v1503_v22, %v799_v13 }
 0x17b   :  { %v838_v21 = vadd.f32 %v1507_v45, %v800_v15 }
 0x17c   :  { %v869_v14 = vmax.f32 %v837_v31, 0.0 }
 0x17d   :  { %v870_v16 = vmax.f32 %v838_v21, 0.0  ;;  %v534_v61 = vpop.f32.mrf.mxu2 }
 0x17e   :  { %v769_v33 = vmax.f32 %v1678_v56, %v534_v61  ;;  %v703_v62 = vpop.f32.mrf.mxu3 }
 0x17f   :  { %v889_v0 = vpack.c.bf16 %v870_v16, %v869_v14  ;;  %v770_v19 = vmax.f32 %v1680_v41, %v703_v62  ;;  %v457_v18 = vpop.f32.mrf.mxu0 }
 0x180   :  { %v801_v35 = vmax.f32 %v737_v63, %v769_v33  ;;  %v626_v43 = vpop.f32.mrf.mxu1  ;;  %v739_v5 = vmax.f32 %v1681_v52, %v457_v18 }
 0x181   :  { %905 = vst [vmem:[%s1652_s3 + $0x60] sm:$0xff] %v889_v0  ;;  %v802_v51 = vmax.f32 %v738_v17, %v770_v19  ;;  %v740_v6 = vmax.f32 %v1683_v4, %v626_v43 }
 0x182   :  { %v839_v20 = vadd.f32 %v1503_v22, %v801_v35 }
 0x183   :  { %v840_v53 = vadd.f32 %v1507_v45, %v802_v51 }
 0x184   :  { %v871_v36 = vmax.f32 %v839_v20, 0.0 }
 0x185   :  { %v872_v11 = vmax.f32 %v840_v53, 0.0  ;;  %v537_v3 = vpop.f32.mrf.mxu2 }
 0x186   :  { %v771_v23 = vmax.f32 %v1682_v54, %v537_v3  ;;  %v706_v42 = vpop.f32.mrf.mxu3 }
 0x187   :  { %v890_v25 = vpack.c.bf16 %v872_v11, %v871_v36  ;;  %v772_v26 = vmax.f32 %v1684_v24, %v706_v42  ;;  %v459_v2 = vpop.f32.mrf.mxu0 }
 0x188   :  { %v803_v44 = vmax.f32 %v739_v5, %v771_v23  ;;  %v628_v12 = vpop.f32.mrf.mxu1  ;;  %v741_v27 = vmax.f32 %v1685_v39, %v459_v2 }
 0x189   :  { %906 = vst [vmem:[%s1652_s3 + $0x68] sm:$0xff] %v890_v25  ;;  %v804_v34 = vmax.f32 %v740_v6, %v772_v26  ;;  %v742_v10 = vmax.f32 %v1687_v8, %v628_v12 }
 0x18a   :  { %v841_v28 = vadd.f32 %v1503_v22, %v803_v44 }
 0x18b   :  { %v842_v32 = vadd.f32 %v1507_v45, %v804_v34 }
 0x18c   :  { %v873_v37 = vmax.f32 %v841_v28, 0.0 }
 0x18d   :  { %v874_v57 = vmax.f32 %v842_v32, 0.0  ;;  %v539_v7 = vpop.f32.mrf.mxu2 }
 0x18e   :  { %v773_v29 = vmax.f32 %v1686_v9, %v539_v7  ;;  %v708_v59 = vpop.f32.mrf.mxu3 }
 0x18f   :  { %v891_v55 = vpack.c.bf16 %v874_v57, %v873_v37  ;;  %v774_v58 = vmax.f32 %v1688_v47, %v708_v59 }
 0x190   :  { %v805_v60 = vmax.f32 %v741_v27, %v773_v29 }
 0x191   :  { %907 = vst [vmem:[%s1652_s3 + $0x70] sm:$0xff] %v891_v55  ;;  %v806_v38 = vmax.f32 %v742_v10, %v774_v58 }
 0x192   :  { %v843_v49 = vadd.f32 %v1503_v22, %v805_v60 }
 0x193   :  { %v844_v46 = vadd.f32 %v1507_v45, %v806_v38 }
 0x194   :  { %v875_v40 = vmax.f32 %v843_v49, 0.0 }
 0x195   :  { %v876_v48 = vmax.f32 %v844_v46, 0.0 }
 0x197   :  { %v892_v13 = vpack.c.bf16 %v876_v48, %v875_v40 }
 0x199   :  { %908 = vst [vmem:[%s1652_s3 + $0x78] sm:$0xff] %v892_v13 }

// kernel: autoencoder_forward.9
= control target key start
LH: loop header
LB: loop body
LE: loop exit
PB: predicated region body
PF: predicated region fallthrough
CT: control target
= control target key end

     0   :  { %s5969_s1 = inlined_call_operand.vmem [shape: bf16[2304,128], index: 1, kind: input, shape index: {}]   ;;  %s5970_s0 = inlined_call_operand.vmem [shape: bf16[128,2304], index: 0, kind: input, shape index: {}]   ;;  %s5971_s2 = inlined_call_operand.vmem [shape: f32[1,128], index: 2, kind: input, shape index: {}]   ;;  %s5972_s3 = inlined_call_operand.vmem [shape: bf16[32,128], index: 3, kind: output, shape index: {}]  }
   0x1   :  { %v4251_v0 = vld [vmem:[%s5969_s1 + $0x38] sm:$0xff]  ;;  %v4250_v2 = vld [vmem:[%s5969_s1 + $0x30] sm:$0xff]  ;;  %v4249_v4 = vld [vmem:[%s5969_s1 + $0x28] sm:$0xff] }
   0x2   :  { %v4259_v1 = vld [vmem:[%s5969_s1 + $0x78] sm:$0xff]  ;;  %4399 = vmatpush.bf16.msra.mxu2 %v4251_v0  ;;  %v4258_v3 = vld [vmem:[%s5969_s1 + $0x70] sm:$0xff]  ;;  %2030 = vmatpush.bf16.msra.mxu0 %v4251_v0  ;;  %v4257_v5 = vld [vmem:[%s5969_s1 + $0x68] sm:$0xff] }
   0x3   :  { %4407 = vmatpush.bf16.msra.mxu3 %v4259_v1  ;;  %2079 = vmatpush.bf16.msra.mxu1 %v4259_v1  ;;  %v4248_v6 = vld [vmem:[%s5969_s1 + $0x20] sm:$0xff]  ;;  %v4247_v8 = vld [vmem:[%s5969_s1 + $0x18] sm:$0xff]  ;;  %v4246_v10 = vld [vmem:[%s5969_s1 + $0x10] sm:$0xff] }
   0x4   :  { %v4256_v7 = vld [vmem:[%s5969_s1 + $0x60] sm:$0xff]  ;;  %v4255_v9 = vld [vmem:[%s5969_s1 + $0x58] sm:$0xff]  ;;  %v4254_v11 = vld [vmem:[%s5969_s1 + $0x50] sm:$0xff] }
   0x5   :  { %v4245_v12 = vld [vmem:[%s5969_s1 + $0x8] sm:$0xff]  ;;  %v4244_v14 = vld [vmem:[%s5969_s1] sm:$0xff]  ;;  %v4267_v24 = vld [vmem:[%s5969_s1 + $0xb8] sm:$0xff] }
   0x6   :  { %4400 = vmatpush.bf16.msra.mxu2 %v4250_v2  ;;  %2031 = vmatpush.bf16.msra.mxu0 %v4250_v2  ;;  %v4253_v13 = vld [vmem:[%s5969_s1 + $0x48] sm:$0xff]  ;;  %v4252_v15 = vld [vmem:[%s5969_s1 + $0x40] sm:$0xff]  ;;  %v4275_v25 = vld [vmem:[%s5969_s1 + $0xf8] sm:$0xff] }
   0x7   :  { %4408 = vmatpush.bf16.msra.mxu3 %v4258_v3  ;;  %2080 = vmatpush.bf16.msra.mxu1 %v4258_v3  ;;  %v3238_v16 = vld [vmem:[%s5970_s0 + $0x240] sm:$0xf]  ;;  %v4181_v17 = vld [vmem:[%s5970_s0 + $0x284] sm:$0xf0]  ;;  %v4172_v18 = vld [vmem:[%s5970_s0 + $0x244] sm:$0xf] }
   0x8   :  { %v3240_v19 = vld [vmem:[%s5970_s0 + $0x288] sm:$0xf0]  ;;  %v2950_v20 = vld [vmem:[%s5970_s0] sm:$0xf]  ;;  %v4109_v21 = vld [vmem:[%s5970_s0 + $0x44] sm:$0xf0]  ;;  %v3239_v26 = vor.u32 %v4181_v17, %v3238_v16 }
   0x9   :  { %v4100_v22 = vld [vmem:[%s5970_s0 + $0x4] sm:$0xf]  ;;  %v2952_v23 = vld [vmem:[%s5970_s0 + $0x48] sm:$0xf0]  ;;  %v3243_v27 = vor.u32 %v4172_v18, %v3240_v19  ;;  %v2951_v28 = vor.u32 %v4109_v21, %v2950_v20  ;;  %v4283_v30 = vld [vmem:[%s5969_s1 + $0x138] sm:$0xff] }
   0xa   :  { %4401 = vmatpush.bf16.msra.mxu2 %v4249_v4  ;;  %2032 = vmatpush.bf16.msra.mxu0 %v4249_v4  ;;  %v2955_v29 = vor.u32 %v4100_v22, %v2952_v23  ;;  %v4291_v31 = vld [vmem:[%s5969_s1 + $0x178] sm:$0xff]  ;;  %v4266_v32 = vld [vmem:[%s5969_s1 + $0xb0] sm:$0xff]  ;;  %v4265_v36 = vld [vmem:[%s5969_s1 + $0xa8] sm:$0xff] }
   0xb   :  { %4409 = vmatpush.bf16.msra.mxu3 %v4257_v5  ;;  %2081 = vmatpush.bf16.msra.mxu1 %v4257_v5  ;;  %v4274_v33 = vld [vmem:[%s5969_s1 + $0xf0] sm:$0xff]  ;;  %v4273_v37 = vld [vmem:[%s5969_s1 + $0xe8] sm:$0xff]  ;;  %v4264_v41 = vld [vmem:[%s5969_s1 + $0xa0] sm:$0xff] }
   0xc   :  { %v4282_v34 = vld [vmem:[%s5969_s1 + $0x130] sm:$0xff]  ;;  %v4281_v38 = vld [vmem:[%s5969_s1 + $0x128] sm:$0xff]  ;;  %v4272_v42 = vld [vmem:[%s5969_s1 + $0xe0] sm:$0xff] }
   0xd   :  { %v4290_v35 = vld [vmem:[%s5969_s1 + $0x170] sm:$0xff]  ;;  %v4289_v39 = vld [vmem:[%s5969_s1 + $0x168] sm:$0xff]  ;;  %v4199_v43 = vld [vmem:[%s5970_s0 + $0x314] sm:$0xf0] }
   0xe   :  { %4402 = vmatpush.bf16.msra.mxu2 %v4248_v6  ;;  %2033 = vmatpush.bf16.msra.mxu0 %v4248_v6  ;;  %v3310_v40 = vld [vmem:[%s5970_s0 + $0x2d0] sm:$0xf]  ;;  %v4190_v44 = vld [vmem:[%s5970_s0 + $0x2d4] sm:$0xf]  ;;  %v3312_v45 = vld [vmem:[%s5970_s0 + $0x318] sm:$0xf0] }
   0xf   :  { %4410 = vmatpush.bf16.msra.mxu3 %v4256_v7  ;;  %2082 = vmatpush.bf16.msra.mxu1 %v4256_v7  ;;  %v3022_v46 = vld [vmem:[%s5970_s0 + $0x90] sm:$0xf]  ;;  %v4127_v47 = vld [vmem:[%s5970_s0 + $0xd4] sm:$0xf0]  ;;  %v4118_v48 = vld [vmem:[%s5970_s0 + $0x94] sm:$0xf]  ;;  %v3311_v54 = vor.u32 %v4199_v43, %v3310_v40  ;;  %v3315_v55 = vor.u32 %v4190_v44, %v3312_v45 }
  0x10   :  { %v3024_v49 = vld [vmem:[%s5970_s0 + $0xd8] sm:$0xf0]  ;;  %v4280_v50 = vld [vmem:[%s5969_s1 + $0x120] sm:$0xff]  ;;  %v3023_v56 = vor.u32 %v4127_v47, %v3022_v46  ;;  %v4262_v60 = vld [vmem:[%s5969_s1 + $0x90] sm:$0xff] }
  0x11   :  { %v4288_v51 = vld [vmem:[%s5969_s1 + $0x160] sm:$0xff]  ;;  %v4263_v52 = vld [vmem:[%s5969_s1 + $0x98] sm:$0xff]  ;;  %v3027_v57 = vor.u32 %v4118_v48, %v3024_v49  ;;  %v4270_v61 = vld [vmem:[%s5969_s1 + $0xd0] sm:$0xff] }
  0x12   :  { %4403 = vmatpush.bf16.msra.mxu2 %v4247_v8  ;;  %2034 = vmatpush.bf16.msra.mxu0 %v4247_v8  ;;  %v4271_v53 = vld [vmem:[%s5969_s1 + $0xd8] sm:$0xff]  ;;  %v4278_v62 = vld [vmem:[%s5969_s1 + $0x110] sm:$0xff]  ;;  %v4261_v0 = vld [vmem:[%s5969_s1 + $0x88] sm:$0xff] }
  0x13   :  { %4411 = vmatpush.bf16.msra.mxu3 %v4255_v9  ;;  %2083 = vmatpush.bf16.msra.mxu1 %v4255_v9  ;;  %v4279_v58 = vld [vmem:[%s5969_s1 + $0x118] sm:$0xff]  ;;  %v4286_v63 = vld [vmem:[%s5969_s1 + $0x150] sm:$0xff]  ;;  %v4269_v1 = vld [vmem:[%s5969_s1 + $0xc8] sm:$0xff] }
  0x14   :  { %v4287_v59 = vld [vmem:[%s5969_s1 + $0x158] sm:$0xff]  ;;  %v4277_v2 = vld [vmem:[%s5969_s1 + $0x108] sm:$0xff]  ;;  %v4260_v4 = vld [vmem:[%s5969_s1 + $0x80] sm:$0xff] }
  0x15   :  { %v4285_v3 = vld [vmem:[%s5969_s1 + $0x148] sm:$0xff]  ;;  %v4268_v5 = vld [vmem:[%s5969_s1 + $0xc0] sm:$0xff]  ;;  %v4299_v20 = vld [vmem:[%s5969_s1 + $0x1b8] sm:$0xff] }
  0x16   :  { %4404 = vmatpush.bf16.msra.mxu2 %v4246_v10  ;;  %2035 = vmatpush.bf16.msra.mxu0 %v4246_v10  ;;  %v3382_v6 = vld [vmem:[%s5970_s0 + $0x360] sm:$0xf]  ;;  %v4217_v7 = vld [vmem:[%s5970_s0 + $0x3a4] sm:$0xf0]  ;;  %v4208_v8 = vld [vmem:[%s5970_s0 + $0x364] sm:$0xf] }
  0x17   :  { %4412 = vmatpush.bf16.msra.mxu3 %v4254_v11  ;;  %2084 = vmatpush.bf16.msra.mxu1 %v4254_v11  ;;  %v3384_v9 = vld [vmem:[%s5970_s0 + $0x3a8] sm:$0xf0]  ;;  %v3094_v10 = vld [vmem:[%s5970_s0 + $0x120] sm:$0xf]  ;;  %v4145_v11 = vld [vmem:[%s5970_s0 + $0x164] sm:$0xf0] }
  0x18   :  { %v3387_v16 = vor.u32 %v4208_v8, %v3384_v9  ;;  %v3095_v17 = vor.u32 %v4145_v11, %v3094_v10  ;;  %v4284_v19 = vld [vmem:[%s5969_s1 + $0x140] sm:$0xff]  ;;  %v4307_v21 = vld [vmem:[%s5969_s1 + $0x1f8] sm:$0xff]  ;;  %v2958_v40 = vld [vmem:[%s5970_s0 + $0x8] sm:$0xf] }
  0x19   :  { %v4315_v22 = vld [vmem:[%s5969_s1 + $0x238] sm:$0xff]  ;;  %v2960_v43 = vld [vmem:[%s5970_s0 + $0x50] sm:$0xf0]  ;;  %v2966_v44 = vld [vmem:[%s5970_s0 + $0x10] sm:$0xf] }
  0x1a   :  { %4405 = vmatpush.bf16.msra.mxu2 %v4245_v12  ;;  %2036 = vmatpush.bf16.msra.mxu0 %v4245_v12  ;;  %v4136_v12 = vld [vmem:[%s5970_s0 + $0x124] sm:$0xf]  ;;  %v4323_v23 = vld [vmem:[%s5969_s1 + $0x278] sm:$0xff]  ;;  %v4102_v46 = vld [vmem:[%s5970_s0 + $0x14] sm:$0xf] }
  0x1b   :  { %4413 = vmatpush.bf16.msra.mxu3 %v4253_v13  ;;  %2085 = vmatpush.bf16.msra.mxu1 %v4253_v13  ;;  %v3096_v13 = vld [vmem:[%s5970_s0 + $0x168] sm:$0xf0]  ;;  %v4111_v45 = vld [vmem:[%s5970_s0 + $0x54] sm:$0xf0]  ;;  %v2968_v47 = vld [vmem:[%s5970_s0 + $0x58] sm:$0xf0] }
  0x1c   :  { %v3099_v18 = vor.u32 %v4136_v12, %v3096_v13  ;;  %v3102_v8 = vld [vmem:[%s5970_s0 + $0x128] sm:$0xf]  ;;  %v4146_v9 = vld [vmem:[%s5970_s0 + $0x16c] sm:$0xf0]  ;;  %v4137_v10 = vld [vmem:[%s5970_s0 + $0x12c] sm:$0xf] }
  0x1d   :  { %v3104_v11 = vld [vmem:[%s5970_s0 + $0x170] sm:$0xf0]  ;;  %v3110_v12 = vld [vmem:[%s5970_s0 + $0x130] sm:$0xf]  ;;  %v4147_v13 = vld [vmem:[%s5970_s0 + $0x174] sm:$0xf0] }
  0x1e   :  { %4406 = vmatpush.bf16.msra.mxu2 %v4244_v14  ;;  %2037 = vmatpush.bf16.msra.mxu0 %v4244_v14  ;;  %v4276_v14 = vld [vmem:[%s5969_s1 + $0x100] sm:$0xff] }
  0x1f   :  { %4414 = vmatpush.bf16.msra.mxu3 %v4252_v15  ;;  %2086 = vmatpush.bf16.msra.mxu1 %v4252_v15  ;;  %v3383_v15 = vor.u32 %v4217_v7, %v3382_v6  ;;  %v4312_v6 = vld [vmem:[%s5969_s1 + $0x220] sm:$0xff] }
  0x20   :  { %v4320_v7 = vld [vmem:[%s5969_s1 + $0x260] sm:$0xff] }
  0x21   :  { %2058 = vmatmul.bf16.vlgmr.msra.gmra.mxu2 %v3239_v26  ;;  %2038 = vmatmul.bf16.vlgmr.msra.gmra.mxu0 %v2951_v28  ;;  %v4226_v26 = vld [vmem:[%s5970_s0 + $0x3f4] sm:$0xf]  ;;  %v3166_v28 = vld [vmem:[%s5970_s0 + $0x1b0] sm:$0xf] }
  0x22   :  { %2128 = vmatpush.bf16.msrb.mxu2 %v4267_v24  ;;  %2107 = vmatmul.bf16.vlgmr.msra.gmra.mxu3 %v3243_v27  ;;  %v3454_v24 = vld [vmem:[%s5970_s0 + $0x3f0] sm:$0xf]  ;;  %v3456_v27 = vld [vmem:[%s5970_s0 + $0x438] sm:$0xf0] }
  0x23   :  { %2177 = vmatpush.bf16.msrb.mxu3 %v4275_v25  ;;  %2087 = vmatmul.bf16.vlgmr.msra.gmra.mxu1 %v2955_v29  ;;  %v4235_v25 = vld [vmem:[%s5970_s0 + $0x434] sm:$0xf0] }
  0x24   :  { %2226 = vmatpush.bf16.msrb.mxu0 %v4283_v30  ;;  %2275 = vmatpush.bf16.msrb.mxu1 %v4291_v31  ;;  %v4163_v29 = vld [vmem:[%s5970_s0 + $0x1f4] sm:$0xf0]  ;;  %v4154_v30 = vld [vmem:[%s5970_s0 + $0x1b4] sm:$0xf]  ;;  %v3168_v31 = vld [vmem:[%s5970_s0 + $0x1f8] sm:$0xf0] }
  0x26   :  { %2129 = vmatpush.bf16.msrb.mxu2 %v4266_v32  ;;  %v3455_v32 = vor.u32 %v4235_v25, %v3454_v24  ;;  %v4164_v24 = vld [vmem:[%s5970_s0 + $0x1fc] sm:$0xf0]  ;;  %v4155_v25 = vld [vmem:[%s5970_s0 + $0x1bc] sm:$0xf] }
  0x27   :  { %2178 = vmatpush.bf16.msrb.mxu3 %v4274_v33  ;;  %v3459_v33 = vor.u32 %v4226_v26, %v3456_v27  ;;  %v3176_v26 = vld [vmem:[%s5970_s0 + $0x200] sm:$0xf0]  ;;  %v3182_v27 = vld [vmem:[%s5970_s0 + $0x1c0] sm:$0xf] }
  0x28   :  { %2227 = vmatpush.bf16.msrb.mxu0 %v4282_v34  ;;  %2276 = vmatpush.bf16.msrb.mxu1 %v4290_v35  ;;  %v3167_v34 = vor.u32 %v4163_v29, %v3166_v28  ;;  %v3171_v35 = vor.u32 %v4154_v30, %v3168_v31  ;;  %v4165_v28 = vld [vmem:[%s5970_s0 + $0x204] sm:$0xf0]  ;;  %v4156_v29 = vld [vmem:[%s5970_s0 + $0x1c4] sm:$0xf]  ;;  %v3184_v30 = vld [vmem:[%s5970_s0 + $0x208] sm:$0xf0] }
  0x2a   :  { %2130 = vmatpush.bf16.msrb.mxu2 %v4265_v36  ;;  %v4298_v36 = vld [vmem:[%s5969_s1 + $0x1b0] sm:$0xff] }
  0x2b   :  { %2179 = vmatpush.bf16.msrb.mxu3 %v4273_v37  ;;  %v4306_v37 = vld [vmem:[%s5969_s1 + $0x1f0] sm:$0xff] }
  0x2c   :  { %2228 = vmatpush.bf16.msrb.mxu0 %v4281_v38  ;;  %2277 = vmatpush.bf16.msrb.mxu1 %v4289_v39  ;;  %v4314_v38 = vld [vmem:[%s5969_s1 + $0x230] sm:$0xff] }
  0x2d   :  { %v4322_v39 = vld [vmem:[%s5969_s1 + $0x270] sm:$0xff] }
  0x2e   :  { %2131 = vmatpush.bf16.msrb.mxu2 %v4264_v41  ;;  %v4110_v41 = vld [vmem:[%s5970_s0 + $0x4c] sm:$0xf0] }
  0x2f   :  { %2180 = vmatpush.bf16.msrb.mxu3 %v4272_v42  ;;  %v4101_v42 = vld [vmem:[%s5970_s0 + $0xc] sm:$0xf]  ;;  %v2959_v48 = vor.u32 %v4110_v41, %v2958_v40  ;;  %v4182_v40 = vld [vmem:[%s5970_s0 + $0x28c] sm:$0xf0] }
  0x30   :  { %2229 = vmatpush.bf16.msrb.mxu0 %v4280_v50  ;;  %2278 = vmatpush.bf16.msrb.mxu1 %v4288_v51  ;;  %v2963_v49 = vor.u32 %v4101_v42, %v2960_v43  ;;  %v2967_v50 = vor.u32 %v4111_v45, %v2966_v44  ;;  %v2971_v51 = vor.u32 %v4102_v46, %v2968_v47  ;;  %v4173_v41 = vld [vmem:[%s5970_s0 + $0x24c] sm:$0xf]  ;;  %v3248_v42 = vld [vmem:[%s5970_s0 + $0x290] sm:$0xf0]  ;;  %v3254_v43 = vld [vmem:[%s5970_s0 + $0x250] sm:$0xf] }
  0x31   :  { %2063 = vmatmul.bf16.gmra.mxu2 %v3311_v54  ;;  %2043 = vmatmul.bf16.gmra.mxu0 %v3023_v56  ;;  %v4313_v54 = vld [vmem:[%s5969_s1 + $0x228] sm:$0xff]  ;;  %v3030_v56 = vld [vmem:[%s5970_s0 + $0x98] sm:$0xf]  ;;  %v4174_v45 = vld [vmem:[%s5970_s0 + $0x254] sm:$0xf] }
  0x32   :  { %2132 = vmatpush.bf16.msrb.mxu2 %v4263_v52  ;;  %2112 = vmatmul.bf16.gmra.mxu3 %v3315_v55  ;;  %v4297_v52 = vld [vmem:[%s5969_s1 + $0x1a8] sm:$0xff]  ;;  %v4183_v44 = vld [vmem:[%s5970_s0 + $0x294] sm:$0xf0]  ;;  %v3256_v46 = vld [vmem:[%s5970_s0 + $0x298] sm:$0xf0] }
  0x33   :  { %2181 = vmatpush.bf16.msrb.mxu3 %v4271_v53  ;;  %2092 = vmatmul.bf16.gmra.mxu1 %v3027_v57  ;;  %v4305_v53 = vld [vmem:[%s5969_s1 + $0x1e8] sm:$0xff]  ;;  %v4128_v57 = vld [vmem:[%s5970_s0 + $0xdc] sm:$0xf0] }
  0x34   :  { %2230 = vmatpush.bf16.msrb.mxu0 %v4279_v58  ;;  %2279 = vmatpush.bf16.msrb.mxu1 %v4287_v59  ;;  %v4321_v55 = vld [vmem:[%s5969_s1 + $0x268] sm:$0xff]  ;;  %v4119_v58 = vld [vmem:[%s5970_s0 + $0x9c] sm:$0xf]  ;;  %v3032_v59 = vld [vmem:[%s5970_s0 + $0xe0] sm:$0xf0] }
  0x36   :  { %2133 = vmatpush.bf16.msrb.mxu2 %v4262_v60  ;;  %v3038_v60 = vld [vmem:[%s5970_s0 + $0xa0] sm:$0xf] }
  0x37   :  { %2182 = vmatpush.bf16.msrb.mxu3 %v4270_v61  ;;  %v4129_v61 = vld [vmem:[%s5970_s0 + $0xe4] sm:$0xf0] }
  0x38   :  { %2231 = vmatpush.bf16.msrb.mxu0 %v4278_v62  ;;  %2280 = vmatpush.bf16.msrb.mxu1 %v4286_v63  ;;  %v4120_v62 = vld [vmem:[%s5970_s0 + $0xa4] sm:$0xf]  ;;  %v3040_v63 = vld [vmem:[%s5970_s0 + $0xe8] sm:$0xf0] }
  0x3a   :  { %2134 = vmatpush.bf16.msrb.mxu2 %v4261_v0  ;;  %v3031_v0 = vor.u32 %v4128_v57, %v3030_v56  ;;  %v4301_v56 = vld [vmem:[%s5969_s1 + $0x1c8] sm:$0xff] }
  0x3b   :  { %2183 = vmatpush.bf16.msrb.mxu3 %v4269_v1  ;;  %v3035_v1 = vor.u32 %v4119_v58, %v3032_v59 }
  0x3c   :  { %2232 = vmatpush.bf16.msrb.mxu0 %v4277_v2  ;;  %2281 = vmatpush.bf16.msrb.mxu1 %v4285_v3  ;;  %v3039_v2 = vor.u32 %v4129_v61, %v3038_v60  ;;  %v3043_v3 = vor.u32 %v4120_v62, %v3040_v63  ;;  %v4309_v63 = vld [vmem:[%s5969_s1 + $0x208] sm:$0xff] }
  0x3e   :  { %2135 = vmatpush.bf16.msrb.mxu2 %v4260_v4  ;;  %v4296_v4 = vld [vmem:[%s5969_s1 + $0x1a0] sm:$0xff] }
  0x3f   :  { %2184 = vmatpush.bf16.msrb.mxu3 %v4268_v5  ;;  %v4304_v5 = vld [vmem:[%s5969_s1 + $0x1e0] sm:$0xff] }
  0x40   :  { %2233 = vmatpush.bf16.msrb.mxu0 %v4276_v14  ;;  %2282 = vmatpush.bf16.msrb.mxu1 %v4284_v19  ;;  %v4138_v14 = vld [vmem:[%s5970_s0 + $0x134] sm:$0xf] }
  0x41   :  { %2068 = vmatmul.bf16.gmra.mxu2 %v3383_v15  ;;  %2048 = vmatmul.bf16.gmra.mxu0 %v3095_v17  ;;  %v3112_v15 = vld [vmem:[%s5970_s0 + $0x178] sm:$0xf0]  ;;  %v3107_v17 = vor.u32 %v4137_v10, %v3104_v11 }
  0x42   :  { %2117 = vmatmul.bf16.gmra.mxu3 %v3387_v16  ;;  %2324 = vmatpush.bf16.msra.mxu2 %v4299_v20  ;;  %v3103_v16 = vor.u32 %v4146_v9, %v3102_v8  ;;  %v3115_v19 = vor.u32 %v4138_v14, %v3112_v15  ;;  %v4295_v20 = vld [vmem:[%s5969_s1 + $0x198] sm:$0xff] }
  0x43   :  { %2097 = vmatmul.bf16.gmra.mxu1 %v3099_v18  ;;  %2373 = vmatpush.bf16.msra.mxu3 %v4307_v21  ;;  %v3111_v18 = vor.u32 %v4147_v13, %v3110_v12  ;;  %v4303_v21 = vld [vmem:[%s5969_s1 + $0x1d8] sm:$0xff]  ;;  %v4317_v13 = vld [vmem:[%s5969_s1 + $0x248] sm:$0xff] }
  0x44   :  { %2422 = vmatpush.bf16.msra.mxu0 %v4315_v22  ;;  %2471 = vmatpush.bf16.msra.mxu1 %v4323_v23  ;;  %v4311_v22 = vld [vmem:[%s5969_s1 + $0x218] sm:$0xff] }
  0x45   :  { %v3174_v23 = vld [vmem:[%s5970_s0 + $0x1b8] sm:$0xf] }
  0x46   :  { %2325 = vmatpush.bf16.msra.mxu2 %v4298_v36  ;;  %v3175_v31 = vor.u32 %v4164_v24, %v3174_v23  ;;  %v4294_v36 = vld [vmem:[%s5969_s1 + $0x190] sm:$0xff] }
  0x47   :  { %2374 = vmatpush.bf16.msra.mxu3 %v4306_v37  ;;  %v4302_v37 = vld [vmem:[%s5969_s1 + $0x1d0] sm:$0xff] }
  0x48   :  { %2423 = vmatpush.bf16.msra.mxu0 %v4314_v38  ;;  %2472 = vmatpush.bf16.msra.mxu1 %v4322_v39  ;;  %v4310_v38 = vld [vmem:[%s5969_s1 + $0x210] sm:$0xff]  ;;  %v3246_v39 = vld [vmem:[%s5970_s0 + $0x248] sm:$0xf] }
  0x49   :  { %v3247_v47 = vor.u32 %v4182_v40, %v3246_v39 }
  0x4a   :  { %2326 = vmatpush.bf16.msra.mxu2 %v4297_v52 }
  0x4b   :  { %2375 = vmatpush.bf16.msra.mxu3 %v4305_v53 }
  0x4c   :  { %2424 = vmatpush.bf16.msra.mxu0 %v4313_v54  ;;  %2473 = vmatpush.bf16.msra.mxu1 %v4321_v55  ;;  %v4293_v55 = vld [vmem:[%s5969_s1 + $0x188] sm:$0xff] }
  0x4e   :  { %2327 = vmatpush.bf16.msra.mxu2 %v4296_v4  ;;  %v3326_v4 = vld [vmem:[%s5970_s0 + $0x2e0] sm:$0xf] }
  0x4f   :  { %2376 = vmatpush.bf16.msra.mxu3 %v4304_v5  ;;  %v4201_v5 = vld [vmem:[%s5970_s0 + $0x324] sm:$0xf0] }
  0x50   :  { %2425 = vmatpush.bf16.msra.mxu0 %v4312_v6  ;;  %2474 = vmatpush.bf16.msra.mxu1 %v4320_v7  ;;  %v4192_v6 = vld [vmem:[%s5970_s0 + $0x2e4] sm:$0xf]  ;;  %v3328_v7 = vld [vmem:[%s5970_s0 + $0x328] sm:$0xf0]  ;;  %v3327_v14 = vor.u32 %v4201_v5, %v3326_v4 }
  0x51   :  { %2073 = vmatmul.bf16.gmra.mxu2 %v3455_v32  ;;  %2053 = vmatmul.bf16.gmra.mxu0 %v3167_v34  ;;  %v3179_v32 = vor.u32 %v4155_v25, %v3176_v26  ;;  %v3183_v34 = vor.u32 %v4165_v28, %v3182_v27  ;;  %v3331_v15 = vor.u32 %v4192_v6, %v3328_v7  ;;  %v4308_v27 = vld [vmem:[%s5969_s1 + $0x200] sm:$0xff]  ;;  %v3390_v28 = vld [vmem:[%s5970_s0 + $0x368] sm:$0xf] }
  0x52   :  { %2122 = vmatmul.bf16.gmra.mxu3 %v3459_v33  ;;  %2328 = vmatpush.bf16.msra.mxu2 %v4295_v20  ;;  %v4319_v33 = vld [vmem:[%s5969_s1 + $0x258] sm:$0xff]  ;;  %v4300_v20 = vld [vmem:[%s5969_s1 + $0x1c0] sm:$0xff] }
  0x53   :  { %2102 = vmatmul.bf16.gmra.mxu1 %v3171_v35  ;;  %2377 = vmatpush.bf16.msra.mxu3 %v4303_v21  ;;  %v3187_v35 = vor.u32 %v4156_v29, %v3184_v30  ;;  %v4218_v29 = vld [vmem:[%s5970_s0 + $0x3ac] sm:$0xf0]  ;;  %v4209_v30 = vld [vmem:[%s5970_s0 + $0x36c] sm:$0xf] }
  0x54   :  { %2426 = vmatpush.bf16.msra.mxu0 %v4311_v22  ;;  %2475 = vmatpush.bf16.msra.mxu1 %v4319_v33  ;;  %v4219_v33 = vld [vmem:[%s5970_s0 + $0x3b4] sm:$0xf0]  ;;  %v3391_v39 = vor.u32 %v4218_v29, %v3390_v28  ;;  %v4346_v28 = vld [vmem:[%s5969_s1 + $0x330] sm:$0xff]  ;;  %v4103_v29 = vld [vmem:[%s5970_s0 + $0x1c] sm:$0xf] }
  0x56   :  { %2329 = vmatpush.bf16.msra.mxu2 %v4294_v36 }
  0x57   :  { %2378 = vmatpush.bf16.msra.mxu3 %v4302_v37 }
  0x58   :  { %2427 = vmatpush.bf16.msra.mxu0 %v4310_v38 }
  0x5a   :  { %2330 = vmatpush.bf16.msra.mxu2 %v4293_v55 }
  0x5b   :  { %2379 = vmatpush.bf16.msra.mxu3 %v4301_v56  ;;  %v3462_v56 = vld [vmem:[%s5970_s0 + $0x3f8] sm:$0xf] }
  0x5c   :  { %2428 = vmatpush.bf16.msra.mxu0 %v4309_v63  ;;  %v3470_v63 = vld [vmem:[%s5970_s0 + $0x400] sm:$0xf] }
  0x5f   :  { %2380 = vmatpush.bf16.msra.mxu3 %v4300_v20 }
  0x60   :  { %2429 = vmatpush.bf16.msra.mxu0 %v4308_v27  ;;  %v4112_v27 = vld [vmem:[%s5970_s0 + $0x5c] sm:$0xf0] }
  0x61   :  { %2136 = vmatmul.bf16.vlgmr.msrb.gmra.mxu2 %v2959_v48  ;;  %2234 = vmatmul.bf16.vlgmr.msrb.gmra.mxu0 %v2967_v50  ;;  %v3251_v48 = vor.u32 %v4173_v41, %v3248_v42  ;;  %v3255_v50 = vor.u32 %v4183_v44, %v3254_v43  ;;  %v4316_v41 = vld [vmem:[%s5969_s1 + $0x240] sm:$0xff] }
  0x62   :  { %2185 = vmatmul.bf16.vlgmr.msrb.gmra.mxu3 %v2963_v49  ;;  %v4318_v49 = vld [vmem:[%s5969_s1 + $0x250] sm:$0xff] }
  0x63   :  { %2283 = vmatmul.bf16.vlgmr.msrb.gmra.mxu1 %v2971_v51  ;;  %v3259_v51 = vor.u32 %v4174_v45, %v3256_v46 }
  0x64   :  { %2476 = vmatpush.bf16.msra.mxu1 %v4318_v49 }
  0x68   :  { %2477 = vmatpush.bf16.msra.mxu1 %v4317_v13 }
  0x6c   :  { %2478 = vmatpush.bf16.msra.mxu1 %v4316_v41 }
  0x71   :  { %2141 = vmatmul.bf16.gmra.mxu2 %v3031_v0  ;;  %2239 = vmatmul.bf16.gmra.mxu0 %v3039_v2  ;;  %v3318_v0 = vld [vmem:[%s5970_s0 + $0x2d8] sm:$0xf]  ;;  %v4191_v2 = vld [vmem:[%s5970_s0 + $0x2dc] sm:$0xf] }
  0x72   :  { %2190 = vmatmul.bf16.gmra.mxu3 %v3035_v1  ;;  %v4200_v1 = vld [vmem:[%s5970_s0 + $0x31c] sm:$0xf0] }
  0x73   :  { %2288 = vmatmul.bf16.gmra.mxu1 %v3043_v3  ;;  %v3320_v3 = vld [vmem:[%s5970_s0 + $0x320] sm:$0xf0]  ;;  %v3319_v11 = vor.u32 %v4200_v1, %v3318_v0  ;;  %v4237_v0 = vld [vmem:[%s5970_s0 + $0x444] sm:$0xf0] }
  0x74   :  { %v3323_v12 = vor.u32 %v4191_v2, %v3320_v3  ;;  %v4228_v1 = vld [vmem:[%s5970_s0 + $0x404] sm:$0xf]  ;;  %v3472_v2 = vld [vmem:[%s5970_s0 + $0x448] sm:$0xf0] }
  0x81   :  { %2146 = vmatmul.bf16.gmra.mxu2 %v3103_v16  ;;  %2244 = vmatmul.bf16.gmra.mxu0 %v3111_v18 }
  0x82   :  { %2195 = vmatmul.bf16.gmra.mxu3 %v3107_v17 }
  0x83   :  { %2293 = vmatmul.bf16.gmra.mxu1 %v3115_v19  ;;  %v4292_v19 = vld [vmem:[%s5969_s1 + $0x180] sm:$0xff] }
  0x84   :  { %2331 = vmatpush.bf16.msra.mxu2 %v4292_v19 }
  0x91   :  { %2151 = vmatmul.bf16.gmra.mxu2 %v3175_v31  ;;  %2249 = vmatmul.bf16.gmra.mxu0 %v3183_v34  ;;  %v3392_v31 = vld [vmem:[%s5970_s0 + $0x3b0] sm:$0xf0] }
  0x92   :  { %2200 = vmatmul.bf16.gmra.mxu3 %v3179_v32  ;;  %v3398_v32 = vld [vmem:[%s5970_s0 + $0x370] sm:$0xf]  ;;  %v4210_v34 = vld [vmem:[%s5970_s0 + $0x374] sm:$0xf]  ;;  %v3395_v40 = vor.u32 %v4209_v30, %v3392_v31  ;;  %v2976_v30 = vld [vmem:[%s5970_s0 + $0x60] sm:$0xf0] }
  0x93   :  { %2298 = vmatmul.bf16.gmra.mxu1 %v3187_v35  ;;  %v3400_v35 = vld [vmem:[%s5970_s0 + $0x3b8] sm:$0xf0]  ;;  %v3399_v42 = vor.u32 %v4219_v33, %v3398_v32  ;;  %v2982_v31 = vld [vmem:[%s5970_s0 + $0x20] sm:$0xf]  ;;  %v4113_v32 = vld [vmem:[%s5970_s0 + $0x64] sm:$0xf0] }
  0x94   :  { %v3403_v43 = vor.u32 %v4210_v34, %v3400_v35  ;;  %v4104_v33 = vld [vmem:[%s5970_s0 + $0x24] sm:$0xf]  ;;  %v2984_v34 = vld [vmem:[%s5970_s0 + $0x68] sm:$0xf0]  ;;  %v2983_v41 = vor.u32 %v4113_v32, %v2982_v31 }
  0x9e   :  { %v2039_v52 = vpop.f32.mrf.mxu0 }
  0xa0   :  { %v2088_v53 = vpop.f32.mrf.mxu1 }
  0xa1   :  { %v4868_v54 = vadd.f32 %v2088_v53, %v2039_v52  ;;  %2156 = vmatmul.bf16.gmra.mxu2 %v3247_v47  ;;  %2254 = vmatmul.bf16.gmra.mxu0 %v3255_v50  ;;  %v4331_v47 = vld [vmem:[%s5969_s1 + $0x2b8] sm:$0xff] }
  0xa2   :  { %2205 = vmatmul.bf16.gmra.mxu3 %v3251_v48  ;;  %v4339_v48 = vld [vmem:[%s5969_s1 + $0x2f8] sm:$0xff]  ;;  %2520 = vmatpush.bf16.msrb.mxu2 %v4331_v47  ;;  %v4329_v47 = vld [vmem:[%s5969_s1 + $0x2a8] sm:$0xff] }
  0xa3   :  { %2303 = vmatmul.bf16.gmra.mxu1 %v3259_v51  ;;  %2569 = vmatpush.bf16.msrb.mxu3 %v4339_v48  ;;  %v4337_v48 = vld [vmem:[%s5969_s1 + $0x2e8] sm:$0xff] }
  0xa4   :  { %v2059_v57 = vpop.f32.mrf.mxu2 }
  0xa5   :  { %v2108_v58 = vpop.f32.mrf.mxu3 }
  0xa6   :  { %v4876_v59 = vadd.f32 %v2108_v58, %v2059_v57  ;;  %v2041_v60 = vpop.f32.mrf.mxu0  ;;  %v4236_v57 = vld [vmem:[%s5970_s0 + $0x43c] sm:$0xf0]  ;;  %v4347_v58 = vld [vmem:[%s5969_s1 + $0x338] sm:$0xff] }
  0xa7   :  { %2618 = vmatpush.bf16.msrb.mxu0 %v4347_v58  ;;  %v3463_v6 = vor.u32 %v4236_v57, %v3462_v56 }
  0xa8   :  { %v2090_v61 = vpop.f32.mrf.mxu1 }
  0xa9   :  { %v4878_v62 = vadd.f32 %v2090_v61, %v2041_v60  ;;  %v4227_v60 = vld [vmem:[%s5970_s0 + $0x3fc] sm:$0xf]  ;;  %v3464_v61 = vld [vmem:[%s5970_s0 + $0x440] sm:$0xf0] }
  0xaa   :  { %v3467_v7 = vor.u32 %v4227_v60, %v3464_v61  ;;  %v3046_v60 = vld [vmem:[%s5970_s0 + $0xa8] sm:$0xf]  ;;  %v4130_v61 = vld [vmem:[%s5970_s0 + $0xec] sm:$0xf0] }
  0xab   :  { %2619 = vmatpush.bf16.msrb.mxu0 %v4346_v28 }
  0xac   :  { %v2061_v8 = vpop.f32.mrf.mxu2 }
  0xad   :  { %v2110_v9 = vpop.f32.mrf.mxu3 }
  0xae   :  { %v4907_v10 = vadd.f32 %v2110_v9, %v2061_v8  ;;  %v2044_v16 = vpop.f32.mrf.mxu0  ;;  %v3471_v8 = vor.u32 %v4237_v0, %v3470_v63  ;;  %v3475_v9 = vor.u32 %v4228_v1, %v3472_v2  ;;  %v4345_v63 = vld [vmem:[%s5969_s1 + $0x328] sm:$0xff]  ;;  %v3048_v0 = vld [vmem:[%s5970_s0 + $0xf0] sm:$0xf0]  ;;  %v3054_v1 = vld [vmem:[%s5970_s0 + $0xb0] sm:$0xf] }
  0xaf   :  { %v4131_v2 = vld [vmem:[%s5970_s0 + $0xf4] sm:$0xf0]  ;;  %2620 = vmatpush.bf16.msrb.mxu0 %v4345_v63  ;;  %v4352_v63 = vld [vmem:[%s5969_s1 + $0x360] sm:$0xff] }
  0xb0   :  { %v2093_v17 = vpop.f32.mrf.mxu1 }
  0xb1   :  { %v4912_v18 = vadd.f32 %v2093_v17, %v2044_v16  ;;  %2161 = vmatmul.bf16.gmra.mxu2 %v3319_v11  ;;  %2259 = vmatmul.bf16.gmra.mxu0 %v3327_v14  ;;  %v4355_v14 = vld [vmem:[%s5969_s1 + $0x378] sm:$0xff]  ;;  %v4338_v16 = vld [vmem:[%s5969_s1 + $0x2f0] sm:$0xff] }
  0xb2   :  { %2210 = vmatmul.bf16.gmra.mxu3 %v3323_v12  ;;  %2667 = vmatpush.bf16.msrb.mxu1 %v4355_v14  ;;  %v3055_v14 = vor.u32 %v4131_v2, %v3054_v1 }
  0xb3   :  { %2308 = vmatmul.bf16.gmra.mxu1 %v3331_v15  ;;  %v4330_v15 = vld [vmem:[%s5969_s1 + $0x2b0] sm:$0xff]  ;;  %2570 = vmatpush.bf16.msrb.mxu3 %v4338_v16 }
  0xb4   :  { %v2064_v21 = vpop.f32.mrf.mxu2  ;;  %2521 = vmatpush.bf16.msrb.mxu2 %v4330_v15 }
  0xb5   :  { %v2113_v22 = vpop.f32.mrf.mxu3 }
  0xb6   :  { %v4920_v23 = vadd.f32 %v2113_v22, %v2064_v21  ;;  %v2046_v24 = vpop.f32.mrf.mxu0 }
  0xb7   :  { %2571 = vmatpush.bf16.msrb.mxu3 %v4337_v48 }
  0xb8   :  { %v2095_v25 = vpop.f32.mrf.mxu1  ;;  %2522 = vmatpush.bf16.msrb.mxu2 %v4329_v47 }
  0xb9   :  { %v4922_v26 = vadd.f32 %v2095_v25, %v2046_v24  ;;  %v2974_v25 = vld [vmem:[%s5970_s0 + $0x18] sm:$0xf] }
  0xbc   :  { %v2066_v36 = vpop.f32.mrf.mxu2 }
  0xbd   :  { %v2115_v37 = vpop.f32.mrf.mxu3 }
  0xbe   :  { %v4951_v38 = vadd.f32 %v2115_v37, %v2066_v36  ;;  %v2049_v44 = vpop.f32.mrf.mxu0 }
  0xc0   :  { %v2098_v45 = vpop.f32.mrf.mxu1 }
  0xc1   :  { %v4956_v46 = vadd.f32 %v2098_v45, %v2049_v44  ;;  %2166 = vmatmul.bf16.gmra.mxu2 %v3391_v39  ;;  %2264 = vmatmul.bf16.gmra.mxu0 %v3399_v42  ;;  %v2975_v39 = vor.u32 %v4112_v27, %v2974_v25  ;;  %v2987_v42 = vor.u32 %v4104_v33, %v2984_v34  ;;  %v4354_v45 = vld [vmem:[%s5969_s1 + $0x370] sm:$0xff]  ;;  %v4328_v25 = vld [vmem:[%s5969_s1 + $0x2a0] sm:$0xff] }
  0xc2   :  { %2215 = vmatmul.bf16.gmra.mxu3 %v3395_v40  ;;  %v2979_v40 = vor.u32 %v4103_v29, %v2976_v30  ;;  %2668 = vmatpush.bf16.msrb.mxu1 %v4354_v45 }
  0xc3   :  { %2313 = vmatmul.bf16.gmra.mxu1 %v3403_v43  ;;  %2523 = vmatpush.bf16.msrb.mxu2 %v4328_v25 }
  0xc4   :  { %v2069_v49 = vpop.f32.mrf.mxu2 }
  0xc5   :  { %v2118_v50 = vpop.f32.mrf.mxu3 }
  0xc6   :  { %v4964_v51 = vadd.f32 %v2118_v50, %v2069_v49  ;;  %v2051_v52 = vpop.f32.mrf.mxu0 }
  0xc8   :  { %v2100_v53 = vpop.f32.mrf.mxu1 }
  0xc9   :  { %v4966_v55 = vadd.f32 %v2100_v53, %v2051_v52 }
  0xcc   :  { %v2071_v3 = vpop.f32.mrf.mxu2 }
  0xcd   :  { %v2120_v4 = vpop.f32.mrf.mxu3 }
  0xce   :  { %v4995_v5 = vadd.f32 %v2120_v4, %v2071_v3  ;;  %v2054_v11 = vpop.f32.mrf.mxu0  ;;  %v4122_v3 = vld [vmem:[%s5970_s0 + $0xb4] sm:$0xf]  ;;  %v3056_v4 = vld [vmem:[%s5970_s0 + $0xf8] sm:$0xf0] }
  0xcf   :  { %v3059_v15 = vor.u32 %v4122_v3, %v3056_v4 }
  0xd0   :  { %v2103_v12 = vpop.f32.mrf.mxu1 }
  0xd1   :  { %v4997_v13 = vadd.f32 %v2103_v12, %v2054_v11  ;;  %2171 = vmatmul.bf16.gmra.mxu2 %v3463_v6  ;;  %2269 = vmatmul.bf16.gmra.mxu0 %v3471_v8  ;;  %v3047_v11 = vor.u32 %v4130_v61, %v3046_v60 }
  0xd2   :  { %2220 = vmatmul.bf16.gmra.mxu3 %v3467_v7 }
  0xd3   :  { %2318 = vmatmul.bf16.gmra.mxu1 %v3475_v9 }
  0xd4   :  { %v2074_v17 = vpop.f32.mrf.mxu2 }
  0xd5   :  { %v2123_v19 = vpop.f32.mrf.mxu3 }
  0xd6   :  { %v5008_v20 = vadd.f32 %v2123_v19, %v2074_v17  ;;  %v2056_v21 = vpop.f32.mrf.mxu0 }
  0xd8   :  { %v2105_v22 = vpop.f32.mrf.mxu1 }
  0xd9   :  { %v5010_v24 = vadd.f32 %v2105_v22, %v2056_v21  ;;  %v4353_v22 = vld [vmem:[%s5969_s1 + $0x368] sm:$0xff] }
  0xda   :  { %2669 = vmatpush.bf16.msrb.mxu1 %v4353_v22 }
  0xdc   :  { %v2076_v35 = vpop.f32.mrf.mxu2 }
  0xdd   :  { %v2125_v36 = vpop.f32.mrf.mxu3 }
  0xde   :  { %v5039_v37 = vadd.f32 %v2125_v36, %v2076_v35  ;;  %v2235_v43 = vpop.f32.mrf.mxu0  ;;  %v3118_v35 = vld [vmem:[%s5970_s0 + $0x138] sm:$0xf]  ;;  %v4148_v36 = vld [vmem:[%s5970_s0 + $0x17c] sm:$0xf0]  ;;  %2670 = vmatpush.bf16.msrb.mxu1 %v4352_v63 }
  0xe0   :  { %v2284_v44 = vpop.f32.mrf.mxu1 }
  0xe1   :  { %2332 = vmatmul.bf16.vlgmr.msra.gmra.mxu2 %v2975_v39  ;;  %2430 = vmatmul.bf16.vlgmr.msra.gmra.mxu0 %v2983_v41  ;;  %v4344_v39 = vld [vmem:[%s5969_s1 + $0x320] sm:$0xff] }
  0xe2   :  { %2381 = vmatmul.bf16.vlgmr.msra.gmra.mxu3 %v2979_v40  ;;  %v3120_v40 = vld [vmem:[%s5970_s0 + $0x180] sm:$0xf0]  ;;  %v3126_v41 = vld [vmem:[%s5970_s0 + $0x140] sm:$0xf]  ;;  %2621 = vmatpush.bf16.msrb.mxu0 %v4344_v39  ;;  %v4351_v39 = vld [vmem:[%s5969_s1 + $0x358] sm:$0xff] }
  0xe3   :  { %2479 = vmatmul.bf16.vlgmr.msra.gmra.mxu1 %v2987_v42  ;;  %v4149_v42 = vld [vmem:[%s5970_s0 + $0x184] sm:$0xf0] }
  0xe4   :  { %v2137_v49 = vpop.f32.mrf.mxu2  ;;  %2671 = vmatpush.bf16.msrb.mxu1 %v4351_v39 }
  0xe5   :  { %v2186_v50 = vpop.f32.mrf.mxu3  ;;  %v2138_v52 = vadd.f32 %v2137_v49, %v4868_v54  ;;  %v4121_v54 = vld [vmem:[%s5970_s0 + $0xac] sm:$0xf] }
  0xe6   :  { %v2237_v56 = vpop.f32.mrf.mxu0  ;;  %v3051_v12 = vor.u32 %v4121_v54, %v3048_v0  ;;  %v4327_v54 = vld [vmem:[%s5969_s1 + $0x298] sm:$0xff] }
  0xe7   :  { %v2187_v53 = vadd.f32 %v2186_v50, %v2138_v52  ;;  %v3119_v50 = vor.u32 %v4148_v36, %v3118_v35  ;;  %2524 = vmatpush.bf16.msrb.mxu2 %v4327_v54 }
  0xe8   :  { %v2286_v57 = vpop.f32.mrf.mxu1 }
  0xe9   :  { %v2236_v58 = vadd.f32 %v2235_v43, %v2187_v53  ;;  %v4140_v43 = vld [vmem:[%s5970_s0 + $0x144] sm:$0xf]  ;;  %v3127_v53 = vor.u32 %v4149_v42, %v3126_v41 }
  0xeb   :  { %v5078_v6 = vadd.f32 %v2284_v44, %v2236_v58  ;;  %v3128_v44 = vld [vmem:[%s5970_s0 + $0x188] sm:$0xf0] }
  0xec   :  { %v2139_v7 = vpop.f32.mrf.mxu2 }
  0xed   :  { %v2188_v8 = vpop.f32.mrf.mxu3  ;;  %v2140_v9 = vadd.f32 %v2139_v7, %v4878_v62  ;;  %v4336_v62 = vld [vmem:[%s5969_s1 + $0x2e0] sm:$0xff] }
  0xee   :  { %v2240_v17 = vpop.f32.mrf.mxu0  ;;  %2572 = vmatpush.bf16.msrb.mxu3 %v4336_v62 }
  0xef   :  { %v2189_v16 = vadd.f32 %v2188_v8, %v2140_v9 }
  0xf0   :  { %v2289_v19 = vpop.f32.mrf.mxu1 }
  0xf1   :  { %v2238_v21 = vadd.f32 %v2237_v56, %v2189_v16  ;;  %2337 = vmatmul.bf16.gmra.mxu2 %v3047_v11  ;;  %2435 = vmatmul.bf16.gmra.mxu0 %v3055_v14  ;;  %v3131_v56 = vor.u32 %v4140_v43, %v3128_v44  ;;  %v3190_v11 = vld [vmem:[%s5970_s0 + $0x1c8] sm:$0xf]  ;;  %v4343_v14 = vld [vmem:[%s5969_s1 + $0x318] sm:$0xff]  ;;  %v3198_v16 = vld [vmem:[%s5970_s0 + $0x1d0] sm:$0xf] }
  0xf2   :  { %2386 = vmatmul.bf16.gmra.mxu3 %v3051_v12  ;;  %v4166_v12 = vld [vmem:[%s5970_s0 + $0x20c] sm:$0xf0]  ;;  %2622 = vmatpush.bf16.msrb.mxu0 %v4343_v14 }
  0xf3   :  { %2484 = vmatmul.bf16.gmra.mxu1 %v3059_v15  ;;  %v5090_v27 = vadd.f32 %v2286_v57, %v2238_v21  ;;  %v3192_v15 = vld [vmem:[%s5970_s0 + $0x210] sm:$0xf0]  ;;  %v3200_v21 = vld [vmem:[%s5970_s0 + $0x218] sm:$0xf0] }
  0xf4   :  { %v2142_v28 = vpop.f32.mrf.mxu2  ;;  %v4350_v14 = vld [vmem:[%s5969_s1 + $0x350] sm:$0xff] }
  0xf5   :  { %v2191_v29 = vpop.f32.mrf.mxu3  ;;  %v2143_v30 = vadd.f32 %v2142_v28, %v4912_v18  ;;  %v4139_v18 = vld [vmem:[%s5970_s0 + $0x13c] sm:$0xf]  ;;  %2672 = vmatpush.bf16.msrb.mxu1 %v4350_v14 }
  0xf6   :  { %v2242_v32 = vpop.f32.mrf.mxu0  ;;  %v3123_v52 = vor.u32 %v4139_v18, %v3120_v40  ;;  %v4326_v18 = vld [vmem:[%s5969_s1 + $0x290] sm:$0xff] }
  0xf7   :  { %v2192_v31 = vadd.f32 %v2191_v29, %v2143_v30  ;;  %v3191_v29 = vor.u32 %v4166_v12, %v3190_v11  ;;  %2525 = vmatpush.bf16.msrb.mxu2 %v4326_v18 }
  0xf8   :  { %v2291_v33 = vpop.f32.mrf.mxu1 }
  0xf9   :  { %v2241_v34 = vadd.f32 %v2240_v17, %v2192_v31  ;;  %v4167_v17 = vld [vmem:[%s5970_s0 + $0x214] sm:$0xf0] }
  0xfa   :  { %v3199_v31 = vor.u32 %v4167_v17, %v3198_v16 }
  0xfb   :  { %v5120_v45 = vadd.f32 %v2289_v19, %v2241_v34  ;;  %v4158_v19 = vld [vmem:[%s5970_s0 + $0x1d4] sm:$0xf] }
  0xfc   :  { %v2144_v47 = vpop.f32.mrf.mxu2 }
  0xfd   :  { %v2193_v48 = vpop.f32.mrf.mxu3  ;;  %v2145_v49 = vadd.f32 %v2144_v47, %v4922_v26  ;;  %v4335_v26 = vld [vmem:[%s5969_s1 + $0x2d8] sm:$0xff] }
  0xfe   :  { %v2245_v58 = vpop.f32.mrf.mxu0  ;;  %2573 = vmatpush.bf16.msrb.mxu3 %v4335_v26 }
  0xff   :  { %v2194_v57 = vadd.f32 %v2193_v48, %v2145_v49 }
 0x100   :  { %v2294_v60 = vpop.f32.mrf.mxu1 }
 0x101   :  { %v2243_v61 = vadd.f32 %v2242_v32, %v2194_v57  ;;  %2342 = vmatmul.bf16.gmra.mxu2 %v3119_v50  ;;  %2440 = vmatmul.bf16.gmra.mxu0 %v3127_v53  ;;  %v3203_v32 = vor.u32 %v4158_v19, %v3200_v21  ;;  %v3262_v50 = vld [vmem:[%s5970_s0 + $0x258] sm:$0xf]  ;;  %v4342_v53 = vld [vmem:[%s5969_s1 + $0x310] sm:$0xff]  ;;  %v3270_v57 = vld [vmem:[%s5970_s0 + $0x260] sm:$0xf] }
 0x102   :  { %2391 = vmatmul.bf16.gmra.mxu3 %v3123_v52  ;;  %v4184_v52 = vld [vmem:[%s5970_s0 + $0x29c] sm:$0xf0]  ;;  %2623 = vmatpush.bf16.msrb.mxu0 %v4342_v53  ;;  %v4349_v53 = vld [vmem:[%s5969_s1 + $0x348] sm:$0xff] }
 0x103   :  { %2489 = vmatmul.bf16.gmra.mxu1 %v3131_v56  ;;  %v5132_v0 = vadd.f32 %v2291_v33, %v2243_v61  ;;  %v3264_v56 = vld [vmem:[%s5970_s0 + $0x2a0] sm:$0xf0]  ;;  %v3272_v61 = vld [vmem:[%s5970_s0 + $0x2a8] sm:$0xf0] }
 0x104   :  { %v2147_v1 = vpop.f32.mrf.mxu2  ;;  %2673 = vmatpush.bf16.msrb.mxu1 %v4349_v53 }
 0x105   :  { %v2196_v2 = vpop.f32.mrf.mxu3  ;;  %v2148_v3 = vadd.f32 %v2147_v1, %v4956_v46  ;;  %v4157_v46 = vld [vmem:[%s5970_s0 + $0x1cc] sm:$0xf] }
 0x106   :  { %v2247_v7 = vpop.f32.mrf.mxu0  ;;  %v3195_v30 = vor.u32 %v4157_v46, %v3192_v15  ;;  %v4325_v46 = vld [vmem:[%s5969_s1 + $0x288] sm:$0xff] }
 0x107   :  { %v2197_v4 = vadd.f32 %v2196_v2, %v2148_v3  ;;  %v3263_v2 = vor.u32 %v4184_v52, %v3262_v50  ;;  %2526 = vmatpush.bf16.msrb.mxu2 %v4325_v46 }
 0x108   :  { %v2296_v8 = vpop.f32.mrf.mxu1 }
 0x109   :  { %v2246_v9 = vadd.f32 %v2245_v58, %v2197_v4  ;;  %v4185_v58 = vld [vmem:[%s5970_s0 + $0x2a4] sm:$0xf0] }
 0x10a   :  { %v3271_v4 = vor.u32 %v4185_v58, %v3270_v57 }
 0x10b   :  { %v5162_v22 = vadd.f32 %v2294_v60, %v2246_v9  ;;  %v4176_v60 = vld [vmem:[%s5970_s0 + $0x264] sm:$0xf] }
 0x10c   :  { %v2149_v25 = vpop.f32.mrf.mxu2 }
 0x10d   :  { %v2198_v62 = vpop.f32.mrf.mxu3  ;;  %v2150_v28 = vadd.f32 %v2149_v25, %v4966_v55  ;;  %v4334_v55 = vld [vmem:[%s5969_s1 + $0x2d0] sm:$0xff] }
 0x10e   :  { %v2250_v34 = vpop.f32.mrf.mxu0  ;;  %2574 = vmatpush.bf16.msrb.mxu3 %v4334_v55 }
 0x10f   :  { %v2199_v33 = vadd.f32 %v2198_v62, %v2150_v28 }
 0x110   :  { %v2299_v35 = vpop.f32.mrf.mxu1 }
 0x111   :  { %v2248_v36 = vadd.f32 %v2247_v7, %v2199_v33  ;;  %2347 = vmatmul.bf16.gmra.mxu2 %v3191_v29  ;;  %2445 = vmatmul.bf16.gmra.mxu0 %v3199_v31  ;;  %v3275_v7 = vor.u32 %v4176_v60, %v3272_v61  ;;  %v3334_v29 = vld [vmem:[%s5970_s0 + $0x2e8] sm:$0xf]  ;;  %v3342_v33 = vld [vmem:[%s5970_s0 + $0x2f0] sm:$0xf] }
 0x112   :  { %2396 = vmatmul.bf16.gmra.mxu3 %v3195_v30  ;;  %v4202_v30 = vld [vmem:[%s5970_s0 + $0x32c] sm:$0xf0]  ;;  %v4341_v31 = vld [vmem:[%s5969_s1 + $0x308] sm:$0xff] }
 0x113   :  { %2494 = vmatmul.bf16.gmra.mxu1 %v3203_v32  ;;  %v5174_v40 = vadd.f32 %v2296_v8, %v2248_v36  ;;  %v3336_v32 = vld [vmem:[%s5970_s0 + $0x330] sm:$0xf0]  ;;  %v3344_v36 = vld [vmem:[%s5970_s0 + $0x338] sm:$0xf0]  ;;  %2624 = vmatpush.bf16.msrb.mxu0 %v4341_v31 }
 0x114   :  { %v2152_v41 = vpop.f32.mrf.mxu2 }
 0x115   :  { %v2201_v42 = vpop.f32.mrf.mxu3  ;;  %v2153_v43 = vadd.f32 %v2152_v41, %v4997_v13  ;;  %v4175_v13 = vld [vmem:[%s5970_s0 + $0x25c] sm:$0xf] }
 0x116   :  { %v2252_v47 = vpop.f32.mrf.mxu0  ;;  %v3267_v3 = vor.u32 %v4175_v13, %v3264_v56  ;;  %v4324_v13 = vld [vmem:[%s5969_s1 + $0x280] sm:$0xff] }
 0x117   :  { %v2202_v44 = vadd.f32 %v2201_v42, %v2153_v43  ;;  %v3335_v42 = vor.u32 %v4202_v30, %v3334_v29  ;;  %2527 = vmatpush.bf16.msrb.mxu2 %v4324_v13  ;;  %v4348_v30 = vld [vmem:[%s5969_s1 + $0x340] sm:$0xff] }
 0x118   :  { %v2301_v48 = vpop.f32.mrf.mxu1  ;;  %2674 = vmatpush.bf16.msrb.mxu1 %v4348_v30  ;;  %v3000_v30 = vld [vmem:[%s5970_s0 + $0x78] sm:$0xf0] }
 0x119   :  { %v2251_v49 = vadd.f32 %v2250_v34, %v2202_v44  ;;  %v4203_v34 = vld [vmem:[%s5970_s0 + $0x334] sm:$0xf0] }
 0x11a   :  { %v3343_v44 = vor.u32 %v4203_v34, %v3342_v33 }
 0x11b   :  { %v5204_v63 = vadd.f32 %v2299_v35, %v2251_v49  ;;  %v4194_v35 = vld [vmem:[%s5970_s0 + $0x2f4] sm:$0xf] }
 0x11c   :  { %v2154_v54 = vpop.f32.mrf.mxu2 }
 0x11d   :  { %v2203_v26 = vpop.f32.mrf.mxu3  ;;  %v2155_v1 = vadd.f32 %v2154_v54, %v5010_v24  ;;  %v4333_v24 = vld [vmem:[%s5969_s1 + $0x2c8] sm:$0xff] }
 0x11e   :  { %v2255_v9 = vpop.f32.mrf.mxu0  ;;  %2575 = vmatpush.bf16.msrb.mxu3 %v4333_v24 }
 0x11f   :  { %v2204_v8 = vadd.f32 %v2203_v26, %v2155_v1 }
 0x120   :  { %v2304_v11 = vpop.f32.mrf.mxu1 }
 0x121   :  { %v2253_v12 = vadd.f32 %v2252_v47, %v2204_v8  ;;  %2352 = vmatmul.bf16.gmra.mxu2 %v3263_v2  ;;  %2450 = vmatmul.bf16.gmra.mxu0 %v3271_v4  ;;  %v3347_v47 = vor.u32 %v4194_v35, %v3344_v36  ;;  %v3406_v2 = vld [vmem:[%s5970_s0 + $0x378] sm:$0xf]  ;;  %v4340_v4 = vld [vmem:[%s5969_s1 + $0x300] sm:$0xff] }
 0x122   :  { %2401 = vmatmul.bf16.gmra.mxu3 %v3267_v3  ;;  %v4220_v3 = vld [vmem:[%s5970_s0 + $0x3bc] sm:$0xf0]  ;;  %2625 = vmatpush.bf16.msrb.mxu0 %v4340_v4  ;;  %v4387_v4 = vld [vmem:[%s5969_s1 + $0x478] sm:$0xff] }
 0x123   :  { %2499 = vmatmul.bf16.gmra.mxu1 %v3275_v7  ;;  %v5216_v15 = vadd.f32 %v2301_v48, %v2253_v12  ;;  %v3408_v7 = vld [vmem:[%s5970_s0 + $0x3c0] sm:$0xf0]  ;;  %v3414_v8 = vld [vmem:[%s5970_s0 + $0x380] sm:$0xf]  ;;  %v3416_v12 = vld [vmem:[%s5970_s0 + $0x3c8] sm:$0xf0] }
 0x124   :  { %v2157_v16 = vpop.f32.mrf.mxu2  ;;  %2863 = vmatpush.bf16.msra.mxu1 %v4387_v4 }
 0x125   :  { %v2206_v17 = vpop.f32.mrf.mxu3  ;;  %v2158_v19 = vadd.f32 %v2157_v16, %v4876_v59  ;;  %v4193_v59 = vld [vmem:[%s5970_s0 + $0x2ec] sm:$0xf] }
 0x126   :  { %v2257_v25 = vpop.f32.mrf.mxu0  ;;  %v3339_v43 = vor.u32 %v4193_v59, %v3336_v32  ;;  %v4363_v59 = vld [vmem:[%s5969_s1 + $0x3b8] sm:$0xff] }
 0x127   :  { %v2207_v21 = vadd.f32 %v2206_v17, %v2158_v19  ;;  %v3407_v17 = vor.u32 %v4220_v3, %v3406_v2  ;;  %2716 = vmatpush.bf16.msra.mxu2 %v4363_v59 }
 0x128   :  { %v2306_v62 = vpop.f32.mrf.mxu1 }
 0x129   :  { %v2256_v28 = vadd.f32 %v2255_v9, %v2207_v21  ;;  %v4221_v9 = vld [vmem:[%s5970_s0 + $0x3c4] sm:$0xf0] }
 0x12a   :  { %v3415_v21 = vor.u32 %v4221_v9, %v3414_v8 }
 0x12b   :  { %v5246_v39 = vadd.f32 %v2304_v11, %v2256_v28  ;;  %v4212_v11 = vld [vmem:[%s5970_s0 + $0x384] sm:$0xf] }
 0x12c   :  { %v2159_v18 = vpop.f32.mrf.mxu2 }
 0x12d   :  { %v2208_v55 = vpop.f32.mrf.mxu3  ;;  %v2160_v41 = vadd.f32 %v2159_v18, %v4907_v10  ;;  %v4332_v10 = vld [vmem:[%s5969_s1 + $0x2c0] sm:$0xff] }
 0x12e   :  { %v2260_v49 = vpop.f32.mrf.mxu0  ;;  %2576 = vmatpush.bf16.msrb.mxu3 %v4332_v10 }
 0x12f   :  { %v2209_v48 = vadd.f32 %v2208_v55, %v2160_v41 }
 0x130   :  { %v2309_v50 = vpop.f32.mrf.mxu1 }
 0x131   :  { %v2258_v52 = vadd.f32 %v2257_v25, %v2209_v48  ;;  %2357 = vmatmul.bf16.gmra.mxu2 %v3335_v42  ;;  %2455 = vmatmul.bf16.gmra.mxu0 %v3343_v44  ;;  %v3419_v25 = vor.u32 %v4212_v11, %v3416_v12  ;;  %v3478_v42 = vld [vmem:[%s5970_s0 + $0x408] sm:$0xf]  ;;  %v4379_v44 = vld [vmem:[%s5969_s1 + $0x438] sm:$0xff]  ;;  %v3486_v48 = vld [vmem:[%s5970_s0 + $0x410] sm:$0xf] }
 0x132   :  { %2406 = vmatmul.bf16.gmra.mxu3 %v3339_v43  ;;  %v4238_v43 = vld [vmem:[%s5970_s0 + $0x44c] sm:$0xf0]  ;;  %2814 = vmatpush.bf16.msra.mxu0 %v4379_v44 }
 0x133   :  { %2504 = vmatmul.bf16.gmra.mxu1 %v3347_v47  ;;  %v5258_v56 = vadd.f32 %v2306_v62, %v2258_v52  ;;  %v3480_v47 = vld [vmem:[%s5970_s0 + $0x450] sm:$0xf0]  ;;  %v3488_v52 = vld [vmem:[%s5970_s0 + $0x458] sm:$0xf0] }
 0x134   :  { %v2162_v57 = vpop.f32.mrf.mxu2  ;;  %v4386_v44 = vld [vmem:[%s5969_s1 + $0x470] sm:$0xff] }
 0x135   :  { %v2211_v58 = vpop.f32.mrf.mxu3  ;;  %v2163_v60 = vadd.f32 %v2162_v57, %v4920_v23  ;;  %v4211_v23 = vld [vmem:[%s5970_s0 + $0x37c] sm:$0xf]  ;;  %2864 = vmatpush.bf16.msra.mxu1 %v4386_v44 }
 0x136   :  { %v2262_v54 = vpop.f32.mrf.mxu0  ;;  %v3411_v19 = vor.u32 %v4211_v23, %v3408_v7  ;;  %v4362_v23 = vld [vmem:[%s5969_s1 + $0x3b0] sm:$0xff] }
 0x137   :  { %v2212_v61 = vadd.f32 %v2211_v58, %v2163_v60  ;;  %v3479_v58 = vor.u32 %v4238_v43, %v3478_v42  ;;  %2717 = vmatpush.bf16.msra.mxu2 %v4362_v23 }
 0x138   :  { %v2311_v26 = vpop.f32.mrf.mxu1 }
 0x139   :  { %v2261_v1 = vadd.f32 %v2260_v49, %v2212_v61  ;;  %v4239_v49 = vld [vmem:[%s5970_s0 + $0x454] sm:$0xf0] }
 0x13a   :  { %v3487_v61 = vor.u32 %v4239_v49, %v3486_v48 }
 0x13b   :  { %v5288_v14 = vadd.f32 %v2309_v50, %v2261_v1  ;;  %v4230_v50 = vld [vmem:[%s5970_s0 + $0x414] sm:$0xf] }
 0x13c   :  { %v2164_v46 = vpop.f32.mrf.mxu2 }
 0x13d   :  { %v2213_v24 = vpop.f32.mrf.mxu3  ;;  %v2165_v16 = vadd.f32 %v2164_v46, %v4951_v38  ;;  %v4371_v38 = vld [vmem:[%s5969_s1 + $0x3f8] sm:$0xff] }
 0x13e   :  { %v2265_v28 = vpop.f32.mrf.mxu0  ;;  %2765 = vmatpush.bf16.msra.mxu3 %v4371_v38 }
 0x13f   :  { %v2214_v62 = vadd.f32 %v2213_v24, %v2165_v16 }
 0x140   :  { %v2314_v29 = vpop.f32.mrf.mxu1 }
 0x141   :  { %v2263_v31 = vadd.f32 %v2262_v54, %v2214_v62  ;;  %2362 = vmatmul.bf16.gmra.mxu2 %v3407_v17  ;;  %2460 = vmatmul.bf16.gmra.mxu0 %v3415_v21  ;;  %v3491_v54 = vor.u32 %v4230_v50, %v3488_v52  ;;  %v2990_v17 = vld [vmem:[%s5970_s0 + $0x28] sm:$0xf]  ;;  %v4378_v21 = vld [vmem:[%s5969_s1 + $0x430] sm:$0xff] }
 0x142   :  { %2411 = vmatmul.bf16.gmra.mxu3 %v3411_v19  ;;  %v4114_v19 = vld [vmem:[%s5970_s0 + $0x6c] sm:$0xf0]  ;;  %2815 = vmatpush.bf16.msra.mxu0 %v4378_v21  ;;  %v4385_v21 = vld [vmem:[%s5969_s1 + $0x468] sm:$0xff] }
 0x143   :  { %2509 = vmatmul.bf16.gmra.mxu1 %v3419_v25  ;;  %v5300_v32 = vadd.f32 %v2311_v26, %v2263_v31  ;;  %v2992_v25 = vld [vmem:[%s5970_s0 + $0x70] sm:$0xf0]  ;;  %v2998_v62 = vld [vmem:[%s5970_s0 + $0x30] sm:$0xf] }
 0x144   :  { %v2167_v33 = vpop.f32.mrf.mxu2  ;;  %2865 = vmatpush.bf16.msra.mxu1 %v4385_v21 }
 0x145   :  { %v2216_v34 = vpop.f32.mrf.mxu3  ;;  %v2168_v35 = vadd.f32 %v2167_v33, %v4964_v51  ;;  %v4229_v51 = vld [vmem:[%s5970_s0 + $0x40c] sm:$0xf] }
 0x146   :  { %v2267_v18 = vpop.f32.mrf.mxu0  ;;  %v3483_v60 = vor.u32 %v4229_v51, %v3480_v47  ;;  %v4361_v51 = vld [vmem:[%s5969_s1 + $0x3a8] sm:$0xff] }
 0x147   :  { %v2217_v36 = vadd.f32 %v2216_v34, %v2168_v35  ;;  %v2991_v34 = vor.u32 %v4114_v19, %v2990_v17  ;;  %2718 = vmatpush.bf16.msra.mxu2 %v4361_v51 }
 0x148   :  { %v2316_v55 = vpop.f32.mrf.mxu1 }
 0x149   :  { %v2266_v41 = vadd.f32 %v2265_v28, %v2217_v36  ;;  %v4115_v28 = vld [vmem:[%s5970_s0 + $0x74] sm:$0xf0] }
 0x14a   :  { %v2999_v36 = vor.u32 %v4115_v28, %v2998_v62 }
 0x14b   :  { %v5330_v53 = vadd.f32 %v2314_v29, %v2266_v41  ;;  %v4106_v29 = vld [vmem:[%s5970_s0 + $0x34] sm:$0xf] }
 0x14c   :  { %v2169_v13 = vpop.f32.mrf.mxu2 }
 0x14d   :  { %v2218_v10 = vpop.f32.mrf.mxu3  ;;  %v2170_v57 = vadd.f32 %v2169_v13, %v4995_v5  ;;  %v4370_v5 = vld [vmem:[%s5969_s1 + $0x3f0] sm:$0xff] }
 0x14e   :  { %v2270_v1 = vpop.f32.mrf.mxu0  ;;  %2766 = vmatpush.bf16.msra.mxu3 %v4370_v5 }
 0x14f   :  { %v2219_v26 = vadd.f32 %v2218_v10, %v2170_v57 }
 0x150   :  { %v2319_v2 = vpop.f32.mrf.mxu1 }
 0x151   :  { %v2268_v3 = vadd.f32 %v2267_v18, %v2219_v26  ;;  %2367 = vmatmul.bf16.gmra.mxu2 %v3479_v58  ;;  %2465 = vmatmul.bf16.gmra.mxu0 %v3487_v61  ;;  %v3003_v18 = vor.u32 %v4106_v29, %v3000_v30  ;;  %v3062_v58 = vld [vmem:[%s5970_s0 + $0xb8] sm:$0xf]  ;;  %v4377_v61 = vld [vmem:[%s5969_s1 + $0x428] sm:$0xff]  ;;  %v3070_v26 = vld [vmem:[%s5970_s0 + $0xc0] sm:$0xf] }
 0x152   :  { %2416 = vmatmul.bf16.gmra.mxu3 %v3483_v60  ;;  %v4132_v60 = vld [vmem:[%s5970_s0 + $0xfc] sm:$0xf0]  ;;  %2816 = vmatpush.bf16.msra.mxu0 %v4377_v61 }
 0x153   :  { %2514 = vmatmul.bf16.gmra.mxu1 %v3491_v54  ;;  %v5342_v7 = vadd.f32 %v2316_v55, %v2268_v3  ;;  %v3064_v54 = vld [vmem:[%s5970_s0 + $0x100] sm:$0xf0]  ;;  %v3072_v3 = vld [vmem:[%s5970_s0 + $0x108] sm:$0xf0] }
 0x154   :  { %v2172_v8 = vpop.f32.mrf.mxu2  ;;  %v4384_v61 = vld [vmem:[%s5969_s1 + $0x460] sm:$0xff] }
 0x155   :  { %v2221_v9 = vpop.f32.mrf.mxu3  ;;  %v2173_v11 = vadd.f32 %v2172_v8, %v5008_v20  ;;  %v4105_v20 = vld [vmem:[%s5970_s0 + $0x2c] sm:$0xf]  ;;  %2866 = vmatpush.bf16.msra.mxu1 %v4384_v61 }
 0x156   :  { %v2272_v46 = vpop.f32.mrf.mxu0  ;;  %v2995_v35 = vor.u32 %v4105_v20, %v2992_v25  ;;  %v4360_v20 = vld [vmem:[%s5969_s1 + $0x3a0] sm:$0xff] }
 0x157   :  { %v2222_v12 = vadd.f32 %v2221_v9, %v2173_v11  ;;  %v3063_v9 = vor.u32 %v4132_v60, %v3062_v58  ;;  %2719 = vmatpush.bf16.msra.mxu2 %v4360_v20 }
 0x158   :  { %v2321_v24 = vpop.f32.mrf.mxu1 }
 0x159   :  { %v2271_v16 = vadd.f32 %v2270_v1, %v2222_v12  ;;  %v4133_v1 = vld [vmem:[%s5970_s0 + $0x104] sm:$0xf0] }
 0x15a   :  { %v3071_v12 = vor.u32 %v4133_v1, %v3070_v26 }
 0x15b   :  { %v5372_v31 = vadd.f32 %v2319_v2, %v2271_v16  ;;  %v4124_v2 = vld [vmem:[%s5970_s0 + $0xc4] sm:$0xf] }
 0x15c   :  { %v2174_v59 = vpop.f32.mrf.mxu2 }
 0x15d   :  { %v2223_v38 = vpop.f32.mrf.mxu3  ;;  %v2175_v33 = vadd.f32 %v2174_v59, %v5039_v37  ;;  %v4369_v37 = vld [vmem:[%s5969_s1 + $0x3e8] sm:$0xff] }
 0x15e   :  { %v2431_v41 = vpop.f32.mrf.mxu0  ;;  %2767 = vmatpush.bf16.msra.mxu3 %v4369_v37 }
 0x15f   :  { %v2224_v55 = vadd.f32 %v2223_v38, %v2175_v33 }
 0x160   :  { %v2480_v42 = vpop.f32.mrf.mxu1 }
 0x161   :  { %v2273_v43 = vadd.f32 %v2272_v46, %v2224_v55  ;;  %2528 = vmatmul.bf16.vlgmr.msrb.gmra.mxu2 %v2991_v34  ;;  %2626 = vmatmul.bf16.vlgmr.msrb.gmra.mxu0 %v2999_v36  ;;  %v3075_v46 = vor.u32 %v4124_v2, %v3072_v3  ;;  %v3134_v34 = vld [vmem:[%s5970_s0 + $0x148] sm:$0xf]  ;;  %v4376_v36 = vld [vmem:[%s5969_s1 + $0x420] sm:$0xff]  ;;  %v3142_v55 = vld [vmem:[%s5970_s0 + $0x150] sm:$0xf] }
 0x162   :  { %2577 = vmatmul.bf16.vlgmr.msrb.gmra.mxu3 %v2995_v35  ;;  %v4150_v35 = vld [vmem:[%s5970_s0 + $0x18c] sm:$0xf0]  ;;  %2817 = vmatpush.bf16.msra.mxu0 %v4376_v36  ;;  %v4383_v36 = vld [vmem:[%s5969_s1 + $0x458] sm:$0xff] }
 0x163   :  { %2675 = vmatmul.bf16.vlgmr.msrb.gmra.mxu1 %v3003_v18  ;;  %v5384_v47 = vadd.f32 %v2321_v24, %v2273_v43  ;;  %v3136_v18 = vld [vmem:[%s5970_s0 + $0x190] sm:$0xf0]  ;;  %v3144_v43 = vld [vmem:[%s5970_s0 + $0x198] sm:$0xf0] }
 0x164   :  { %v2333_v48 = vpop.f32.mrf.mxu2  ;;  %2867 = vmatpush.bf16.msra.mxu1 %v4383_v36 }
 0x165   :  { %v2382_v49 = vpop.f32.mrf.mxu3  ;;  %v2334_v50 = vadd.f32 %v2333_v48, %v5078_v6  ;;  %v4123_v6 = vld [vmem:[%s5970_s0 + $0xbc] sm:$0xf] }
 0x166   :  { %v2433_v13 = vpop.f32.mrf.mxu0  ;;  %v3067_v11 = vor.u32 %v4123_v6, %v3064_v54  ;;  %v4359_v6 = vld [vmem:[%s5969_s1 + $0x398] sm:$0xff] }
 0x167   :  { %v2383_v52 = vadd.f32 %v2382_v49, %v2334_v50  ;;  %v3135_v49 = vor.u32 %v4150_v35, %v3134_v34  ;;  %2720 = vmatpush.bf16.msra.mxu2 %v4359_v6 }
 0x168   :  { %v2482_v10 = vpop.f32.mrf.mxu1 }
 0x169   :  { %v2432_v57 = vadd.f32 %v2431_v41, %v2383_v52  ;;  %v4151_v41 = vld [vmem:[%s5970_s0 + $0x194] sm:$0xf0] }
 0x16a   :  { %v3143_v52 = vor.u32 %v4151_v41, %v3142_v55 }
 0x16b   :  { %v5414_v4 = vadd.f32 %v2480_v42, %v2432_v57  ;;  %v4142_v42 = vld [vmem:[%s5970_s0 + $0x154] sm:$0xf] }
 0x16c   :  { %v2335_v23 = vpop.f32.mrf.mxu2 }
 0x16d   :  { %v2384_v5 = vpop.f32.mrf.mxu3  ;;  %v2336_v8 = vadd.f32 %v2335_v23, %v5090_v27  ;;  %v4368_v27 = vld [vmem:[%s5969_s1 + $0x3e0] sm:$0xff] }
 0x16e   :  { %v2436_v16 = vpop.f32.mrf.mxu0  ;;  %2768 = vmatpush.bf16.msra.mxu3 %v4368_v27 }
 0x16f   :  { %v2385_v24 = vadd.f32 %v2384_v5, %v2336_v8 }
 0x170   :  { %v2485_v17 = vpop.f32.mrf.mxu1 }
 0x171   :  { %v2434_v19 = vadd.f32 %v2433_v13, %v2385_v24  ;;  %2533 = vmatmul.bf16.gmra.mxu2 %v3063_v9  ;;  %2631 = vmatmul.bf16.gmra.mxu0 %v3071_v12  ;;  %v3147_v13 = vor.u32 %v4142_v42, %v3144_v43  ;;  %v3206_v9 = vld [vmem:[%s5970_s0 + $0x1d8] sm:$0xf]  ;;  %v3214_v24 = vld [vmem:[%s5970_s0 + $0x1e0] sm:$0xf] }
 0x172   :  { %2582 = vmatmul.bf16.gmra.mxu3 %v3067_v11  ;;  %v4168_v11 = vld [vmem:[%s5970_s0 + $0x21c] sm:$0xf0]  ;;  %v4375_v12 = vld [vmem:[%s5969_s1 + $0x418] sm:$0xff] }
 0x173   :  { %2680 = vmatmul.bf16.gmra.mxu1 %v3075_v46  ;;  %v5426_v25 = vadd.f32 %v2482_v10, %v2434_v19  ;;  %v3208_v46 = vld [vmem:[%s5970_s0 + $0x220] sm:$0xf0]  ;;  %v3216_v19 = vld [vmem:[%s5970_s0 + $0x228] sm:$0xf0]  ;;  %2818 = vmatpush.bf16.msra.mxu0 %v4375_v12  ;;  %v4382_v12 = vld [vmem:[%s5969_s1 + $0x450] sm:$0xff] }
 0x174   :  { %v2338_v62 = vpop.f32.mrf.mxu2  ;;  %2868 = vmatpush.bf16.msra.mxu1 %v4382_v12 }
 0x175   :  { %v2387_v28 = vpop.f32.mrf.mxu3  ;;  %v2339_v29 = vadd.f32 %v2338_v62, %v5120_v45  ;;  %v4141_v45 = vld [vmem:[%s5970_s0 + $0x14c] sm:$0xf] }
 0x176   :  { %v2438_v59 = vpop.f32.mrf.mxu0  ;;  %v3139_v50 = vor.u32 %v4141_v45, %v3136_v18  ;;  %v4358_v45 = vld [vmem:[%s5969_s1 + $0x390] sm:$0xff] }
 0x177   :  { %v2388_v30 = vadd.f32 %v2387_v28, %v2339_v29  ;;  %v3207_v28 = vor.u32 %v4168_v11, %v3206_v9  ;;  %2721 = vmatpush.bf16.msra.mxu2 %v4358_v45 }
 0x178   :  { %v2487_v38 = vpop.f32.mrf.mxu1 }
 0x179   :  { %v2437_v33 = vadd.f32 %v2436_v16, %v2388_v30  ;;  %v4169_v16 = vld [vmem:[%s5970_s0 + $0x224] sm:$0xf0] }
 0x17a   :  { %v3215_v30 = vor.u32 %v4169_v16, %v3214_v24 }
 0x17b   :  { %v5456_v44 = vadd.f32 %v2485_v17, %v2437_v33  ;;  %v4160_v17 = vld [vmem:[%s5970_s0 + $0x1e4] sm:$0xf] }
 0x17c   :  { %v2340_v51 = vpop.f32.mrf.mxu2 }
 0x17d   :  { %v2389_v37 = vpop.f32.mrf.mxu3  ;;  %v2341_v48 = vadd.f32 %v2340_v51, %v5132_v0  ;;  %v4367_v0 = vld [vmem:[%s5969_s1 + $0x3d8] sm:$0xff] }
 0x17e   :  { %v2441_v57 = vpop.f32.mrf.mxu0  ;;  %2769 = vmatpush.bf16.msra.mxu3 %v4367_v0 }
 0x17f   :  { %v2390_v10 = vadd.f32 %v2389_v37, %v2341_v48 }
 0x180   :  { %v2490_v58 = vpop.f32.mrf.mxu1 }
 0x181   :  { %v2439_v60 = vadd.f32 %v2438_v59, %v2390_v10  ;;  %2538 = vmatmul.bf16.gmra.mxu2 %v3135_v49  ;;  %2636 = vmatmul.bf16.gmra.mxu0 %v3143_v52  ;;  %v3219_v59 = vor.u32 %v4160_v17, %v3216_v19  ;;  %v3278_v49 = vld [vmem:[%s5970_s0 + $0x268] sm:$0xf]  ;;  %v4374_v52 = vld [vmem:[%s5969_s1 + $0x410] sm:$0xff] }
 0x182   :  { %2587 = vmatmul.bf16.gmra.mxu3 %v3139_v50  ;;  %v4186_v50 = vld [vmem:[%s5970_s0 + $0x2ac] sm:$0xf0]  ;;  %2819 = vmatpush.bf16.msra.mxu0 %v4374_v52  ;;  %v4381_v52 = vld [vmem:[%s5969_s1 + $0x448] sm:$0xff] }
 0x183   :  { %2685 = vmatmul.bf16.gmra.mxu1 %v3147_v13  ;;  %v5468_v54 = vadd.f32 %v2487_v38, %v2439_v60  ;;  %v3280_v13 = vld [vmem:[%s5970_s0 + $0x2b0] sm:$0xf0]  ;;  %v3286_v10 = vld [vmem:[%s5970_s0 + $0x270] sm:$0xf]  ;;  %v3288_v60 = vld [vmem:[%s5970_s0 + $0x2b8] sm:$0xf0] }
 0x184   :  { %v2343_v26 = vpop.f32.mrf.mxu2  ;;  %2869 = vmatpush.bf16.msra.mxu1 %v4381_v52 }
 0x185   :  { %v2392_v1 = vpop.f32.mrf.mxu3  ;;  %v2344_v2 = vadd.f32 %v2343_v26, %v5162_v22  ;;  %v4159_v22 = vld [vmem:[%s5970_s0 + $0x1dc] sm:$0xf] }
 0x186   :  { %v2443_v23 = vpop.f32.mrf.mxu0  ;;  %v3211_v29 = vor.u32 %v4159_v22, %v3208_v46  ;;  %v4357_v22 = vld [vmem:[%s5969_s1 + $0x388] sm:$0xff] }
 0x187   :  { %v2393_v3 = vadd.f32 %v2392_v1, %v2344_v2  ;;  %v3279_v1 = vor.u32 %v4186_v50, %v3278_v49  ;;  %2722 = vmatpush.bf16.msra.mxu2 %v4357_v22 }
 0x188   :  { %v2492_v5 = vpop.f32.mrf.mxu1 }
 0x189   :  { %v2442_v8 = vadd.f32 %v2441_v57, %v2393_v3  ;;  %v4187_v57 = vld [vmem:[%s5970_s0 + $0x2b4] sm:$0xf0] }
 0x18a   :  { %v3287_v3 = vor.u32 %v4187_v57, %v3286_v10 }
 0x18b   :  { %v5498_v21 = vadd.f32 %v2490_v58, %v2442_v8  ;;  %v4178_v58 = vld [vmem:[%s5970_s0 + $0x274] sm:$0xf] }
 0x18c   :  { %v2345_v20 = vpop.f32.mrf.mxu2 }
 0x18d   :  { %v2394_v27 = vpop.f32.mrf.mxu3  ;;  %v2346_v62 = vadd.f32 %v2345_v20, %v5174_v40  ;;  %v4366_v40 = vld [vmem:[%s5969_s1 + $0x3d0] sm:$0xff] }
 0x18e   :  { %v2446_v33 = vpop.f32.mrf.mxu0  ;;  %2770 = vmatpush.bf16.msra.mxu3 %v4366_v40 }
 0x18f   :  { %v2395_v38 = vadd.f32 %v2394_v27, %v2346_v62 }
 0x190   :  { %v2495_v34 = vpop.f32.mrf.mxu1 }
 0x191   :  { %v2444_v35 = vadd.f32 %v2443_v23, %v2395_v38  ;;  %2543 = vmatmul.bf16.gmra.mxu2 %v3207_v28  ;;  %2641 = vmatmul.bf16.gmra.mxu0 %v3215_v30  ;;  %v3291_v23 = vor.u32 %v4178_v58, %v3288_v60  ;;  %v3350_v28 = vld [vmem:[%s5970_s0 + $0x2f8] sm:$0xf]  ;;  %v4373_v30 = vld [vmem:[%s5969_s1 + $0x408] sm:$0xff]  ;;  %v3358_v38 = vld [vmem:[%s5970_s0 + $0x300] sm:$0xf] }
 0x192   :  { %2592 = vmatmul.bf16.gmra.mxu3 %v3211_v29  ;;  %v4204_v29 = vld [vmem:[%s5970_s0 + $0x33c] sm:$0xf0]  ;;  %2820 = vmatpush.bf16.msra.mxu0 %v4373_v30 }
 0x193   :  { %2690 = vmatmul.bf16.gmra.mxu1 %v3219_v59  ;;  %v5510_v18 = vadd.f32 %v2492_v5, %v2444_v35  ;;  %v3352_v59 = vld [vmem:[%s5970_s0 + $0x340] sm:$0xf0]  ;;  %v3360_v35 = vld [vmem:[%s5970_s0 + $0x348] sm:$0xf0] }
 0x194   :  { %v2348_v55 = vpop.f32.mrf.mxu2 }
 0x195   :  { %v2397_v41 = vpop.f32.mrf.mxu3  ;;  %v2349_v42 = vadd.f32 %v2348_v55, %v5204_v63  ;;  %v4177_v63 = vld [vmem:[%s5970_s0 + $0x26c] sm:$0xf] }
 0x196   :  { %v2448_v51 = vpop.f32.mrf.mxu0  ;;  %v3283_v2 = vor.u32 %v4177_v63, %v3280_v13  ;;  %v4356_v63 = vld [vmem:[%s5969_s1 + $0x380] sm:$0xff] }
 0x197   :  { %v2398_v43 = vadd.f32 %v2397_v41, %v2349_v42  ;;  %v3351_v41 = vor.u32 %v4204_v29, %v3350_v28  ;;  %2723 = vmatpush.bf16.msra.mxu2 %v4356_v63  ;;  %v4380_v29 = vld [vmem:[%s5969_s1 + $0x440] sm:$0xff] }
 0x198   :  { %v2497_v37 = vpop.f32.mrf.mxu1  ;;  %2870 = vmatpush.bf16.msra.mxu1 %v4380_v29 }
 0x199   :  { %v2447_v48 = vadd.f32 %v2446_v33, %v2398_v43  ;;  %v4205_v33 = vld [vmem:[%s5970_s0 + $0x344] sm:$0xf0] }
 0x19a   :  { %v3359_v43 = vor.u32 %v4205_v33, %v3358_v38 }
 0x19b   :  { %v5540_v61 = vadd.f32 %v2495_v34, %v2447_v48  ;;  %v4196_v34 = vld [vmem:[%s5970_s0 + $0x304] sm:$0xf] }
 0x19c   :  { %v2350_v6 = vpop.f32.mrf.mxu2 }
 0x19d   :  { %v2399_v0 = vpop.f32.mrf.mxu3  ;;  %v2351_v26 = vadd.f32 %v2350_v6, %v5216_v15  ;;  %v4365_v15 = vld [vmem:[%s5969_s1 + $0x3c8] sm:$0xff] }
 0x19e   :  { %v2451_v8 = vpop.f32.mrf.mxu0  ;;  %2771 = vmatpush.bf16.msra.mxu3 %v4365_v15 }
 0x19f   :  { %v2400_v5 = vadd.f32 %v2399_v0, %v2351_v26 }
 0x1a0   :  { %v2500_v9 = vpop.f32.mrf.mxu1 }
 0x1a1   :  { %v2449_v11 = vadd.f32 %v2448_v51, %v2400_v5  ;;  %2548 = vmatmul.bf16.gmra.mxu2 %v3279_v1  ;;  %2646 = vmatmul.bf16.gmra.mxu0 %v3287_v3  ;;  %v3363_v51 = vor.u32 %v4196_v34, %v3360_v35  ;;  %v3422_v1 = vld [vmem:[%s5970_s0 + $0x388] sm:$0xf]  ;;  %v4372_v3 = vld [vmem:[%s5969_s1 + $0x400] sm:$0xff]  ;;  %v3430_v5 = vld [vmem:[%s5970_s0 + $0x390] sm:$0xf] }
 0x1a2   :  { %2597 = vmatmul.bf16.gmra.mxu3 %v3283_v2  ;;  %v4222_v2 = vld [vmem:[%s5970_s0 + $0x3cc] sm:$0xf0]  ;;  %2821 = vmatpush.bf16.msra.mxu0 %v4372_v3 }
 0x1a3   :  { %2695 = vmatmul.bf16.gmra.mxu1 %v3291_v23  ;;  %v5552_v46 = vadd.f32 %v2497_v37, %v2449_v11  ;;  %v3424_v23 = vld [vmem:[%s5970_s0 + $0x3d0] sm:$0xf0]  ;;  %v3432_v11 = vld [vmem:[%s5970_s0 + $0x3d8] sm:$0xf0] }
 0x1a4   :  { %v2353_v24 = vpop.f32.mrf.mxu2 }
 0x1a5   :  { %v2402_v16 = vpop.f32.mrf.mxu3  ;;  %v2354_v17 = vadd.f32 %v2353_v24, %v5246_v39  ;;  %v4195_v39 = vld [vmem:[%s5970_s0 + $0x2fc] sm:$0xf] }
 0x1a6   :  { %v2453_v20 = vpop.f32.mrf.mxu0  ;;  %v3355_v42 = vor.u32 %v4195_v39, %v3352_v59 }
 0x1a7   :  { %v2403_v19 = vadd.f32 %v2402_v16, %v2354_v17  ;;  %v3423_v16 = vor.u32 %v4222_v2, %v3422_v1 }
 0x1a8   :  { %v2502_v27 = vpop.f32.mrf.mxu1 }
 0x1a9   :  { %v2452_v62 = vadd.f32 %v2451_v8, %v2403_v19  ;;  %v4223_v8 = vld [vmem:[%s5970_s0 + $0x3d4] sm:$0xf0] }
 0x1aa   :  { %v3431_v19 = vor.u32 %v4223_v8, %v3430_v5  ;;  %v3006_v8 = vld [vmem:[%s5970_s0 + $0x38] sm:$0xf] }
 0x1ab   :  { %v5582_v36 = vadd.f32 %v2500_v9, %v2452_v62  ;;  %v4214_v9 = vld [vmem:[%s5970_s0 + $0x394] sm:$0xf] }
 0x1ac   :  { %v2355_v45 = vpop.f32.mrf.mxu2 }
 0x1ad   :  { %v2404_v40 = vpop.f32.mrf.mxu3  ;;  %v2356_v55 = vadd.f32 %v2355_v45, %v5258_v56  ;;  %v4364_v56 = vld [vmem:[%s5969_s1 + $0x3c0] sm:$0xff] }
 0x1ae   :  { %v2456_v48 = vpop.f32.mrf.mxu0  ;;  %2772 = vmatpush.bf16.msra.mxu3 %v4364_v56 }
 0x1af   :  { %v2405_v37 = vadd.f32 %v2404_v40, %v2356_v55  ;;  %v3494_v40 = vld [vmem:[%s5970_s0 + $0x418] sm:$0xf]  ;;  %v4240_v55 = vld [vmem:[%s5970_s0 + $0x45c] sm:$0xf0] }
 0x1b0   :  { %v2505_v49 = vpop.f32.mrf.mxu1  ;;  %v3495_v63 = vor.u32 %v4240_v55, %v3494_v40 }
 0x1b1   :  { %v2454_v50 = vadd.f32 %v2453_v20, %v2405_v37  ;;  %2553 = vmatmul.bf16.gmra.mxu2 %v3351_v41  ;;  %2651 = vmatmul.bf16.gmra.mxu0 %v3359_v43  ;;  %v3435_v20 = vor.u32 %v4214_v9, %v3432_v11  ;;  %v4231_v41 = vld [vmem:[%s5970_s0 + $0x41c] sm:$0xf]  ;;  %v4241_v43 = vld [vmem:[%s5970_s0 + $0x464] sm:$0xf0]  ;;  %v3504_v37 = vld [vmem:[%s5970_s0 + $0x468] sm:$0xf0] }
 0x1b2   :  { %2602 = vmatmul.bf16.gmra.mxu3 %v3355_v42  ;;  %v3502_v42 = vld [vmem:[%s5970_s0 + $0x420] sm:$0xf]  ;;  %v4107_v11 = vld [vmem:[%s5970_s0 + $0x3c] sm:$0xf] }
 0x1b3   :  { %2700 = vmatmul.bf16.gmra.mxu1 %v3363_v51  ;;  %v5594_v13 = vadd.f32 %v2502_v27, %v2454_v50  ;;  %v4232_v51 = vld [vmem:[%s5970_s0 + $0x424] sm:$0xf]  ;;  %v4116_v9 = vld [vmem:[%s5970_s0 + $0x7c] sm:$0xf0] }
 0x1b4   :  { %v2358_v10 = vpop.f32.mrf.mxu2 }
 0x1b5   :  { %v2407_v57 = vpop.f32.mrf.mxu3  ;;  %v2359_v58 = vadd.f32 %v2358_v10, %v5288_v14  ;;  %v4213_v14 = vld [vmem:[%s5970_s0 + $0x38c] sm:$0xf]  ;;  %v3503_v10 = vor.u32 %v4241_v43, %v3502_v42  ;;  %v3078_v42 = vld [vmem:[%s5970_s0 + $0xc8] sm:$0xf]  ;;  %v4134_v43 = vld [vmem:[%s5970_s0 + $0x10c] sm:$0xf0] }
 0x1b6   :  { %v2458_v6 = vpop.f32.mrf.mxu0  ;;  %v3427_v17 = vor.u32 %v4213_v14, %v3424_v23 }
 0x1b7   :  { %v2408_v60 = vadd.f32 %v2407_v57, %v2359_v58  ;;  %v3507_v57 = vor.u32 %v4232_v51, %v3504_v37  ;;  %v4125_v51 = vld [vmem:[%s5970_s0 + $0xcc] sm:$0xf]  ;;  %v3086_v37 = vld [vmem:[%s5970_s0 + $0xd0] sm:$0xf] }
 0x1b8   :  { %v2507_v0 = vpop.f32.mrf.mxu1 }
 0x1b9   :  { %v2457_v26 = vadd.f32 %v2456_v48, %v2408_v60 }
 0x1bb   :  { %v5624_v12 = vadd.f32 %v2505_v49, %v2457_v26 }
 0x1bc   :  { %v2360_v22 = vpop.f32.mrf.mxu2 }
 0x1bd   :  { %v2409_v15 = vpop.f32.mrf.mxu3  ;;  %v2361_v24 = vadd.f32 %v2360_v22, %v5300_v32  ;;  %v3014_v22 = vld [vmem:[%s5970_s0 + $0x40] sm:$0xf] }
 0x1be   :  { %v2461_v62 = vpop.f32.mrf.mxu0 }
 0x1bf   :  { %v2410_v27 = vadd.f32 %v2409_v15, %v2361_v24  ;;  %v4117_v15 = vld [vmem:[%s5970_s0 + $0x84] sm:$0xf0]  ;;  %v4108_v24 = vld [vmem:[%s5970_s0 + $0x44] sm:$0xf] }
 0x1c0   :  { %v2510_v28 = vpop.f32.mrf.mxu1  ;;  %v3015_v29 = vor.u32 %v4117_v15, %v3014_v22  ;;  %v3150_v22 = vld [vmem:[%s5970_s0 + $0x158] sm:$0xf]  ;;  %v4152_v15 = vld [vmem:[%s5970_s0 + $0x19c] sm:$0xf0] }
 0x1c1   :  { %v2459_v30 = vadd.f32 %v2458_v6, %v2410_v27  ;;  %2558 = vmatmul.bf16.gmra.mxu2 %v3423_v16  ;;  %2656 = vmatmul.bf16.gmra.mxu0 %v3431_v19  ;;  %v3016_v16 = vld [vmem:[%s5970_s0 + $0x88] sm:$0xf0] }
 0x1c2   :  { %2607 = vmatmul.bf16.gmra.mxu3 %v3427_v17 }
 0x1c3   :  { %2705 = vmatmul.bf16.gmra.mxu1 %v3435_v20  ;;  %v5630_v39 = vadd.f32 %v2507_v0, %v2459_v30  ;;  %v3019_v30 = vor.u32 %v4108_v24, %v3016_v16  ;;  %v4143_v24 = vld [vmem:[%s5970_s0 + $0x15c] sm:$0xf]  ;;  %v3158_v16 = vld [vmem:[%s5970_s0 + $0x160] sm:$0xf] }
 0x1c4   :  { %v2363_v32 = vpop.f32.mrf.mxu2 }
 0x1c5   :  { %v2412_v59 = vpop.f32.mrf.mxu3  ;;  %v2364_v38 = vadd.f32 %v2363_v32, %v5330_v53  ;;  %v3496_v53 = vld [vmem:[%s5970_s0 + $0x460] sm:$0xf0] }
 0x1c6   :  { %v2463_v34 = vpop.f32.mrf.mxu0  ;;  %v3499_v56 = vor.u32 %v4231_v41, %v3496_v53 }
 0x1c7   :  { %v2413_v33 = vadd.f32 %v2412_v59, %v2364_v38 }
 0x1c8   :  { %v2512_v35 = vpop.f32.mrf.mxu1 }
 0x1c9   :  { %v2462_v45 = vadd.f32 %v2461_v62, %v2413_v33  ;;  %v3007_v62 = vor.u32 %v4116_v9, %v3006_v8 }
 0x1cb   :  { %v5657_v48 = vadd.f32 %v2510_v28, %v2462_v45 }
 0x1cc   :  { %v2365_v49 = vpop.f32.mrf.mxu2 }
 0x1cd   :  { %v2414_v50 = vpop.f32.mrf.mxu3  ;;  %v2366_v52 = vadd.f32 %v2365_v49, %v5342_v7  ;;  %v4135_v49 = vld [vmem:[%s5970_s0 + $0x114] sm:$0xf0] }
 0x1ce   :  { %v2466_v60 = vpop.f32.mrf.mxu0 }
 0x1cf   :  { %v2415_v58 = vadd.f32 %v2414_v50, %v2366_v52  ;;  %v4126_v50 = vld [vmem:[%s5970_s0 + $0xd4] sm:$0xf]  ;;  %v3088_v52 = vld [vmem:[%s5970_s0 + $0x118] sm:$0xf0] }
 0x1d0   :  { %v2515_v6 = vpop.f32.mrf.mxu1 }
 0x1d1   :  { %v2464_v0 = vadd.f32 %v2463_v34, %v2415_v58  ;;  %2563 = vmatmul.bf16.gmra.mxu2 %v3495_v63  ;;  %2661 = vmatmul.bf16.gmra.mxu0 %v3503_v10  ;;  %v3079_v58 = vor.u32 %v4134_v43, %v3078_v42 }
 0x1d2   :  { %2612 = vmatmul.bf16.gmra.mxu3 %v3499_v56 }
 0x1d3   :  { %2710 = vmatmul.bf16.gmra.mxu1 %v3507_v57  ;;  %v5660_v26 = vadd.f32 %v2512_v35, %v2464_v0  ;;  %v3091_v0 = vor.u32 %v4126_v50, %v3088_v52  ;;  %v4161_v50 = vld [vmem:[%s5970_s0 + $0x1ec] sm:$0xf]  ;;  %v3230_v52 = vld [vmem:[%s5970_s0 + $0x1f0] sm:$0xf] }
 0x1d4   :  { %v2368_v1 = vpop.f32.mrf.mxu2 }
 0x1d5   :  { %v2417_v2 = vpop.f32.mrf.mxu3  ;;  %v2369_v3 = vadd.f32 %v2368_v1, %v5372_v31  ;;  %v3008_v31 = vld [vmem:[%s5970_s0 + $0x80] sm:$0xf0] }
 0x1d6   :  { %v2468_v7 = vpop.f32.mrf.mxu0  ;;  %v3011_v28 = vor.u32 %v4107_v11, %v3008_v31 }
 0x1d7   :  { %v2418_v14 = vadd.f32 %v2417_v2, %v2369_v3 }
 0x1d8   :  { %v2517_v23 = vpop.f32.mrf.mxu1 }
 0x1d9   :  { %v2467_v5 = vadd.f32 %v2466_v60, %v2418_v14 }
 0x1db   :  { %v5687_v17 = vadd.f32 %v2515_v6, %v2467_v5  ;;  %v3087_v6 = vor.u32 %v4135_v49, %v3086_v37  ;;  %v3222_v37 = vld [vmem:[%s5970_s0 + $0x1e8] sm:$0xf]  ;;  %v4170_v49 = vld [vmem:[%s5970_s0 + $0x22c] sm:$0xf0] }
 0x1dc   :  { %v2370_v19 = vpop.f32.mrf.mxu2 }
 0x1dd   :  { %v2419_v20 = vpop.f32.mrf.mxu3  ;;  %v2371_v27 = vadd.f32 %v2370_v19, %v5384_v47  ;;  %v4153_v19 = vld [vmem:[%s5970_s0 + $0x1a4] sm:$0xf0] }
 0x1de   :  { %v2627_v59 = vpop.f32.mrf.mxu0 }
 0x1df   :  { %v2420_v32 = vadd.f32 %v2419_v20, %v2371_v27  ;;  %v4144_v20 = vld [vmem:[%s5970_s0 + $0x164] sm:$0xf]  ;;  %v3160_v27 = vld [vmem:[%s5970_s0 + $0x1a8] sm:$0xf0] }
 0x1e0   :  { %v2676_v38 = vpop.f32.mrf.mxu1 }
 0x1e1   :  { %v2469_v33 = vadd.f32 %v2468_v7, %v2420_v32  ;;  %2724 = vmatmul.bf16.vlgmr.msra.gmra.mxu2 %v3007_v62  ;;  %2822 = vmatmul.bf16.vlgmr.msra.gmra.mxu0 %v3015_v29  ;;  %v3151_v32 = vor.u32 %v4152_v15, %v3150_v22 }
 0x1e2   :  { %2773 = vmatmul.bf16.vlgmr.msra.gmra.mxu3 %v3011_v28 }
 0x1e3   :  { %2871 = vmatmul.bf16.vlgmr.msra.gmra.mxu1 %v3019_v30  ;;  %v5690_v34 = vadd.f32 %v2517_v23, %v2469_v33  ;;  %v3163_v33 = vor.u32 %v4144_v20, %v3160_v27  ;;  %v4179_v20 = vld [vmem:[%s5970_s0 + $0x27c] sm:$0xf]  ;;  %v3302_v27 = vld [vmem:[%s5970_s0 + $0x280] sm:$0xf] }
 0x1e4   :  { %v2529_v35 = vpop.f32.mrf.mxu2 }
 0x1e5   :  { %v2578_v45 = vpop.f32.mrf.mxu3  ;;  %v2530_v40 = vadd.f32 %v2529_v35, %v5414_v4  ;;  %v3080_v4 = vld [vmem:[%s5970_s0 + $0x110] sm:$0xf0] }
 0x1e6   :  { %v2629_v47 = vpop.f32.mrf.mxu0  ;;  %v3083_v60 = vor.u32 %v4125_v51, %v3080_v4 }
 0x1e7   :  { %v2579_v55 = vadd.f32 %v2578_v45, %v2530_v40 }
 0x1e8   :  { %v2678_v41 = vpop.f32.mrf.mxu1 }
 0x1e9   :  { %v2628_v53 = vadd.f32 %v2627_v59, %v2579_v55 }
 0x1eb   :  { %v5717_v63 = vadd.f32 %v2676_v38, %v2628_v53  ;;  %v3159_v38 = vor.u32 %v4153_v19, %v3158_v16  ;;  %v3294_v16 = vld [vmem:[%s5970_s0 + $0x278] sm:$0xf]  ;;  %v4188_v19 = vld [vmem:[%s5970_s0 + $0x2bc] sm:$0xf0] }
 0x1ec   :  { %v2531_v56 = vpop.f32.mrf.mxu2 }
 0x1ed   :  { %v2580_v10 = vpop.f32.mrf.mxu3  ;;  %v2532_v57 = vadd.f32 %v2531_v56, %v5426_v25  ;;  %v4171_v56 = vld [vmem:[%s5970_s0 + $0x234] sm:$0xf0] }
 0x1ee   :  { %v2632_v2 = vpop.f32.mrf.mxu0 }
 0x1ef   :  { %v2581_v1 = vadd.f32 %v2580_v10, %v2532_v57  ;;  %v4162_v10 = vld [vmem:[%s5970_s0 + $0x1f4] sm:$0xf]  ;;  %v3232_v57 = vld [vmem:[%s5970_s0 + $0x238] sm:$0xf0] }
 0x1f0   :  { %v2681_v3 = vpop.f32.mrf.mxu1 }
 0x1f1   :  { %v2630_v14 = vadd.f32 %v2629_v47, %v2581_v1  ;;  %2729 = vmatmul.bf16.gmra.mxu2 %v3079_v58  ;;  %2827 = vmatmul.bf16.gmra.mxu0 %v3087_v6  ;;  %v3223_v1 = vor.u32 %v4170_v49, %v3222_v37 }
 0x1f2   :  { %2778 = vmatmul.bf16.gmra.mxu3 %v3083_v60 }
 0x1f3   :  { %2876 = vmatmul.bf16.gmra.mxu1 %v3091_v0  ;;  %v5720_v7 = vadd.f32 %v2678_v41, %v2630_v14  ;;  %v3235_v14 = vor.u32 %v4162_v10, %v3232_v57  ;;  %v4197_v10 = vld [vmem:[%s5970_s0 + $0x30c] sm:$0xf]  ;;  %v3374_v57 = vld [vmem:[%s5970_s0 + $0x310] sm:$0xf] }
 0x1f4   :  { %v2534_v23 = vpop.f32.mrf.mxu2 }
 0x1f5   :  { %v2583_v5 = vpop.f32.mrf.mxu3  ;;  %v2535_v8 = vadd.f32 %v2534_v23, %v5456_v44  ;;  %v3152_v44 = vld [vmem:[%s5970_s0 + $0x1a0] sm:$0xf0] }
 0x1f6   :  { %v2634_v25 = vpop.f32.mrf.mxu0  ;;  %v3155_v59 = vor.u32 %v4143_v24, %v3152_v44 }
 0x1f7   :  { %v2584_v9 = vadd.f32 %v2583_v5, %v2535_v8 }
 0x1f8   :  { %v2683_v11 = vpop.f32.mrf.mxu1 }
 0x1f9   :  { %v2633_v31 = vadd.f32 %v2632_v2, %v2584_v9 }
 0x1fb   :  { %v5747_v62 = vadd.f32 %v2681_v3, %v2633_v31  ;;  %v3231_v3 = vor.u32 %v4171_v56, %v3230_v52  ;;  %v3366_v52 = vld [vmem:[%s5970_s0 + $0x308] sm:$0xf]  ;;  %v4206_v56 = vld [vmem:[%s5970_s0 + $0x34c] sm:$0xf0] }
 0x1fc   :  { %v2536_v28 = vpop.f32.mrf.mxu2 }
 0x1fd   :  { %v2585_v29 = vpop.f32.mrf.mxu3  ;;  %v2537_v30 = vadd.f32 %v2536_v28, %v5468_v54  ;;  %v4189_v28 = vld [vmem:[%s5970_s0 + $0x2c4] sm:$0xf0] }
 0x1fe   :  { %v2637_v45 = vpop.f32.mrf.mxu0 }
 0x1ff   :  { %v2586_v35 = vadd.f32 %v2585_v29, %v2537_v30  ;;  %v4180_v29 = vld [vmem:[%s5970_s0 + $0x284] sm:$0xf]  ;;  %v3304_v30 = vld [vmem:[%s5970_s0 + $0x2c8] sm:$0xf0] }
 0x200   :  { %v2686_v40 = vpop.f32.mrf.mxu1 }
 0x201   :  { %v2635_v55 = vadd.f32 %v2634_v25, %v2586_v35  ;;  %2734 = vmatmul.bf16.gmra.mxu2 %v3151_v32  ;;  %2832 = vmatmul.bf16.gmra.mxu0 %v3159_v38  ;;  %v3295_v35 = vor.u32 %v4188_v19, %v3294_v16 }
 0x202   :  { %2783 = vmatmul.bf16.gmra.mxu3 %v3155_v59 }
 0x203   :  { %2881 = vmatmul.bf16.gmra.mxu1 %v3163_v33  ;;  %v5750_v47 = vadd.f32 %v2683_v11, %v2635_v55  ;;  %v3307_v55 = vor.u32 %v4180_v29, %v3304_v30  ;;  %v4215_v29 = vld [vmem:[%s5970_s0 + $0x39c] sm:$0xf]  ;;  %v3446_v30 = vld [vmem:[%s5970_s0 + $0x3a0] sm:$0xf] }
 0x204   :  { %v2539_v41 = vpop.f32.mrf.mxu2 }
 0x205   :  { %v2588_v53 = vpop.f32.mrf.mxu3  ;;  %v2540_v42 = vadd.f32 %v2539_v41, %v5498_v21  ;;  %v3224_v21 = vld [vmem:[%s5970_s0 + $0x230] sm:$0xf0] }
 0x206   :  { %v2639_v54 = vpop.f32.mrf.mxu0  ;;  %v3227_v2 = vor.u32 %v4161_v50, %v3224_v21 }
 0x207   :  { %v2589_v43 = vadd.f32 %v2588_v53, %v2540_v42 }
 0x208   :  { %v2688_v51 = vpop.f32.mrf.mxu1 }
 0x209   :  { %v2638_v4 = vadd.f32 %v2637_v45, %v2589_v43 }
 0x20b   :  { %v5777_v58 = vadd.f32 %v2686_v40, %v2638_v4  ;;  %v3303_v40 = vor.u32 %v4189_v28, %v3302_v27  ;;  %v3438_v27 = vld [vmem:[%s5970_s0 + $0x398] sm:$0xf]  ;;  %v4224_v28 = vld [vmem:[%s5970_s0 + $0x3dc] sm:$0xf0] }
 0x20c   :  { %v2541_v60 = vpop.f32.mrf.mxu2 }
 0x20d   :  { %v2590_v6 = vpop.f32.mrf.mxu3  ;;  %v2542_v0 = vadd.f32 %v2541_v60, %v5510_v18  ;;  %v4207_v60 = vld [vmem:[%s5970_s0 + $0x354] sm:$0xf0] }
 0x20e   :  { %v2642_v5 = vpop.f32.mrf.mxu0 }
 0x20f   :  { %v2591_v23 = vadd.f32 %v2590_v6, %v2542_v0  ;;  %v4198_v6 = vld [vmem:[%s5970_s0 + $0x314] sm:$0xf]  ;;  %v3376_v0 = vld [vmem:[%s5970_s0 + $0x358] sm:$0xf0] }
 0x210   :  { %v2691_v8 = vpop.f32.mrf.mxu1 }
 0x211   :  { %v2640_v9 = vadd.f32 %v2639_v54, %v2591_v23  ;;  %2739 = vmatmul.bf16.gmra.mxu2 %v3223_v1  ;;  %2837 = vmatmul.bf16.gmra.mxu0 %v3231_v3  ;;  %v3367_v23 = vor.u32 %v4206_v56, %v3366_v52 }
 0x212   :  { %2788 = vmatmul.bf16.gmra.mxu3 %v3227_v2 }
 0x213   :  { %2886 = vmatmul.bf16.gmra.mxu1 %v3235_v14  ;;  %v5780_v25 = vadd.f32 %v2688_v51, %v2640_v9  ;;  %v3379_v9 = vor.u32 %v4198_v6, %v3376_v0  ;;  %v4233_v6 = vld [vmem:[%s5970_s0 + $0x42c] sm:$0xf]  ;;  %v3518_v0 = vld [vmem:[%s5970_s0 + $0x430] sm:$0xf] }
 0x214   :  { %v2544_v11 = vpop.f32.mrf.mxu2 }
 0x215   :  { %v2593_v31 = vpop.f32.mrf.mxu3  ;;  %v2545_v22 = vadd.f32 %v2544_v11, %v5540_v61  ;;  %v3296_v61 = vld [vmem:[%s5970_s0 + $0x2c0] sm:$0xf0] }
 0x216   :  { %v2644_v18 = vpop.f32.mrf.mxu0  ;;  %v3299_v45 = vor.u32 %v4179_v20, %v3296_v61 }
 0x217   :  { %v2594_v15 = vadd.f32 %v2593_v31, %v2545_v22 }
 0x218   :  { %v2693_v24 = vpop.f32.mrf.mxu1 }
 0x219   :  { %v2643_v44 = vadd.f32 %v2642_v5, %v2594_v15 }
 0x21b   :  { %v5807_v32 = vadd.f32 %v2691_v8, %v2643_v44  ;;  %v3375_v8 = vor.u32 %v4207_v60, %v3374_v57  ;;  %v3510_v57 = vld [vmem:[%s5970_s0 + $0x428] sm:$0xf]  ;;  %v4242_v60 = vld [vmem:[%s5970_s0 + $0x46c] sm:$0xf0] }
 0x21c   :  { %v2546_v59 = vpop.f32.mrf.mxu2 }
 0x21d   :  { %v2595_v38 = vpop.f32.mrf.mxu3  ;;  %v2547_v33 = vadd.f32 %v2546_v59, %v5552_v46  ;;  %v4225_v59 = vld [vmem:[%s5970_s0 + $0x3e4] sm:$0xf0] }
 0x21e   :  { %v2647_v53 = vpop.f32.mrf.mxu0 }
 0x21f   :  { %v2596_v41 = vadd.f32 %v2595_v38, %v2547_v33  ;;  %v4216_v38 = vld [vmem:[%s5970_s0 + $0x3a4] sm:$0xf]  ;;  %v3448_v33 = vld [vmem:[%s5970_s0 + $0x3e8] sm:$0xf0] }
 0x220   :  { %v2696_v42 = vpop.f32.mrf.mxu1 }
 0x221   :  { %v2645_v43 = vadd.f32 %v2644_v18, %v2596_v41  ;;  %2744 = vmatmul.bf16.gmra.mxu2 %v3295_v35  ;;  %2842 = vmatmul.bf16.gmra.mxu0 %v3303_v40  ;;  %v3439_v41 = vor.u32 %v4224_v28, %v3438_v27 }
 0x222   :  { %2793 = vmatmul.bf16.gmra.mxu3 %v3299_v45 }
 0x223   :  { %2891 = vmatmul.bf16.gmra.mxu1 %v3307_v55  ;;  %v5810_v54 = vadd.f32 %v2693_v24, %v2645_v43  ;;  %v3451_v43 = vor.u32 %v4216_v38, %v3448_v33 }
 0x224   :  { %v2549_v51 = vpop.f32.mrf.mxu2 }
 0x225   :  { %v2598_v4 = vpop.f32.mrf.mxu3  ;;  %v2550_v37 = vadd.f32 %v2549_v51, %v5582_v36  ;;  %v3368_v36 = vld [vmem:[%s5970_s0 + $0x350] sm:$0xf0] }
 0x226   :  { %v2649_v46 = vpop.f32.mrf.mxu0  ;;  %v3371_v5 = vor.u32 %v4197_v10, %v3368_v36 }
 0x227   :  { %v2599_v49 = vadd.f32 %v2598_v4, %v2550_v37 }
 0x228   :  { %v2698_v50 = vpop.f32.mrf.mxu1 }
 0x229   :  { %v2648_v21 = vadd.f32 %v2647_v53, %v2599_v49 }
 0x22b   :  { %v5837_v1 = vadd.f32 %v2696_v42, %v2648_v21  ;;  %v3447_v42 = vor.u32 %v4225_v59, %v3446_v30 }
 0x22c   :  { %v2551_v2 = vpop.f32.mrf.mxu2 }
 0x22d   :  { %v2600_v3 = vpop.f32.mrf.mxu3  ;;  %v2552_v14 = vadd.f32 %v2551_v2, %v5594_v13  ;;  %v4243_v2 = vld [vmem:[%s5970_s0 + $0x474] sm:$0xf0] }
 0x22e   :  { %v2652_v31 = vpop.f32.mrf.mxu0 }
 0x22f   :  { %v2601_v11 = vadd.f32 %v2600_v3, %v2552_v14  ;;  %v4234_v3 = vld [vmem:[%s5970_s0 + $0x434] sm:$0xf]  ;;  %v3520_v14 = vld [vmem:[%s5970_s0 + $0x478] sm:$0xf0] }
 0x230   :  { %v2701_v22 = vpop.f32.mrf.mxu1 }
 0x231   :  { %v2650_v15 = vadd.f32 %v2649_v46, %v2601_v11  ;;  %2749 = vmatmul.bf16.gmra.mxu2 %v3367_v23  ;;  %2847 = vmatmul.bf16.gmra.mxu0 %v3375_v8  ;;  %v3511_v11 = vor.u32 %v4242_v60, %v3510_v57 }
 0x232   :  { %2798 = vmatmul.bf16.gmra.mxu3 %v3371_v5 }
 0x233   :  { %2896 = vmatmul.bf16.gmra.mxu1 %v3379_v9  ;;  %v5840_v18 = vadd.f32 %v2698_v50, %v2650_v15  ;;  %v3523_v15 = vor.u32 %v4234_v3, %v3520_v14 }
 0x234   :  { %v2554_v24 = vpop.f32.mrf.mxu2 }
 0x235   :  { %v2603_v44 = vpop.f32.mrf.mxu3  ;;  %v2555_v16 = vadd.f32 %v2554_v24, %v5624_v12  ;;  %v3440_v12 = vld [vmem:[%s5970_s0 + $0x3e0] sm:$0xf0] }
 0x236   :  { %v2654_v13 = vpop.f32.mrf.mxu0  ;;  %v3443_v53 = vor.u32 %v4215_v29, %v3440_v12 }
 0x237   :  { %v2604_v19 = vadd.f32 %v2603_v44, %v2555_v16 }
 0x238   :  { %v2703_v20 = vpop.f32.mrf.mxu1 }
 0x239   :  { %v2653_v61 = vadd.f32 %v2652_v31, %v2604_v19 }
 0x23b   :  { %v5867_v35 = vadd.f32 %v2701_v22, %v2653_v61  ;;  %v3519_v22 = vor.u32 %v4243_v2, %v3518_v0 }
 0x23c   :  { %v2556_v45 = vpop.f32.mrf.mxu2 }
 0x23d   :  { %v2605_v40 = vpop.f32.mrf.mxu3  ;;  %v2557_v55 = vadd.f32 %v2556_v45, %v5630_v39 }
 0x23e   :  { %v2657_v4 = vpop.f32.mrf.mxu0 }
 0x23f   :  { %v2606_v51 = vadd.f32 %v2605_v40, %v2557_v55 }
 0x240   :  { %v2706_v37 = vpop.f32.mrf.mxu1 }
 0x241   :  { %v2655_v49 = vadd.f32 %v2654_v13, %v2606_v51  ;;  %2754 = vmatmul.bf16.gmra.mxu2 %v3439_v41  ;;  %2852 = vmatmul.bf16.gmra.mxu0 %v3447_v42 }
 0x242   :  { %2803 = vmatmul.bf16.gmra.mxu3 %v3443_v53 }
 0x243   :  { %2901 = vmatmul.bf16.gmra.mxu1 %v3451_v43  ;;  %v5870_v46 = vadd.f32 %v2703_v20, %v2655_v49 }
 0x244   :  { %v2559_v50 = vpop.f32.mrf.mxu2 }
 0x245   :  { %v2608_v21 = vpop.f32.mrf.mxu3  ;;  %v2560_v52 = vadd.f32 %v2559_v50, %v5657_v48  ;;  %v3512_v48 = vld [vmem:[%s5970_s0 + $0x470] sm:$0xf0] }
 0x246   :  { %v2659_v39 = vpop.f32.mrf.mxu0  ;;  %v3515_v31 = vor.u32 %v4233_v6, %v3512_v48 }
 0x247   :  { %v2609_v56 = vadd.f32 %v2608_v21, %v2560_v52 }
 0x248   :  { %v2708_v10 = vpop.f32.mrf.mxu1 }
 0x249   :  { %v2658_v36 = vadd.f32 %v2657_v4, %v2609_v56 }
 0x24b   :  { %v5897_v23 = vadd.f32 %v2706_v37, %v2658_v36 }
 0x24c   :  { %v2561_v5 = vpop.f32.mrf.mxu2 }
 0x24d   :  { %v2610_v8 = vpop.f32.mrf.mxu3  ;;  %v2562_v9 = vadd.f32 %v2561_v5, %v5660_v26 }
 0x24e   :  { %v2662_v44 = vpop.f32.mrf.mxu0 }
 0x24f   :  { %v2611_v24 = vadd.f32 %v2610_v8, %v2562_v9 }
 0x250   :  { %v2711_v16 = vpop.f32.mrf.mxu1 }
 0x251   :  { %v2660_v19 = vadd.f32 %v2659_v39, %v2611_v24  ;;  %2759 = vmatmul.bf16.gmra.mxu2 %v3511_v11  ;;  %2857 = vmatmul.bf16.gmra.mxu0 %v3519_v22 }
 0x252   :  { %2808 = vmatmul.bf16.gmra.mxu3 %v3515_v31 }
 0x253   :  { %2906 = vmatmul.bf16.gmra.mxu1 %v3523_v15  ;;  %v5900_v13 = vadd.f32 %v2708_v10, %v2660_v19 }
 0x254   :  { %v2564_v20 = vpop.f32.mrf.mxu2 }
 0x255   :  { %v2613_v61 = vpop.f32.mrf.mxu3  ;;  %v2565_v27 = vadd.f32 %v2564_v20, %v5687_v17 }
 0x256   :  { %v2664_v26 = vpop.f32.mrf.mxu0 }
 0x257   :  { %v2614_v28 = vadd.f32 %v2613_v61, %v2565_v27 }
 0x258   :  { %v2713_v29 = vpop.f32.mrf.mxu1 }
 0x259   :  { %v2663_v12 = vadd.f32 %v2662_v44, %v2614_v28 }
 0x25b   :  { %v5903_v30 = vadd.f32 %v2711_v16, %v2663_v12 }
 0x25c   :  { %v2566_v59 = vpop.f32.mrf.mxu2 }
 0x25d   :  { %v2615_v38 = vpop.f32.mrf.mxu3  ;;  %v2567_v33 = vadd.f32 %v2566_v59, %v5690_v34 }
 0x25e   :  { %v2823_v40 = vpop.f32.mrf.mxu0 }
 0x25f   :  { %v2616_v45 = vadd.f32 %v2615_v38, %v2567_v33 }
 0x260   :  { %v2872_v55 = vpop.f32.mrf.mxu1 }
 0x261   :  { %v2665_v41 = vadd.f32 %v2664_v26, %v2616_v45 }
 0x263   :  { %v5906_v53 = vadd.f32 %v2713_v29, %v2665_v41 }
 0x264   :  { %v2725_v42 = vpop.f32.mrf.mxu2 }
 0x265   :  { %v2774_v43 = vpop.f32.mrf.mxu3  ;;  %v2726_v17 = vadd.f32 %v2725_v42, %v5717_v63 }
 0x266   :  { %v2825_v4 = vpop.f32.mrf.mxu0 }
 0x267   :  { %v2775_v51 = vadd.f32 %v2774_v43, %v2726_v17 }
 0x268   :  { %v2874_v37 = vpop.f32.mrf.mxu1 }
 0x269   :  { %v2824_v49 = vadd.f32 %v2823_v40, %v2775_v51 }
 0x26b   :  { %v5909_v50 = vadd.f32 %v2872_v55, %v2824_v49 }
 0x26c   :  { %v2727_v21 = vpop.f32.mrf.mxu2 }
 0x26d   :  { %v2776_v52 = vpop.f32.mrf.mxu3  ;;  %v2728_v34 = vadd.f32 %v2727_v21, %v5720_v7 }
 0x26e   :  { %v2828_v39 = vpop.f32.mrf.mxu0 }
 0x26f   :  { %v2777_v56 = vadd.f32 %v2776_v52, %v2728_v34 }
 0x270   :  { %v2877_v10 = vpop.f32.mrf.mxu1 }
 0x271   :  { %v2826_v36 = vadd.f32 %v2825_v4, %v2777_v56 }
 0x273   :  { %v5912_v57 = vadd.f32 %v2874_v37, %v2826_v36 }
 0x274   :  { %v2730_v60 = vpop.f32.mrf.mxu2 }
 0x275   :  { %v2779_v6 = vpop.f32.mrf.mxu3  ;;  %v2731_v63 = vadd.f32 %v2730_v60, %v5747_v62 }
 0x276   :  { %v2830_v0 = vpop.f32.mrf.mxu0 }
 0x277   :  { %v2780_v48 = vadd.f32 %v2779_v6, %v2731_v63 }
 0x278   :  { %v2879_v2 = vpop.f32.mrf.mxu1 }
 0x279   :  { %v2829_v3 = vadd.f32 %v2828_v39, %v2780_v48 }
 0x27b   :  { %v5915_v14 = vadd.f32 %v2877_v10, %v2829_v3 }
 0x27c   :  { %v2732_v5 = vpop.f32.mrf.mxu2 }
 0x27d   :  { %v2781_v8 = vpop.f32.mrf.mxu3  ;;  %v2733_v7 = vadd.f32 %v2732_v5, %v5750_v47 }
 0x27e   :  { %v2833_v11 = vpop.f32.mrf.mxu0 }
 0x27f   :  { %v2782_v9 = vadd.f32 %v2781_v8, %v2733_v7 }
 0x280   :  { %v2882_v31 = vpop.f32.mrf.mxu1 }
 0x281   :  { %v2831_v22 = vadd.f32 %v2830_v0, %v2782_v9 }
 0x283   :  { %v5918_v15 = vadd.f32 %v2879_v2, %v2831_v22 }
 0x284   :  { %v2735_v24 = vpop.f32.mrf.mxu2 }
 0x285   :  { %v2784_v44 = vpop.f32.mrf.mxu3  ;;  %v2736_v62 = vadd.f32 %v2735_v24, %v5777_v58 }
 0x286   :  { %v2835_v19 = vpop.f32.mrf.mxu0 }
 0x287   :  { %v2785_v16 = vadd.f32 %v2784_v44, %v2736_v62 }
 0x288   :  { %v2884_v20 = vpop.f32.mrf.mxu1 }
 0x289   :  { %v2834_v61 = vadd.f32 %v2833_v11, %v2785_v16 }
 0x28b   :  { %v5921_v27 = vadd.f32 %v2882_v31, %v2834_v61 }
 0x28c   :  { %v2737_v28 = vpop.f32.mrf.mxu2 }
 0x28d   :  { %v2786_v26 = vpop.f32.mrf.mxu3  ;;  %v2912_v47 = vmax.f32 %v5909_v50, %v5921_v27  ;;  %v2738_v29 = vadd.f32 %v2737_v28, %v5780_v25 }
 0x28e   :  { %v2838_v59 = vpop.f32.mrf.mxu0 }
 0x28f   :  { %v2787_v12 = vadd.f32 %v2786_v26, %v2738_v29 }
 0x290   :  { %v2887_v38 = vpop.f32.mrf.mxu1 }
 0x291   :  { %v2836_v33 = vadd.f32 %v2835_v19, %v2787_v12 }
 0x293   :  { %v5926_v45 = vadd.f32 %v2884_v20, %v2836_v33 }
 0x294   :  { %v2740_v58 = vpop.f32.mrf.mxu2 }
 0x295   :  { %v2789_v40 = vpop.f32.mrf.mxu3  ;;  %v2913_v55 = vmax.f32 %v5912_v57, %v5926_v45  ;;  %v2741_v41 = vadd.f32 %v2740_v58, %v5807_v32 }
 0x296   :  { %v2840_v43 = vpop.f32.mrf.mxu0 }
 0x297   :  { %v2790_v42 = vadd.f32 %v2789_v40, %v2741_v41 }
 0x298   :  { %v2889_v17 = vpop.f32.mrf.mxu1 }
 0x299   :  { %v2839_v51 = vadd.f32 %v2838_v59, %v2790_v42 }
 0x29b   :  { %v5931_v4 = vadd.f32 %v2887_v38, %v2839_v51  ;;  %v4415_v51 = vld [vmem:[%s5971_s2] ss:$0 sm:$0xff] }
 0x29c   :  { %v2742_v25 = vpop.f32.mrf.mxu2 }
 0x29d   :  { %v2791_v37 = vpop.f32.mrf.mxu3  ;;  %v2914_v49 = vmax.f32 %v5915_v14, %v5931_v4  ;;  %v2743_v50 = vadd.f32 %v2742_v25, %v5810_v54 }
 0x29e   :  { %v2843_v52 = vpop.f32.mrf.mxu0 }
 0x29f   :  { %v2792_v21 = vadd.f32 %v2791_v37, %v2743_v50 }
 0x2a0   :  { %v2892_v34 = vpop.f32.mrf.mxu1 }
 0x2a1   :  { %v2841_v56 = vadd.f32 %v2840_v43, %v2792_v21 }
 0x2a3   :  { %v5936_v39 = vadd.f32 %v2889_v17, %v2841_v56 }
 0x2a4   :  { %v2745_v32 = vpop.f32.mrf.mxu2 }
 0x2a5   :  { %v2794_v10 = vpop.f32.mrf.mxu3  ;;  %v2915_v36 = vmax.f32 %v5918_v15, %v5936_v39  ;;  %v2746_v11 = vadd.f32 %v2745_v32, %v5837_v1 }
 0x2a6   :  { %v2845_v60 = vpop.f32.mrf.mxu0 }
 0x2a7   :  { %v2795_v22 = vadd.f32 %v2794_v10, %v2746_v11 }
 0x2a8   :  { %v2894_v6 = vpop.f32.mrf.mxu1 }
 0x2a9   :  { %v2844_v19 = vadd.f32 %v2843_v52, %v2795_v22 }
 0x2ab   :  { %v2893_v28 = vadd.f32 %v2892_v34, %v2844_v19 }
 0x2ac   :  { %v2747_v63 = vpop.f32.mrf.mxu2 }
 0x2ad   :  { %v2796_v48 = vpop.f32.mrf.mxu3  ;;  %v2748_v20 = vadd.f32 %v2747_v63, %v5840_v18 }
 0x2ae   :  { %v2848_v0 = vpop.f32.mrf.mxu0 }
 0x2af   :  { %v2797_v26 = vadd.f32 %v2796_v48, %v2748_v20 }
 0x2b0   :  { %v2897_v2 = vpop.f32.mrf.mxu1 }
 0x2b1   :  { %v2846_v41 = vadd.f32 %v2845_v60, %v2797_v26 }
 0x2b3   :  { %v2895_v18 = vadd.f32 %v2894_v6, %v2846_v41 }
 0x2b4   :  { %v2750_v3 = vpop.f32.mrf.mxu2 }
 0x2b5   :  { %v2799_v5 = vpop.f32.mrf.mxu3  ;;  %v2751_v58 = vadd.f32 %v2750_v3, %v5867_v35 }
 0x2b6   :  { %v2850_v54 = vpop.f32.mrf.mxu0 }
 0x2b7   :  { %v2800_v17 = vadd.f32 %v2799_v5, %v2751_v58 }
 0x2b8   :  { %v5940_v8 = vpop.f32.mrf.mxu1 }
 0x2bc   :  { %v2752_v7 = vpop.f32.mrf.mxu2 }
 0x2bd   :  { %v2801_v9 = vpop.f32.mrf.mxu3  ;;  %v2753_v35 = vadd.f32 %v2752_v7, %v5870_v46 }
 0x2be   :  { %v2853_v31 = vpop.f32.mrf.mxu0 }
 0x2bf   :  { %v2802_v48 = vadd.f32 %v2801_v9, %v2753_v35 }
 0x2c0   :  { %v2902_v24 = vpop.f32.mrf.mxu1 }
 0x2c1   :  { %v2851_v7 = vadd.f32 %v2850_v54, %v2802_v48 }
 0x2c4   :  { %v2755_v44 = vpop.f32.mrf.mxu2 }
 0x2c5   :  { %v2804_v62 = vpop.f32.mrf.mxu3  ;;  %v2756_v16 = vadd.f32 %v2755_v44, %v5897_v23 }
 0x2c6   :  { %v2855_v12 = vpop.f32.mrf.mxu0 }
 0x2c7   :  { %v2805_v61 = vadd.f32 %v2804_v62, %v2756_v16 }
 0x2c8   :  { %v2904_v40 = vpop.f32.mrf.mxu1 }
 0x2c9   :  { %v2854_v27 = vadd.f32 %v2853_v31, %v2805_v61 }
 0x2cb   :  { %v2903_v29 = vadd.f32 %v2902_v24, %v2854_v27  ;;  %v2900_v24 = vadd.f32 %v5940_v8, %v2851_v7 }
 0x2cc   :  { %v2757_v59 = vpop.f32.mrf.mxu2 }
 0x2cd   :  { %v2806_v38 = vpop.f32.mrf.mxu3  ;;  %v2916_v33 = vmax.f32 %v2893_v28, %v2903_v29  ;;  %v2758_v1 = vadd.f32 %v2757_v59, %v5900_v13  ;;  %v2849_v13 = vadd.f32 %v2848_v0, %v2800_v17 }
 0x2ce   :  { %v2858_v34 = vpop.f32.mrf.mxu0 }
 0x2cf   :  { %v2920_v42 = vmax.f32 %v2912_v47, %v2916_v33  ;;  %v2807_v23 = vadd.f32 %v2806_v38, %v2758_v1  ;;  %v2898_v63 = vadd.f32 %v2897_v2, %v2849_v13 }
 0x2d0   :  { %v2907_v10 = vpop.f32.mrf.mxu1 }
 0x2d1   :  { %v2856_v43 = vadd.f32 %v2855_v12, %v2807_v23  ;;  %v2928_v56 = vadd.f32 %v4415_v51, %v2920_v42 }
 0x2d3   :  { %v2905_v25 = vadd.f32 %v2904_v40, %v2856_v43  ;;  %v2932_v3 = vmax.f32 %v2928_v56, 0.0 }
 0x2d4   :  { %v2760_v37 = vpop.f32.mrf.mxu2 }
 0x2d5   :  { %v2809_v50 = vpop.f32.mrf.mxu3  ;;  %v2917_v21 = vmax.f32 %v2895_v18, %v2905_v25  ;;  %v2761_v52 = vadd.f32 %v2760_v37, %v5903_v30 }
 0x2d7   :  { %v2921_v47 = vmax.f32 %v2913_v55, %v2917_v21  ;;  %v2810_v32 = vadd.f32 %v2809_v50, %v2761_v52  ;;  %v2860_v55 = vpop.f32.mrf.mxu0 }
 0x2d8   :  { %v2909_v9 = vpop.f32.mrf.mxu1 }
 0x2d9   :  { %v2929_v60 = vadd.f32 %v4415_v51, %v2921_v47  ;;  %v2859_v6 = vadd.f32 %v2858_v34, %v2810_v32 }
 0x2db   :  { %v2933_v5 = vmax.f32 %v2929_v60, 0.0  ;;  %v2908_v11 = vadd.f32 %v2907_v10, %v2859_v6 }
 0x2dc   :  { %v2762_v31 = vpop.f32.mrf.mxu2 }
 0x2dd   :  { %v4391_v30 = vpack.c.bf16 %v2933_v5, %v2932_v3  ;;  %v2918_v0 = vmax.f32 %v2898_v63, %v2908_v11  ;;  %v2763_v22 = vadd.f32 %v2762_v31, %v5906_v53  ;;  %v2811_v46 = vpop.f32.mrf.mxu3 }
 0x2df   :  { %4392 = vst [vmem:[%s5972_s3] sm:$0xff] %v4391_v30   ;;  %v2922_v57 = vmax.f32 %v2914_v49, %v2918_v0  ;;  %v2812_v45 = vadd.f32 %v2811_v46, %v2763_v22 }
 0x2e1   :  { %v2861_v2 = vadd.f32 %v2860_v55, %v2812_v45  ;;  %v2930_v16 = vadd.f32 %v4415_v51, %v2922_v57 }
 0x2e3   :  { %v2910_v44 = vadd.f32 %v2909_v9, %v2861_v2  ;;  %v2934_v19 = vmax.f32 %v2930_v16, 0.0 }
 0x2e5   :  { %v2919_v62 = vmax.f32 %v2900_v24, %v2910_v44 }
 0x2e7   :  { %v2923_v53 = vmax.f32 %v2915_v36, %v2919_v62 }
 0x2e9   :  { %v2931_v54 = vadd.f32 %v4415_v51, %v2923_v53 }
 0x2eb   :  { %v2935_v20 = vmax.f32 %v2931_v54, 0.0 }
 0x2ed   :  { %v4396_v61 = vpack.c.bf16 %v2935_v20, %v2934_v19 }
 0x2ef   :  { %4398 = vst [vmem:[%s5972_s3 + $0x8] sm:$0xff] %v4396_v61  }

// kernel: autoencoder_forward.10
= control target key start
LH: loop header
LB: loop body
LE: loop exit
PB: predicated region body
PF: predicated region fallthrough
CT: control target
= control target key end

     0   :  { %s1697_s1 = inlined_call_operand.vmem [shape: bf16[1152,128], index: 1, kind: input, shape index: {}]   ;;  %s1698_s0 = inlined_call_operand.vmem [shape: bf16[32,1152], index: 0, kind: input, shape index: {}]   ;;  %s1699_s2 = inlined_call_operand.vmem [shape: f32[1,128], index: 2, kind: input, shape index: {}]   ;;  %s1700_s3 = inlined_call_operand.vmem [shape: bf16[8,128], index: 3, kind: output, shape index: {}]  }
   0x1   :  { %v1273_v0 = vld [vmem:[%s1697_s1 + $0x38] sm:$0xff]  ;;  %v1272_v4 = vld [vmem:[%s1697_s1 + $0x30] sm:$0xff]  ;;  %v1271_v8 = vld [vmem:[%s1697_s1 + $0x28] sm:$0xff] }
   0x2   :  { %v1281_v1 = vld [vmem:[%s1697_s1 + $0x78] sm:$0xff]  ;;  %702 = vmatpush.bf16.msra.mxu0 %v1273_v0  ;;  %v1280_v5 = vld [vmem:[%s1697_s1 + $0x70] sm:$0xff]  ;;  %v1279_v9 = vld [vmem:[%s1697_s1 + $0x68] sm:$0xff] }
   0x3   :  { %v1289_v2 = vld [vmem:[%s1697_s1 + $0xb8] sm:$0xff]  ;;  %721 = vmatpush.bf16.msra.mxu1 %v1281_v1  ;;  %v1288_v6 = vld [vmem:[%s1697_s1 + $0xb0] sm:$0xff]  ;;  %v1287_v10 = vld [vmem:[%s1697_s1 + $0xa8] sm:$0xff] }
   0x4   :  { %v1297_v3 = vld [vmem:[%s1697_s1 + $0xf8] sm:$0xff]  ;;  %740 = vmatpush.bf16.msra.mxu2 %v1289_v2  ;;  %v1296_v7 = vld [vmem:[%s1697_s1 + $0xf0] sm:$0xff]  ;;  %v1295_v11 = vld [vmem:[%s1697_s1 + $0xe8] sm:$0xff] }
   0x5   :  { %759 = vmatpush.bf16.msra.mxu3 %v1297_v3  ;;  %v1270_v12 = vld [vmem:[%s1697_s1 + $0x20] sm:$0xff]  ;;  %v1269_v16 = vld [vmem:[%s1697_s1 + $0x18] sm:$0xff]  ;;  %v1268_v20 = vld [vmem:[%s1697_s1 + $0x10] sm:$0xff] }
   0x6   :  { %703 = vmatpush.bf16.msra.mxu0 %v1272_v4  ;;  %v1278_v13 = vld [vmem:[%s1697_s1 + $0x60] sm:$0xff]  ;;  %v1277_v17 = vld [vmem:[%s1697_s1 + $0x58] sm:$0xff]  ;;  %v1276_v21 = vld [vmem:[%s1697_s1 + $0x50] sm:$0xff] }
   0x7   :  { %722 = vmatpush.bf16.msra.mxu1 %v1280_v5  ;;  %v1286_v14 = vld [vmem:[%s1697_s1 + $0xa0] sm:$0xff]  ;;  %v1285_v18 = vld [vmem:[%s1697_s1 + $0x98] sm:$0xff]  ;;  %v1284_v22 = vld [vmem:[%s1697_s1 + $0x90] sm:$0xff] }
   0x8   :  { %741 = vmatpush.bf16.msra.mxu2 %v1288_v6  ;;  %v1294_v15 = vld [vmem:[%s1697_s1 + $0xe0] sm:$0xff]  ;;  %v1293_v19 = vld [vmem:[%s1697_s1 + $0xd8] sm:$0xff]  ;;  %v1292_v23 = vld [vmem:[%s1697_s1 + $0xd0] sm:$0xff] }
   0x9   :  { %760 = vmatpush.bf16.msra.mxu3 %v1296_v7  ;;  %v1267_v24 = vld [vmem:[%s1697_s1 + $0x8] sm:$0xff]  ;;  %v1266_v28 = vld [vmem:[%s1697_s1] sm:$0xff]  ;;  %v900_v39 = vld [vmem:[%s1698_s0 + $0x2c] sm:$0xf0] }
   0xa   :  { %704 = vmatpush.bf16.msra.mxu0 %v1271_v8  ;;  %v1275_v25 = vld [vmem:[%s1697_s1 + $0x48] sm:$0xff]  ;;  %v1274_v29 = vld [vmem:[%s1697_s1 + $0x40] sm:$0xff]  ;;  %v1305_v40 = vld [vmem:[%s1697_s1 + $0x138] sm:$0xff] }
   0xb   :  { %723 = vmatpush.bf16.msra.mxu1 %v1279_v9  ;;  %v1283_v26 = vld [vmem:[%s1697_s1 + $0x88] sm:$0xff]  ;;  %v1282_v30 = vld [vmem:[%s1697_s1 + $0x80] sm:$0xff]  ;;  %v1313_v41 = vld [vmem:[%s1697_s1 + $0x178] sm:$0xff] }
   0xc   :  { %742 = vmatpush.bf16.msra.mxu2 %v1287_v10  ;;  %v1291_v27 = vld [vmem:[%s1697_s1 + $0xc8] sm:$0xff]  ;;  %v1290_v31 = vld [vmem:[%s1697_s1 + $0xc0] sm:$0xff]  ;;  %v1321_v46 = vld [vmem:[%s1697_s1 + $0x1b8] sm:$0xff] }
   0xd   :  { %761 = vmatpush.bf16.msra.mxu3 %v1295_v11  ;;  %v890_v32 = vld [vmem:[%s1698_s0] sm:$0xf]  ;;  %v1252_v33 = vld [vmem:[%s1698_s0 + $0x20] sm:$0xf0]  ;;  %v892_v35 = vld [vmem:[%s1698_s0 + $0x24] sm:$0xf0] }
   0xe   :  { %705 = vmatpush.bf16.msra.mxu0 %v1270_v12  ;;  %v1248_v34 = vld [vmem:[%s1698_s0 + $0x4] sm:$0xf]  ;;  %v898_v36 = vld [vmem:[%s1698_s0 + $0x8] sm:$0xf]  ;;  %v1253_v37 = vld [vmem:[%s1698_s0 + $0x28] sm:$0xf0]  ;;  %v891_v42 = vor.u32 %v1252_v33, %v890_v32 }
   0xf   :  { %724 = vmatpush.bf16.msra.mxu1 %v1278_v13  ;;  %v1249_v38 = vld [vmem:[%s1698_s0 + $0xc] sm:$0xf]  ;;  %v895_v43 = vor.u32 %v1248_v34, %v892_v35  ;;  %v899_v44 = vor.u32 %v1253_v37, %v898_v36  ;;  %v1329_v47 = vld [vmem:[%s1697_s1 + $0x1f8] sm:$0xff]  ;;  %v1304_v48 = vld [vmem:[%s1697_s1 + $0x130] sm:$0xff] }
  0x10   :  { %743 = vmatpush.bf16.msra.mxu2 %v1286_v14  ;;  %v903_v45 = vor.u32 %v1249_v38, %v900_v39  ;;  %v1312_v49 = vld [vmem:[%s1697_s1 + $0x170] sm:$0xff]  ;;  %v1303_v52 = vld [vmem:[%s1697_s1 + $0x128] sm:$0xff]  ;;  %v1302_v56 = vld [vmem:[%s1697_s1 + $0x120] sm:$0xff] }
  0x11   :  { %762 = vmatpush.bf16.msra.mxu3 %v1294_v15  ;;  %v1320_v50 = vld [vmem:[%s1697_s1 + $0x1b0] sm:$0xff]  ;;  %v1311_v53 = vld [vmem:[%s1697_s1 + $0x168] sm:$0xff]  ;;  %v1310_v57 = vld [vmem:[%s1697_s1 + $0x160] sm:$0xff] }
  0x12   :  { %706 = vmatpush.bf16.msra.mxu0 %v1269_v16  ;;  %v1328_v51 = vld [vmem:[%s1697_s1 + $0x1f0] sm:$0xff]  ;;  %v1319_v54 = vld [vmem:[%s1697_s1 + $0x1a8] sm:$0xff]  ;;  %v1318_v58 = vld [vmem:[%s1697_s1 + $0x1a0] sm:$0xff] }
  0x13   :  { %725 = vmatpush.bf16.msra.mxu1 %v1277_v17  ;;  %v1327_v55 = vld [vmem:[%s1697_s1 + $0x1e8] sm:$0xff]  ;;  %v1326_v59 = vld [vmem:[%s1697_s1 + $0x1e0] sm:$0xff]  ;;  %v928_v63 = vld [vmem:[%s1698_s0 + $0x6c] sm:$0xf0] }
  0x14   :  { %744 = vmatpush.bf16.msra.mxu2 %v1285_v18  ;;  %v926_v60 = vld [vmem:[%s1698_s0 + $0x48] sm:$0xf]  ;;  %v1261_v61 = vld [vmem:[%s1698_s0 + $0x68] sm:$0xf0]  ;;  %v934_v0 = vld [vmem:[%s1698_s0 + $0x50] sm:$0xf] }
  0x15   :  { %763 = vmatpush.bf16.msra.mxu3 %v1293_v19  ;;  %v1257_v62 = vld [vmem:[%s1698_s0 + $0x4c] sm:$0xf]  ;;  %v1262_v1 = vld [vmem:[%s1698_s0 + $0x70] sm:$0xf0]  ;;  %v936_v3 = vld [vmem:[%s1698_s0 + $0x74] sm:$0xf0]  ;;  %v927_v6 = vor.u32 %v1261_v61, %v926_v60 }
  0x16   :  { %707 = vmatpush.bf16.msra.mxu0 %v1268_v20  ;;  %v1258_v2 = vld [vmem:[%s1698_s0 + $0x54] sm:$0xf]  ;;  %v1301_v4 = vld [vmem:[%s1697_s1 + $0x118] sm:$0xff]  ;;  %v931_v7 = vor.u32 %v1257_v62, %v928_v63  ;;  %v935_v8 = vor.u32 %v1262_v1, %v934_v0  ;;  %v1299_v16 = vld [vmem:[%s1697_s1 + $0x108] sm:$0xff] }
  0x17   :  { %726 = vmatpush.bf16.msra.mxu1 %v1276_v21  ;;  %v1309_v5 = vld [vmem:[%s1697_s1 + $0x158] sm:$0xff]  ;;  %v939_v9 = vor.u32 %v1258_v2, %v936_v3  ;;  %v1300_v12 = vld [vmem:[%s1697_s1 + $0x110] sm:$0xff]  ;;  %v1307_v17 = vld [vmem:[%s1697_s1 + $0x148] sm:$0xff] }
  0x18   :  { %745 = vmatpush.bf16.msra.mxu2 %v1284_v22  ;;  %v1317_v10 = vld [vmem:[%s1697_s1 + $0x198] sm:$0xff]  ;;  %v1308_v13 = vld [vmem:[%s1697_s1 + $0x150] sm:$0xff]  ;;  %v1315_v18 = vld [vmem:[%s1697_s1 + $0x188] sm:$0xff] }
  0x19   :  { %764 = vmatpush.bf16.msra.mxu3 %v1292_v23  ;;  %v1325_v11 = vld [vmem:[%s1697_s1 + $0x1d8] sm:$0xff]  ;;  %v1316_v14 = vld [vmem:[%s1697_s1 + $0x190] sm:$0xff]  ;;  %v1323_v19 = vld [vmem:[%s1697_s1 + $0x1c8] sm:$0xff] }
  0x1a   :  { %708 = vmatpush.bf16.msra.mxu0 %v1267_v24  ;;  %v1324_v15 = vld [vmem:[%s1697_s1 + $0x1d0] sm:$0xff]  ;;  %v1298_v20 = vld [vmem:[%s1697_s1 + $0x100] sm:$0xff]  ;;  %v1335_v38 = vld [vmem:[%s1697_s1 + $0x228] sm:$0xff] }
  0x1b   :  { %727 = vmatpush.bf16.msra.mxu1 %v1275_v25  ;;  %v1306_v21 = vld [vmem:[%s1697_s1 + $0x140] sm:$0xff]  ;;  %v906_v24 = vld [vmem:[%s1698_s0 + $0x10] sm:$0xf]  ;;  %v1254_v25 = vld [vmem:[%s1698_s0 + $0x30] sm:$0xf0] }
  0x1c   :  { %746 = vmatpush.bf16.msra.mxu2 %v1283_v26  ;;  %v1314_v22 = vld [vmem:[%s1697_s1 + $0x180] sm:$0xff]  ;;  %v1337_v26 = vld [vmem:[%s1697_s1 + $0x238] sm:$0xff]  ;;  %v907_v33 = vor.u32 %v1254_v25, %v906_v24  ;;  %v1336_v37 = vld [vmem:[%s1697_s1 + $0x230] sm:$0xff] }
  0x1d   :  { %765 = vmatpush.bf16.msra.mxu3 %v1291_v27  ;;  %v1322_v23 = vld [vmem:[%s1697_s1 + $0x1c0] sm:$0xff]  ;;  %v1250_v27 = vld [vmem:[%s1698_s0 + $0x14] sm:$0xf] }
  0x1e   :  { %709 = vmatpush.bf16.msra.mxu0 %v1266_v28  ;;  %v908_v28 = vld [vmem:[%s1698_s0 + $0x34] sm:$0xf0]  ;;  %v916_v32 = vld [vmem:[%s1698_s0 + $0x3c] sm:$0xf0] }
  0x1f   :  { %728 = vmatpush.bf16.msra.mxu1 %v1274_v29  ;;  %v914_v29 = vld [vmem:[%s1698_s0 + $0x18] sm:$0xf]  ;;  %v911_v34 = vor.u32 %v1250_v27, %v908_v28  ;;  %v1334_v39 = vld [vmem:[%s1697_s1 + $0x220] sm:$0xff] }
  0x20   :  { %747 = vmatpush.bf16.msra.mxu2 %v1282_v30  ;;  %v1255_v30 = vld [vmem:[%s1698_s0 + $0x38] sm:$0xf0] }
  0x21   :  { %766 = vmatpush.bf16.msra.mxu3 %v1290_v31  ;;  %710 = vmatmul.bf16.vlgmr.msra.gmra.mxu0 %v891_v42  ;;  %v1251_v31 = vld [vmem:[%s1698_s0 + $0x1c] sm:$0xf]  ;;  %v915_v35 = vor.u32 %v1255_v30, %v914_v29 }
  0x22   :  { %778 = vmatpush.bf16.msrb.mxu0 %v1305_v40  ;;  %729 = vmatmul.bf16.vlgmr.msra.gmra.mxu1 %v895_v43  ;;  %v919_v36 = vor.u32 %v1251_v31, %v916_v32  ;;  %v942_v40 = vld [vmem:[%s1698_s0 + $0x58] sm:$0xf]  ;;  %v1259_v42 = vld [vmem:[%s1698_s0 + $0x5c] sm:$0xf]  ;;  %v944_v43 = vld [vmem:[%s1698_s0 + $0x7c] sm:$0xf0] }
  0x23   :  { %797 = vmatpush.bf16.msrb.mxu1 %v1313_v41  ;;  %748 = vmatmul.bf16.vlgmr.msra.gmra.mxu2 %v899_v44  ;;  %v1263_v41 = vld [vmem:[%s1698_s0 + $0x78] sm:$0xf0]  ;;  %v950_v44 = vld [vmem:[%s1698_s0 + $0x60] sm:$0xf] }
  0x24   :  { %767 = vmatmul.bf16.vlgmr.msra.gmra.mxu3 %v903_v45  ;;  %816 = vmatpush.bf16.msrb.mxu2 %v1321_v46  ;;  %v1264_v45 = vld [vmem:[%s1698_s0 + $0x80] sm:$0xf0] }
  0x25   :  { %835 = vmatpush.bf16.msrb.mxu3 %v1329_v47  ;;  %v1260_v46 = vld [vmem:[%s1698_s0 + $0x64] sm:$0xf]  ;;  %v952_v47 = vld [vmem:[%s1698_s0 + $0x84] sm:$0xf0] }
  0x26   :  { %779 = vmatpush.bf16.msrb.mxu0 %v1304_v48  ;;  %v1333_v48 = vld [vmem:[%s1697_s1 + $0x218] sm:$0xff] }
  0x27   :  { %798 = vmatpush.bf16.msrb.mxu1 %v1312_v49  ;;  %v943_v49 = vor.u32 %v1263_v41, %v942_v40 }
  0x28   :  { %817 = vmatpush.bf16.msrb.mxu2 %v1320_v50  ;;  %v947_v50 = vor.u32 %v1259_v42, %v944_v43 }
  0x29   :  { %836 = vmatpush.bf16.msrb.mxu3 %v1328_v51  ;;  %v951_v51 = vor.u32 %v1264_v45, %v950_v44 }
  0x2a   :  { %780 = vmatpush.bf16.msrb.mxu0 %v1303_v52  ;;  %v955_v52 = vor.u32 %v1260_v46, %v952_v47 }
  0x2b   :  { %799 = vmatpush.bf16.msrb.mxu1 %v1311_v53  ;;  %v1332_v53 = vld [vmem:[%s1697_s1 + $0x210] sm:$0xff] }
  0x2c   :  { %818 = vmatpush.bf16.msrb.mxu2 %v1319_v54  ;;  %v1331_v54 = vld [vmem:[%s1697_s1 + $0x208] sm:$0xff] }
  0x2d   :  { %837 = vmatpush.bf16.msrb.mxu3 %v1327_v55  ;;  %v1330_v55 = vld [vmem:[%s1697_s1 + $0x200] sm:$0xff] }
  0x2e   :  { %781 = vmatpush.bf16.msrb.mxu0 %v1302_v56  ;;  %v922_v56 = vld [vmem:[%s1698_s0 + $0x20] sm:$0xf] }
  0x2f   :  { %800 = vmatpush.bf16.msrb.mxu1 %v1310_v57  ;;  %v1256_v57 = vld [vmem:[%s1698_s0 + $0x40] sm:$0xf0] }
  0x30   :  { %819 = vmatpush.bf16.msrb.mxu2 %v1318_v58  ;;  %v958_v58 = vld [vmem:[%s1698_s0 + $0x68] sm:$0xf]  ;;  %v923_v60 = vor.u32 %v1256_v57, %v922_v56 }
  0x31   :  { %838 = vmatpush.bf16.msrb.mxu3 %v1326_v59  ;;  %715 = vmatmul.bf16.gmra.mxu0 %v927_v6  ;;  %v1265_v59 = vld [vmem:[%s1698_s0 + $0x88] sm:$0xf0] }
  0x32   :  { %782 = vmatpush.bf16.msrb.mxu0 %v1301_v4  ;;  %734 = vmatmul.bf16.gmra.mxu1 %v931_v7  ;;  %v959_v61 = vor.u32 %v1265_v59, %v958_v58 }
  0x33   :  { %801 = vmatpush.bf16.msrb.mxu1 %v1309_v5  ;;  %753 = vmatmul.bf16.gmra.mxu2 %v935_v8 }
  0x34   :  { %772 = vmatmul.bf16.gmra.mxu3 %v939_v9  ;;  %820 = vmatpush.bf16.msrb.mxu2 %v1317_v10 }
  0x35   :  { %839 = vmatpush.bf16.msrb.mxu3 %v1325_v11 }
  0x36   :  { %783 = vmatpush.bf16.msrb.mxu0 %v1300_v12 }
  0x37   :  { %802 = vmatpush.bf16.msrb.mxu1 %v1308_v13 }
  0x38   :  { %821 = vmatpush.bf16.msrb.mxu2 %v1316_v14 }
  0x39   :  { %840 = vmatpush.bf16.msrb.mxu3 %v1324_v15 }
  0x3a   :  { %784 = vmatpush.bf16.msrb.mxu0 %v1299_v16 }
  0x3b   :  { %803 = vmatpush.bf16.msrb.mxu1 %v1307_v17 }
  0x3c   :  { %822 = vmatpush.bf16.msrb.mxu2 %v1315_v18 }
  0x3d   :  { %841 = vmatpush.bf16.msrb.mxu3 %v1323_v19 }
  0x3e   :  { %785 = vmatpush.bf16.msrb.mxu0 %v1298_v20 }
  0x3f   :  { %804 = vmatpush.bf16.msrb.mxu1 %v1306_v21 }
  0x40   :  { %823 = vmatpush.bf16.msrb.mxu2 %v1314_v22 }
  0x41   :  { %842 = vmatpush.bf16.msrb.mxu3 %v1322_v23  ;;  %786 = vmatmul.bf16.vlgmr.msrb.gmra.mxu0 %v907_v33 }
  0x42   :  { %854 = vmatpush.bf16.msra.mxu0 %v1337_v26  ;;  %805 = vmatmul.bf16.vlgmr.msrb.gmra.mxu1 %v911_v34 }
  0x43   :  { %1338 = vmatpush.bf16.msra.mxu1 %v1337_v26  ;;  %824 = vmatmul.bf16.vlgmr.msrb.gmra.mxu2 %v915_v35 }
  0x44   :  { %843 = vmatmul.bf16.vlgmr.msrb.gmra.mxu3 %v919_v36 }
  0x46   :  { %855 = vmatpush.bf16.msra.mxu0 %v1336_v37 }
  0x47   :  { %1339 = vmatpush.bf16.msra.mxu1 %v1336_v37 }
  0x4a   :  { %856 = vmatpush.bf16.msra.mxu0 %v1335_v38 }
  0x4b   :  { %1340 = vmatpush.bf16.msra.mxu1 %v1335_v38 }
  0x4e   :  { %857 = vmatpush.bf16.msra.mxu0 %v1334_v39 }
  0x4f   :  { %1341 = vmatpush.bf16.msra.mxu1 %v1334_v39 }
  0x51   :  { %791 = vmatmul.bf16.gmra.mxu0 %v943_v49 }
  0x52   :  { %858 = vmatpush.bf16.msra.mxu0 %v1333_v48  ;;  %810 = vmatmul.bf16.gmra.mxu1 %v947_v50 }
  0x53   :  { %1342 = vmatpush.bf16.msra.mxu1 %v1333_v48  ;;  %829 = vmatmul.bf16.gmra.mxu2 %v951_v51 }
  0x54   :  { %848 = vmatmul.bf16.gmra.mxu3 %v955_v52 }
  0x56   :  { %859 = vmatpush.bf16.msra.mxu0 %v1332_v53 }
  0x57   :  { %1343 = vmatpush.bf16.msra.mxu1 %v1332_v53 }
  0x5a   :  { %860 = vmatpush.bf16.msra.mxu0 %v1331_v54 }
  0x5b   :  { %1344 = vmatpush.bf16.msra.mxu1 %v1331_v54 }
  0x5e   :  { %861 = vmatpush.bf16.msra.mxu0 %v1330_v55 }
  0x5f   :  { %1345 = vmatpush.bf16.msra.mxu1 %v1330_v55 }
  0x61   :  { %862 = vmatmul.bf16.vlgmr.msra.gmra.mxu0 %v923_v60 }
  0x62   :  { %867 = vmatmul.bf16.vlgmr.msra.gmra.mxu1 %v959_v61 }
  0x9e   :  { %v711_v62 = vpop.f32.mrf.mxu0 }
  0x9f   :  { %v730_v63 = vpop.f32.mrf.mxu1 }
  0xa0   :  { %v731_v24 = vadd.f32 %v730_v63, %v711_v62 }
  0xa6   :  { %v749_v0 = vpop.f32.mrf.mxu2  ;;  %v713_v2 = vpop.f32.mrf.mxu0 }
  0xa7   :  { %v768_v1 = vpop.f32.mrf.mxu3  ;;  %v732_v3 = vpop.f32.mrf.mxu1  ;;  %v750_v28 = vadd.f32 %v749_v0, %v731_v24 }
  0xa8   :  { %v733_v25 = vadd.f32 %v732_v3, %v713_v2 }
  0xa9   :  { %v769_v35 = vadd.f32 %v768_v1, %v750_v28 }
  0xae   :  { %v751_v4 = vpop.f32.mrf.mxu2  ;;  %v716_v6 = vpop.f32.mrf.mxu0 }
  0xaf   :  { %v770_v5 = vpop.f32.mrf.mxu3  ;;  %v735_v7 = vpop.f32.mrf.mxu1  ;;  %v752_v29 = vadd.f32 %v751_v4, %v733_v25  ;;  %v1346_v4 = vld [vmem:[%s1699_s2] ss:$0 sm:$0xff] }
  0xb0   :  { %v736_v26 = vadd.f32 %v735_v7, %v716_v6 }
  0xb1   :  { %v771_v36 = vadd.f32 %v770_v5, %v752_v29 }
  0xb6   :  { %v754_v8 = vpop.f32.mrf.mxu2  ;;  %v718_v10 = vpop.f32.mrf.mxu0 }
  0xb7   :  { %v773_v9 = vpop.f32.mrf.mxu3  ;;  %v737_v11 = vpop.f32.mrf.mxu1  ;;  %v755_v30 = vadd.f32 %v754_v8, %v736_v26 }
  0xb8   :  { %v738_v27 = vadd.f32 %v737_v11, %v718_v10 }
  0xb9   :  { %v774_v37 = vadd.f32 %v773_v9, %v755_v30 }
  0xbe   :  { %v756_v12 = vpop.f32.mrf.mxu2  ;;  %v787_v14 = vpop.f32.mrf.mxu0 }
  0xbf   :  { %v775_v13 = vpop.f32.mrf.mxu3  ;;  %v806_v15 = vpop.f32.mrf.mxu1  ;;  %v757_v31 = vadd.f32 %v756_v12, %v738_v27  ;;  %v788_v40 = vadd.f32 %v787_v14, %v769_v35 }
  0xc1   :  { %v776_v38 = vadd.f32 %v775_v13, %v757_v31  ;;  %v807_v47 = vadd.f32 %v806_v15, %v788_v40 }
  0xc6   :  { %v825_v16 = vpop.f32.mrf.mxu2  ;;  %v789_v18 = vpop.f32.mrf.mxu0 }
  0xc7   :  { %v844_v17 = vpop.f32.mrf.mxu3  ;;  %v808_v19 = vpop.f32.mrf.mxu1  ;;  %v790_v41 = vadd.f32 %v789_v18, %v771_v36  ;;  %v826_v51 = vadd.f32 %v825_v16, %v807_v47 }
  0xc9   :  { %v809_v48 = vadd.f32 %v808_v19, %v790_v41  ;;  %v845_v56 = vadd.f32 %v844_v17, %v826_v51 }
  0xce   :  { %v827_v20 = vpop.f32.mrf.mxu2  ;;  %v792_v21 = vpop.f32.mrf.mxu0 }
  0xcf   :  { %v811_v22 = vpop.f32.mrf.mxu1  ;;  %v846_v23 = vpop.f32.mrf.mxu3  ;;  %v793_v42 = vadd.f32 %v792_v21, %v774_v37  ;;  %v828_v52 = vadd.f32 %v827_v20, %v809_v48 }
  0xd1   :  { %v812_v49 = vadd.f32 %v811_v22, %v793_v42  ;;  %v847_v57 = vadd.f32 %v846_v23, %v828_v52 }
  0xd6   :  { %v830_v32 = vpop.f32.mrf.mxu2  ;;  %v794_v33 = vpop.f32.mrf.mxu0 }
  0xd7   :  { %v813_v34 = vpop.f32.mrf.mxu1  ;;  %v849_v39 = vpop.f32.mrf.mxu3  ;;  %v795_v43 = vadd.f32 %v794_v33, %v776_v38  ;;  %v831_v53 = vadd.f32 %v830_v32, %v812_v49 }
  0xd9   :  { %v814_v50 = vadd.f32 %v813_v34, %v795_v43  ;;  %v850_v58 = vadd.f32 %v849_v39, %v831_v53 }
  0xde   :  { %v832_v44 = vpop.f32.mrf.mxu2  ;;  %v863_v45 = vpop.f32.mrf.mxu0 }
  0xdf   :  { %v868_v46 = vpop.f32.mrf.mxu1  ;;  %v833_v54 = vadd.f32 %v832_v44, %v814_v50  ;;  %v851_v55 = vpop.f32.mrf.mxu3  ;;  %v864_v62 = vadd.f32 %v863_v45, %v845_v56 }
  0xe0   :  { %v869_v63 = vadd.f32 %v868_v46, %v850_v58 }
  0xe1   :  { %v852_v59 = vadd.f32 %v851_v55, %v833_v54 }
  0xe6   :  { %v865_v60 = vpop.f32.mrf.mxu0 }
  0xe7   :  { %v870_v61 = vpop.f32.mrf.mxu1  ;;  %v866_v0 = vadd.f32 %v865_v60, %v847_v57 }
  0xe8   :  { %v871_v1 = vadd.f32 %v870_v61, %v852_v59 }
  0xe9   :  { %v873_v2 = vmax.f32 %v864_v62, %v866_v0 }
  0xea   :  { %v874_v3 = vmax.f32 %v869_v63, %v871_v1 }
  0xec   :  { %v875_v5 = vmax.f32 %v873_v2, %v874_v3 }
  0xee   :  { %v880_v6 = vadd.f32 %v1346_v4, %v875_v5 }
  0xf0   :  { %v881_v7 = vmax.f32 %v880_v6, 0.0 }
  0xf2   :  { %v882_v8 = vpack.c.bf16 %v881_v7, %v881_v7 }
  0xf4   :  { %883 = vst [vmem:[%s1700_s3] sm:$0xf] %v882_v8 }

// kernel: autoencoder_forward.11
= control target key start
LH: loop header
LB: loop body
LE: loop exit
PB: predicated region body
PF: predicated region fallthrough
CT: control target
= control target key end

     0   :  { %vm365_vm0 = vcmask 523264   ;;  %s913_s1 = inlined_call_operand.vmem [shape: bf16[576,128], index: 1, kind: input, shape index: {}]   ;;  %s914_s0 = inlined_call_operand.vmem [shape: bf16[32,576], index: 0, kind: input, shape index: {}]   ;;  %s915_s2 = inlined_call_operand.vmem [shape: f32[1,128], index: 2, kind: input, shape index: {}]   ;;  %s916_s3 = inlined_call_operand.vmem [shape: bf16[8,128], index: 3, kind: output, shape index: {}]  }
   0x1   :  { %v685_v0 = vld [vmem:[%s913_s1 + $0x38] sm:$0xff]  ;;  %v684_v4 = vld [vmem:[%s913_s1 + $0x30] sm:$0xff]  ;;  %v683_v8 = vld [vmem:[%s913_s1 + $0x28] sm:$0xff] }
   0x2   :  { %v693_v1 = vld [vmem:[%s913_s1 + $0x78] sm:$0xff]  ;;  %372 = vmatpush.bf16.msra.mxu0 %v685_v0  ;;  %v692_v5 = vld [vmem:[%s913_s1 + $0x70] sm:$0xff]  ;;  %v691_v9 = vld [vmem:[%s913_s1 + $0x68] sm:$0xff] }
   0x3   :  { %v701_v2 = vld [vmem:[%s913_s1 + $0xb8] sm:$0xff]  ;;  %391 = vmatpush.bf16.msra.mxu1 %v693_v1  ;;  %v700_v6 = vld [vmem:[%s913_s1 + $0xb0] sm:$0xff]  ;;  %v699_v10 = vld [vmem:[%s913_s1 + $0xa8] sm:$0xff] }
   0x4   :  { %v709_v3 = vld [vmem:[%s913_s1 + $0xf8] sm:$0xff]  ;;  %410 = vmatpush.bf16.msra.mxu2 %v701_v2  ;;  %v708_v7 = vld [vmem:[%s913_s1 + $0xf0] sm:$0xff]  ;;  %v707_v11 = vld [vmem:[%s913_s1 + $0xe8] sm:$0xff] }
   0x5   :  { %429 = vmatpush.bf16.msra.mxu3 %v709_v3  ;;  %v682_v12 = vld [vmem:[%s913_s1 + $0x20] sm:$0xff]  ;;  %v681_v16 = vld [vmem:[%s913_s1 + $0x18] sm:$0xff]  ;;  %v680_v20 = vld [vmem:[%s913_s1 + $0x10] sm:$0xff] }
   0x6   :  { %373 = vmatpush.bf16.msra.mxu0 %v684_v4  ;;  %v690_v13 = vld [vmem:[%s913_s1 + $0x60] sm:$0xff]  ;;  %v689_v17 = vld [vmem:[%s913_s1 + $0x58] sm:$0xff]  ;;  %v688_v21 = vld [vmem:[%s913_s1 + $0x50] sm:$0xff] }
   0x7   :  { %392 = vmatpush.bf16.msra.mxu1 %v692_v5  ;;  %v698_v14 = vld [vmem:[%s913_s1 + $0xa0] sm:$0xff]  ;;  %v697_v18 = vld [vmem:[%s913_s1 + $0x98] sm:$0xff]  ;;  %v696_v22 = vld [vmem:[%s913_s1 + $0x90] sm:$0xff] }
   0x8   :  { %411 = vmatpush.bf16.msra.mxu2 %v700_v6  ;;  %v706_v15 = vld [vmem:[%s913_s1 + $0xe0] sm:$0xff]  ;;  %v705_v19 = vld [vmem:[%s913_s1 + $0xd8] sm:$0xff]  ;;  %v704_v23 = vld [vmem:[%s913_s1 + $0xd0] sm:$0xff] }
   0x9   :  { %430 = vmatpush.bf16.msra.mxu3 %v708_v7  ;;  %v679_v24 = vld [vmem:[%s913_s1 + $0x8] sm:$0xff]  ;;  %v678_v28 = vld [vmem:[%s913_s1] sm:$0xff]  ;;  %v670_v33 = vld [vmem:[%s914_s0 + $0x10] sm:$0xf0] }
   0xa   :  { %374 = vmatpush.bf16.msra.mxu0 %v683_v8  ;;  %v687_v25 = vld [vmem:[%s913_s1 + $0x48] sm:$0xff]  ;;  %v686_v29 = vld [vmem:[%s913_s1 + $0x40] sm:$0xff]  ;;  %v486_v35 = vld [vmem:[%s914_s0 + $0x14] sm:$0xf0] }
   0xb   :  { %393 = vmatpush.bf16.msra.mxu1 %v691_v9  ;;  %v695_v26 = vld [vmem:[%s913_s1 + $0x88] sm:$0xff]  ;;  %v694_v30 = vld [vmem:[%s913_s1 + $0x80] sm:$0xff]  ;;  %v671_v37 = vld [vmem:[%s914_s0 + $0x18] sm:$0xf0] }
   0xc   :  { %412 = vmatpush.bf16.msra.mxu2 %v699_v10  ;;  %v703_v27 = vld [vmem:[%s913_s1 + $0xc8] sm:$0xff]  ;;  %v702_v31 = vld [vmem:[%s913_s1 + $0xc0] sm:$0xff]  ;;  %v713_v40 = vld [vmem:[%s913_s1 + $0x118] sm:$0xff] }
   0xd   :  { %431 = vmatpush.bf16.msra.mxu3 %v707_v11  ;;  %v484_v32 = vld [vmem:[%s914_s0] sm:$0xf]  ;;  %v668_v34 = vld [vmem:[%s914_s0 + $0x4] sm:$0xf]  ;;  %v492_v36 = vld [vmem:[%s914_s0 + $0x8] sm:$0xf] }
   0xe   :  { %375 = vmatpush.bf16.msra.mxu0 %v682_v12  ;;  %v669_v38 = vld [vmem:[%s914_s0 + $0xc] sm:$0xf]  ;;  %v494_v39 = vld [vmem:[%s914_s0 + $0x1c] sm:$0xf0]  ;;  %v485_v41 = vor.u32 %v670_v33, %v484_v32  ;;  %v489_v42 = vor.u32 %v668_v34, %v486_v35  ;;  %v493_v43 = vor.u32 %v671_v37, %v492_v36  ;;  %v712_v45 = vld [vmem:[%s913_s1 + $0x110] sm:$0xff] }
   0xf   :  { %394 = vmatpush.bf16.msra.mxu1 %v690_v13  ;;  %v497_v44 = vor.u32 %v669_v38, %v494_v39  ;;  %v711_v46 = vld [vmem:[%s913_s1 + $0x108] sm:$0xff]  ;;  %v710_v47 = vld [vmem:[%s913_s1 + $0x100] sm:$0xff]  ;;  %v675_v49 = vld [vmem:[%s914_s0 + $0x38] sm:$0xf0] }
  0x10   :  { %413 = vmatpush.bf16.msra.mxu2 %v698_v14  ;;  %v504_v48 = vld [vmem:[%s914_s0 + $0x28] sm:$0xf]  ;;  %v673_v50 = vld [vmem:[%s914_s0 + $0x2c] sm:$0xf]  ;;  %v506_v51 = vld [vmem:[%s914_s0 + $0x3c] sm:$0xf0] }
  0x11   :  { %432 = vmatpush.bf16.msra.mxu3 %v706_v15  ;;  %v512_v52 = vld [vmem:[%s914_s0 + $0x30] sm:$0xf]  ;;  %v676_v53 = vld [vmem:[%s914_s0 + $0x40] sm:$0xf0]  ;;  %v674_v54 = vld [vmem:[%s914_s0 + $0x34] sm:$0xf]  ;;  %v505_v56 = vor.u32 %v675_v49, %v504_v48  ;;  %v509_v57 = vor.u32 %v673_v50, %v506_v51 }
  0x12   :  { %376 = vmatpush.bf16.msra.mxu0 %v681_v16  ;;  %v514_v55 = vld [vmem:[%s914_s0 + $0x44] sm:$0xf0]  ;;  %v513_v58 = vor.u32 %v676_v53, %v512_v52  ;;  %v500_v60 = vld [vmem:[%s914_s0 + $0x10] sm:$0xf]  ;;  %v672_v61 = vld [vmem:[%s914_s0 + $0x20] sm:$0xf0] }
  0x13   :  { %395 = vmatpush.bf16.msra.mxu1 %v689_v17  ;;  %v517_v59 = vor.u32 %v674_v54, %v514_v55  ;;  %v520_v62 = vld [vmem:[%s914_s0 + $0x38] sm:$0xf]  ;;  %v677_v63 = vld [vmem:[%s914_s0 + $0x48] sm:$0xf0]  ;;  %v501_v0 = vor.u32 %v672_v61, %v500_v60 }
  0x14   :  { %414 = vmatpush.bf16.msra.mxu2 %v697_v18  ;;  %v521_v1 = vor.u32 %v677_v63, %v520_v62 }
  0x15   :  { %433 = vmatpush.bf16.msra.mxu3 %v705_v19 }
  0x16   :  { %377 = vmatpush.bf16.msra.mxu0 %v680_v20 }
  0x17   :  { %396 = vmatpush.bf16.msra.mxu1 %v688_v21 }
  0x18   :  { %415 = vmatpush.bf16.msra.mxu2 %v696_v22 }
  0x19   :  { %434 = vmatpush.bf16.msra.mxu3 %v704_v23 }
  0x1a   :  { %378 = vmatpush.bf16.msra.mxu0 %v679_v24 }
  0x1b   :  { %397 = vmatpush.bf16.msra.mxu1 %v687_v25 }
  0x1c   :  { %416 = vmatpush.bf16.msra.mxu2 %v695_v26 }
  0x1d   :  { %435 = vmatpush.bf16.msra.mxu3 %v703_v27 }
  0x1e   :  { %379 = vmatpush.bf16.msra.mxu0 %v678_v28 }
  0x1f   :  { %398 = vmatpush.bf16.msra.mxu1 %v686_v29 }
  0x20   :  { %417 = vmatpush.bf16.msra.mxu2 %v694_v30 }
  0x21   :  { %436 = vmatpush.bf16.msra.mxu3 %v702_v31  ;;  %380 = vmatmul.bf16.vlgmr.msra.gmra.mxu0 %v485_v41 }
  0x22   :  { %452 = vmatpush.bf16.msrb.mxu0 %v713_v40  ;;  %399 = vmatmul.bf16.vlgmr.msra.gmra.mxu1 %v489_v42 }
  0x23   :  { %714 = vmatpush.bf16.msrb.mxu1 %v713_v40  ;;  %418 = vmatmul.bf16.vlgmr.msra.gmra.mxu2 %v493_v43  ;;  %v718_v40 = vld [vmem:[%s915_s2] ss:$0 sm:$0xff] }
  0x24   :  { %437 = vmatmul.bf16.vlgmr.msra.gmra.mxu3 %v497_v44 }
  0x26   :  { %453 = vmatpush.bf16.msrb.mxu0 %v712_v45 }
  0x27   :  { %715 = vmatpush.bf16.msrb.mxu1 %v712_v45 }
  0x2a   :  { %454 = vmatpush.bf16.msrb.mxu0 %v711_v46 }
  0x2b   :  { %716 = vmatpush.bf16.msrb.mxu1 %v711_v46 }
  0x2e   :  { %455 = vmatpush.bf16.msrb.mxu0 %v710_v47 }
  0x2f   :  { %717 = vmatpush.bf16.msrb.mxu1 %v710_v47 }
  0x31   :  { %385 = vmatmul.bf16.gmra.mxu0 %v505_v56 }
  0x32   :  { %404 = vmatmul.bf16.gmra.mxu1 %v509_v57 }
  0x33   :  { %423 = vmatmul.bf16.gmra.mxu2 %v513_v58 }
  0x34   :  { %442 = vmatmul.bf16.gmra.mxu3 %v517_v59 }
  0x41   :  { %666 = vmatmul.msk.bf16.vlgmr.msrb.gmra.mxu0 %vm365_vm0, %v501_v0 }
  0x42   :  { %667 = vmatmul.msk.bf16.vlgmr.msrb.gmra.mxu1 %vm365_vm0, %v521_v1 }
  0x9e   :  { %v381_v2 = vpop.f32.mrf.mxu0 }
  0x9f   :  { %v400_v3 = vpop.f32.mrf.mxu1 }
  0xa0   :  { %v401_v19 = vadd.f32 %v400_v3, %v381_v2 }
  0xa6   :  { %v419_v4 = vpop.f32.mrf.mxu2  ;;  %v383_v6 = vpop.f32.mrf.mxu0 }
  0xa7   :  { %v438_v5 = vpop.f32.mrf.mxu3  ;;  %v402_v7 = vpop.f32.mrf.mxu1  ;;  %v420_v23 = vadd.f32 %v419_v4, %v401_v19 }
  0xa8   :  { %v403_v20 = vadd.f32 %v402_v7, %v383_v6 }
  0xa9   :  { %v439_v28 = vadd.f32 %v438_v5, %v420_v23 }
  0xae   :  { %v421_v8 = vpop.f32.mrf.mxu2  ;;  %v386_v9 = vpop.f32.mrf.mxu0 }
  0xaf   :  { %v405_v10 = vpop.f32.mrf.mxu1  ;;  %v440_v11 = vpop.f32.mrf.mxu3  ;;  %v422_v24 = vadd.f32 %v421_v8, %v403_v20 }
  0xb0   :  { %v406_v21 = vadd.f32 %v405_v10, %v386_v9 }
  0xb1   :  { %v441_v29 = vadd.f32 %v440_v11, %v422_v24 }
  0xb6   :  { %v424_v12 = vpop.f32.mrf.mxu2  ;;  %v388_v13 = vpop.f32.mrf.mxu0 }
  0xb7   :  { %v407_v14 = vpop.f32.mrf.mxu1  ;;  %v443_v15 = vpop.f32.mrf.mxu3  ;;  %v425_v25 = vadd.f32 %v424_v12, %v406_v21 }
  0xb8   :  { %v408_v22 = vadd.f32 %v407_v14, %v388_v13 }
  0xb9   :  { %v444_v30 = vadd.f32 %v443_v15, %v425_v25 }
  0xbe   :  { %v426_v16 = vpop.f32.mrf.mxu2  ;;  %v457_v17 = vpop.f32.mrf.mxu0 }
  0xbf   :  { %v462_v18 = vpop.f32.mrf.mxu1  ;;  %v427_v26 = vadd.f32 %v426_v16, %v408_v22  ;;  %v445_v27 = vpop.f32.mrf.mxu3  ;;  %v458_v34 = vadd.f32 %v457_v17, %v439_v28 }
  0xc0   :  { %v463_v35 = vadd.f32 %v462_v18, %v444_v30 }
  0xc1   :  { %v446_v31 = vadd.f32 %v445_v27, %v427_v26 }
  0xc6   :  { %v459_v32 = vpop.f32.mrf.mxu0 }
  0xc7   :  { %v464_v33 = vpop.f32.mrf.mxu1  ;;  %v460_v36 = vadd.f32 %v459_v32, %v441_v29 }
  0xc8   :  { %v465_v37 = vadd.f32 %v464_v33, %v446_v31 }
  0xc9   :  { %v467_v38 = vmax.f32 %v458_v34, %v460_v36 }
  0xca   :  { %v468_v39 = vmax.f32 %v463_v35, %v465_v37 }
  0xcc   :  { %v469_v41 = vmax.f32 %v467_v38, %v468_v39 }
  0xce   :  { %v474_v42 = vadd.f32 %v718_v40, %v469_v41 }
  0xd0   :  { %v475_v43 = vmax.f32 %v474_v42, 0.0 }
  0xd2   :  { %v476_v44 = vpack.c.bf16 %v475_v43, %v475_v43 }
  0xd4   :  { %477 = vst [vmem:[%s916_s3] sm:$0xf] %v476_v44 }

// kernel: autoencoder_forward.12
= control target key start
LH: loop header
LB: loop body
LE: loop exit
PB: predicated region body
PF: predicated region fallthrough
CT: control target
= control target key end

     0   :  { %vm46_vm0 = vcmask 261120   ;;  %vm81_vm1 = vcmask 1040384   ;;  %s166_s1 = inlined_call_operand.vmem [shape: bf16[32,256], index: 1, kind: input, shape index: {}]   ;;  %s167_s0 = inlined_call_operand.vmem [shape: bf16[2,32], index: 0, kind: input, shape index: {}]   ;;  %s168_s2 = inlined_call_operand.vmem [shape: f32[1,256], index: 2, kind: input, shape index: {}]   ;;  %s169_s3 = inlined_call_operand.vmem [shape: bf16[2,256], index: 3, kind: output, shape index: {}]  }
   0x1   :  { %v101_v0 = vld [vmem:[%s166_s1 + $0x10] sm:$0xf]  ;;  %v112_v1 = vld [vmem:[%s166_s1 + $0x14] sm:$0xf0]  ;;  %v111_v2 = vld [vmem:[%s166_s1 + $0x14] sm:$0xf] }
   0x2   :  { %v102_v3 = vor.u32 %v112_v1, %v101_v0  ;;  %v103_v4 = vld [vmem:[%s166_s1 + $0x18] sm:$0xf0]  ;;  %v93_v5 = vld [vmem:[%s166_s1] sm:$0xf]  ;;  %v110_v6 = vld [vmem:[%s166_s1 + $0x4] sm:$0xf0] }
   0x3   :  { %v106_v7 = vor.u32 %v111_v2, %v103_v4  ;;  %v109_v8 = vld [vmem:[%s166_s1 + $0x4] sm:$0xf]  ;;  %v95_v9 = vld [vmem:[%s166_s1 + $0x8] sm:$0xf0]  ;;  %v94_v10 = vor.u32 %v110_v6, %v93_v5  ;;  %v15_v12 = vld [vmem:[%s167_s0] sm:$0x1] }
   0x4   :  { %56 = vmatpush.bf16.msra.mxu0 %v102_v3  ;;  %v98_v11 = vor.u32 %v109_v8, %v95_v9  ;;  %v20_v13 = vld [vmem:[%s168_s2] sm:$0x3] }
   0x5   :  { %69 = vmatpush.bf16.msra.mxu1 %v106_v7  ;;  %v22_v14 = vperm.slane %v20_v13, 0  ;;  %v23_v15 = vperm.slane %v20_v13, 1 }
   0x8   :  { %57 = vmatpush.bf16.msra.mxu0 %v94_v10 }
   0x9   :  { %70 = vmatpush.bf16.msra.mxu1 %v98_v11 }
   0xb   :  { %107 = vmatmul.msk.bf16.vlgmr.msra.gmra.mxu0 %vm46_vm0, %v15_v12 }
   0xc   :  { %108 = vmatmul.msk.bf16.vlgmr.msra.gmra.mxu1 %vm46_vm0, %v15_v12 }
  0x88   :  { %v59_v16 = vpop.f32.mrf.mxu0 }
  0x89   :  { %v60_v17 = vadd.f32 %v59_v16, %v22_v14  ;;  %v72_v18 = vpop.f32.mrf.mxu1 }
  0x8a   :  { %v73_v19 = vadd.f32 %v72_v18, %v23_v15 }
  0x8b   :  { %v76_v20 = vmax.f32 %v60_v17, 0.0 }
  0x8c   :  { %v77_v21 = vmax.f32 %v73_v19, 0.0 }
  0x8e   :  { %v78_v22 = vpack.c.bf16 %v77_v21, %v76_v20 }
  0x90   :  { %v80_v23 = vrot.slane %v78_v22, 3  ;;  %v61_v24 = vpop.f32.mrf.mxu0 }
  0x91   :  { %v74_v25 = vpop.f32.mrf.mxu1 }
  0x92   :  { %v84_v26 = vsel %vm81_vm1, %v78_v22, %v80_v23 }
  0x93   :  { %86 = vst [vmem:[%s169_s3] sm:$0x3] %v84_v26 }

// kernel: autoencoder_forward.13
= control target key start
LH: loop header
LB: loop body
LE: loop exit
PB: predicated region body
PF: predicated region fallthrough
CT: control target
= control target key end

     0   :  { %s667_s1 = inlined_call_operand.vmem [shape: bf16[384,128], index: 1, kind: input, shape index: {}]   ;;  %s668_s2 = inlined_call_operand.vmem [shape: f32[1,128], index: 2, kind: input, shape index: {}]   ;;  %s669_s0 = inlined_call_operand.vmem [shape: bf16[40,384], index: 0, kind: input, shape index: {}]   ;;  %s670_s3 = inlined_call_operand.vmem [shape: bf16[40,128], index: 3, kind: output, shape index: {}]  }
   0x1   :  { %v484_v0 = vld [vmem:[%s667_s1 + $0x38] sm:$0xff]  ;;  %v483_v3 = vld [vmem:[%s667_s1 + $0x30] sm:$0xff]  ;;  %v482_v6 = vld [vmem:[%s667_s1 + $0x28] sm:$0xff] }
   0x2   :  { %v492_v1 = vld [vmem:[%s667_s1 + $0x78] sm:$0xff]  ;;  %263 = vmatpush.bf16.msra.mxu0 %v484_v0  ;;  %v491_v4 = vld [vmem:[%s667_s1 + $0x70] sm:$0xff]  ;;  %512 = vmatpush.bf16.msra.mxu3 %v484_v0  ;;  %v490_v7 = vld [vmem:[%s667_s1 + $0x68] sm:$0xff] }
   0x3   :  { %v500_v2 = vld [vmem:[%s667_s1 + $0xb8] sm:$0xff]  ;;  %286 = vmatpush.bf16.msra.mxu1 %v492_v1  ;;  %v499_v5 = vld [vmem:[%s667_s1 + $0xb0] sm:$0xff]  ;;  %v498_v8 = vld [vmem:[%s667_s1 + $0xa8] sm:$0xff] }
   0x4   :  { %309 = vmatpush.bf16.msra.mxu2 %v500_v2  ;;  %v481_v9 = vld [vmem:[%s667_s1 + $0x20] sm:$0xff]  ;;  %v480_v12 = vld [vmem:[%s667_s1 + $0x18] sm:$0xff]  ;;  %v479_v15 = vld [vmem:[%s667_s1 + $0x10] sm:$0xff] }
   0x5   :  { %v489_v10 = vld [vmem:[%s667_s1 + $0x60] sm:$0xff]  ;;  %v488_v13 = vld [vmem:[%s667_s1 + $0x58] sm:$0xff]  ;;  %v487_v16 = vld [vmem:[%s667_s1 + $0x50] sm:$0xff] }
   0x6   :  { %264 = vmatpush.bf16.msra.mxu0 %v483_v3  ;;  %513 = vmatpush.bf16.msra.mxu3 %v483_v3  ;;  %v497_v11 = vld [vmem:[%s667_s1 + $0xa0] sm:$0xff]  ;;  %v496_v14 = vld [vmem:[%s667_s1 + $0x98] sm:$0xff]  ;;  %v495_v17 = vld [vmem:[%s667_s1 + $0x90] sm:$0xff] }
   0x7   :  { %287 = vmatpush.bf16.msra.mxu1 %v491_v4  ;;  %v478_v18 = vld [vmem:[%s667_s1 + $0x8] sm:$0xff]  ;;  %v477_v21 = vld [vmem:[%s667_s1] sm:$0xff]  ;;  %v355_v27 = vld [vmem:[%s669_s0 + $0xc] sm:$0xf0] }
   0x8   :  { %310 = vmatpush.bf16.msra.mxu2 %v499_v5  ;;  %v486_v19 = vld [vmem:[%s667_s1 + $0x48] sm:$0xff]  ;;  %v485_v22 = vld [vmem:[%s667_s1 + $0x40] sm:$0xff]  ;;  %v473_v29 = vld [vmem:[%s669_s0 + $0x10] sm:$0xf0] }
   0x9   :  { %v494_v20 = vld [vmem:[%s667_s1 + $0x88] sm:$0xff]  ;;  %v493_v23 = vld [vmem:[%s667_s1 + $0x80] sm:$0xff]  ;;  %v365_v30 = vld [vmem:[%s669_s0 + $0x18] sm:$0xf] }
   0xa   :  { %265 = vmatpush.bf16.msra.mxu0 %v482_v6  ;;  %514 = vmatpush.bf16.msra.mxu3 %v482_v6  ;;  %v353_v24 = vld [vmem:[%s669_s0] sm:$0xf]  ;;  %v472_v25 = vld [vmem:[%s669_s0 + $0x8] sm:$0xf0]  ;;  %v471_v26 = vld [vmem:[%s669_s0 + $0x4] sm:$0xf] }
   0xb   :  { %288 = vmatpush.bf16.msra.mxu1 %v490_v7  ;;  %v361_v28 = vld [vmem:[%s669_s0 + $0x8] sm:$0xf]  ;;  %v475_v31 = vld [vmem:[%s669_s0 + $0x20] sm:$0xf0]  ;;  %v354_v32 = vor.u32 %v472_v25, %v353_v24  ;;  %v358_v33 = vor.u32 %v471_v26, %v355_v27  ;;  %v22_v36 = vld [vmem:[%s669_s0 + $0x30] sm:$0xff] }
   0xc   :  { %311 = vmatpush.bf16.msra.mxu2 %v498_v8  ;;  %v362_v34 = vor.u32 %v473_v29, %v361_v28  ;;  %v366_v35 = vor.u32 %v475_v31, %v365_v30  ;;  %v474_v37 = vld [vmem:[%s669_s0 + $0x1c] sm:$0xf]  ;;  %v367_v38 = vld [vmem:[%s669_s0 + $0x24] sm:$0xf0]  ;;  %v98_v39 = vunpack.c.l.b16 %v22_v36  ;;  %v373_v40 = vld [vmem:[%s669_s0 + $0x20] sm:$0xf]  ;;  %v99_v46 = vunpack.c.h.b16 %v22_v36 }
   0xd   :  { %v476_v41 = vld [vmem:[%s669_s0 + $0x28] sm:$0xf0]  ;;  %v370_v42 = vor.u32 %v474_v37, %v367_v38  ;;  %v23_v45 = vld [vmem:[%s669_s0 + $0x38] sm:$0xf]  ;;  %v520_v52 = vld [vmem:[%s668_s2] ss:$0 sm:$0xff] }
   0xe   :  { %266 = vmatpush.bf16.msra.mxu0 %v481_v9  ;;  %515 = vmatpush.bf16.msra.mxu3 %v481_v9  ;;  %v374_v43 = vor.u32 %v476_v41, %v373_v40  ;;  %v107_v44 = vpack.c.b16 %v98_v39, %v98_v39  ;;  %v100_v47 = vunpack.c.l.b16 %v23_v45  ;;  %v108_v48 = vpack.c.b16 %v99_v46, %v99_v46 }
   0xf   :  { %289 = vmatpush.bf16.msra.mxu1 %v489_v10 }
  0x10   :  { %312 = vmatpush.bf16.msra.mxu2 %v497_v11  ;;  %v109_v49 = vpack.c.b16 %v100_v47, %v100_v47 }
  0x12   :  { %267 = vmatpush.bf16.msra.mxu0 %v480_v12  ;;  %516 = vmatpush.bf16.msra.mxu3 %v480_v12 }
  0x13   :  { %290 = vmatpush.bf16.msra.mxu1 %v488_v13 }
  0x14   :  { %313 = vmatpush.bf16.msra.mxu2 %v496_v14 }
  0x16   :  { %268 = vmatpush.bf16.msra.mxu0 %v479_v15  ;;  %517 = vmatpush.bf16.msra.mxu3 %v479_v15 }
  0x17   :  { %291 = vmatpush.bf16.msra.mxu1 %v487_v16 }
  0x18   :  { %314 = vmatpush.bf16.msra.mxu2 %v495_v17 }
  0x1a   :  { %269 = vmatpush.bf16.msra.mxu0 %v478_v18  ;;  %518 = vmatpush.bf16.msra.mxu3 %v478_v18 }
  0x1b   :  { %292 = vmatpush.bf16.msra.mxu1 %v486_v19 }
  0x1c   :  { %315 = vmatpush.bf16.msra.mxu2 %v494_v20 }
  0x1e   :  { %270 = vmatpush.bf16.msra.mxu0 %v477_v21  ;;  %519 = vmatpush.bf16.msra.mxu3 %v477_v21 }
  0x1f   :  { %293 = vmatpush.bf16.msra.mxu1 %v485_v22 }
  0x20   :  { %316 = vmatpush.bf16.msra.mxu2 %v493_v23 }
  0x21   :  { %271 = vmatmul.bf16.vlgmr.msra.gmra.mxu0 %v354_v32  ;;  %276 = vmatmul.bf16.vlgmr.msra.gmra.mxu3 %v366_v35 }
  0x22   :  { %294 = vmatmul.bf16.vlgmr.msra.gmra.mxu1 %v358_v33 }
  0x23   :  { %317 = vmatmul.bf16.vlgmr.msra.gmra.mxu2 %v362_v34 }
  0x31   :  { %281 = vmatmul.bf16.gmra.mxu3 %v107_v44 }
  0x32   :  { %299 = vmatmul.bf16.gmra.mxu1 %v370_v42 }
  0x33   :  { %322 = vmatmul.bf16.gmra.mxu2 %v374_v43 }
  0x42   :  { %304 = vmatmul.bf16.gmra.mxu1 %v108_v48 }
  0x43   :  { %327 = vmatmul.bf16.gmra.mxu2 %v109_v49 }
  0x9e   :  { %v272_v50 = vpop.f32.mrf.mxu0 }
  0x9f   :  { %v295_v51 = vpop.f32.mrf.mxu1  ;;  %v273_v53 = vadd.f32 %v520_v52, %v272_v50 }
  0xa1   :  { %v296_v58 = vadd.f32 %v295_v51, %v273_v53 }
  0xa4   :  { %v277_v55 = vpop.f32.mrf.mxu3 }
  0xa5   :  { %v278_v5 = vadd.f32 %v520_v52, %v277_v55 }
  0xa6   :  { %v318_v54 = vpop.f32.mrf.mxu2  ;;  %v274_v56 = vpop.f32.mrf.mxu0 }
  0xa7   :  { %v297_v57 = vpop.f32.mrf.mxu1  ;;  %v275_v59 = vadd.f32 %v520_v52, %v274_v56  ;;  %v319_v60 = vadd.f32 %v318_v54, %v296_v58 }
  0xa9   :  { %v298_v61 = vadd.f32 %v297_v57, %v275_v59  ;;  %v332_v2 = vmax.f32 %v319_v60, 0.0 }
  0xac   :  { %v279_v63 = vpop.f32.mrf.mxu3 }
  0xad   :  { %v280_v10 = vadd.f32 %v520_v52, %v279_v63 }
  0xae   :  { %v320_v62 = vpop.f32.mrf.mxu2 }
  0xaf   :  { %v321_v0 = vadd.f32 %v320_v62, %v298_v61  ;;  %v300_v1 = vpop.f32.mrf.mxu1 }
  0xb0   :  { %v301_v9 = vadd.f32 %v300_v1, %v278_v5 }
  0xb1   :  { %v333_v3 = vmax.f32 %v321_v0, 0.0 }
  0xb3   :  { %v504_v4 = vpack.c.bf16 %v333_v3, %v332_v2 }
  0xb4   :  { %v282_v7 = vpop.f32.mrf.mxu3 }
  0xb5   :  { %505 = vst [vmem:[%s670_s3] sm:$0xff] %v504_v4   ;;  %v283_v15 = vadd.f32 %v520_v52, %v282_v7 }
  0xb6   :  { %v323_v6 = vpop.f32.mrf.mxu2 }
  0xb7   :  { %v302_v8 = vpop.f32.mrf.mxu1  ;;  %v324_v11 = vadd.f32 %v323_v6, %v301_v9 }
  0xb8   :  { %v303_v12 = vadd.f32 %v302_v8, %v280_v10 }
  0xb9   :  { %v334_v18 = vmax.f32 %v324_v11, 0.0 }
  0xbc   :  { %v284_v14 = vpop.f32.mrf.mxu3 }
  0xbe   :  { %v325_v13 = vpop.f32.mrf.mxu2 }
  0xbf   :  { %v326_v16 = vadd.f32 %v325_v13, %v303_v12  ;;  %v305_v17 = vpop.f32.mrf.mxu1 }
  0xc0   :  { %v306_v21 = vadd.f32 %v305_v17, %v283_v15 }
  0xc1   :  { %v335_v19 = vmax.f32 %v326_v16, 0.0 }
  0xc3   :  { %v509_v20 = vpack.c.bf16 %v335_v19, %v334_v18 }
  0xc5   :  { %511 = vst [vmem:[%s670_s3 + $0x8] sm:$0xff] %v509_v20  }
  0xc6   :  { %v328_v22 = vpop.f32.mrf.mxu2 }
  0xc7   :  { %v329_v23 = vadd.f32 %v328_v22, %v306_v21  ;;  %v307_v24 = vpop.f32.mrf.mxu1 }
  0xc9   :  { %v336_v25 = vmax.f32 %v329_v23, 0.0 }
  0xcb   :  { %v341_v26 = vpack.c.bf16 %v336_v25, %v336_v25 }
  0xcd   :  { %346 = vst [vmem:[%s670_s3 + $0x10] sm:$0xf] %v341_v26 }
  0xce   :  { %v330_v27 = vpop.f32.mrf.mxu2 }

// kernel: autoencoder_forward.14
= control target key start
LH: loop header
LB: loop body
LE: loop exit
PB: predicated region body
PF: predicated region fallthrough
CT: control target
= control target key end

     0   :  { %s1597_s1 = inlined_call_operand.vmem [shape: bf16[128,1024], index: 1, kind: input, shape index: {}]   ;;  %s1598_s0 = inlined_call_operand.vmem [shape: bf16[40,128], index: 0, kind: input, shape index: {}]   ;;  %s1599_s2 = inlined_call_operand.vmem [shape: f32[1,1024], index: 2, kind: input, shape index: {}]   ;;  %s1600_s3 = inlined_call_operand.vmem [shape: bf16[40,1024], index: 3, kind: output, shape index: {}]  }
   0x1   :  { %v939_v0 = vld [vmem:[%s1597_s1 + $0x1c0] sm:$0xf]  ;;  %v1027_v2 = vld [vmem:[%s1597_s1 + $0x1c4] sm:$0xf]  ;;  %v947_v5 = vld [vmem:[%s1597_s1 + $0x1c8] sm:$0xf] }
   0x2   :  { %v1031_v1 = vld [vmem:[%s1597_s1 + $0x1dc] sm:$0xf0]  ;;  %v941_v4 = vld [vmem:[%s1597_s1 + $0x1e0] sm:$0xf0]  ;;  %v1032_v6 = vld [vmem:[%s1597_s1 + $0x1e4] sm:$0xf0] }
   0x3   :  { %v940_v3 = vor.u32 %v1031_v1, %v939_v0  ;;  %v944_v7 = vor.u32 %v1027_v2, %v941_v4  ;;  %v948_v8 = vor.u32 %v1032_v6, %v947_v5  ;;  %v1028_v9 = vld [vmem:[%s1597_s1 + $0x1cc] sm:$0xf]  ;;  %v907_v11 = vld [vmem:[%s1597_s1 + $0x180] sm:$0xf]  ;;  %v1019_v14 = vld [vmem:[%s1597_s1 + $0x184] sm:$0xf] }
   0x4   :  { %v949_v10 = vld [vmem:[%s1597_s1 + $0x1e8] sm:$0xf0]  ;;  %v1023_v13 = vld [vmem:[%s1597_s1 + $0x19c] sm:$0xf0]  ;;  %v909_v15 = vld [vmem:[%s1597_s1 + $0x1a0] sm:$0xf0] }
   0x5   :  { %437 = vmatpush.bf16.msra.mxu0 %v940_v3  ;;  %v952_v12 = vor.u32 %v1028_v9, %v949_v10  ;;  %460 = vmatpush.bf16.msra.mxu1 %v944_v7  ;;  %v908_v16 = vor.u32 %v1023_v13, %v907_v11  ;;  %v912_v17 = vor.u32 %v1019_v14, %v909_v15  ;;  %v915_v18 = vld [vmem:[%s1597_s1 + $0x188] sm:$0xf]  ;;  %v1020_v20 = vld [vmem:[%s1597_s1 + $0x18c] sm:$0xf]  ;;  %v875_v23 = vld [vmem:[%s1597_s1 + $0x140] sm:$0xf] }
   0x6   :  { %483 = vmatpush.bf16.msra.mxu2 %v948_v8  ;;  %v1024_v19 = vld [vmem:[%s1597_s1 + $0x1a4] sm:$0xf0]  ;;  %v917_v22 = vld [vmem:[%s1597_s1 + $0x1a8] sm:$0xf0]  ;;  %v1015_v24 = vld [vmem:[%s1597_s1 + $0x15c] sm:$0xf0] }
   0x7   :  { %506 = vmatpush.bf16.msra.mxu3 %v952_v12  ;;  %v916_v21 = vor.u32 %v1024_v19, %v915_v18  ;;  %v920_v25 = vor.u32 %v1020_v20, %v917_v22  ;;  %v1011_v26 = vld [vmem:[%s1597_s1 + $0x144] sm:$0xf]  ;;  %v883_v28 = vld [vmem:[%s1597_s1 + $0x148] sm:$0xf]  ;;  %v876_v29 = vor.u32 %v1015_v24, %v875_v23  ;;  %v1012_v31 = vld [vmem:[%s1597_s1 + $0x14c] sm:$0xf] }
   0x8   :  { %v877_v27 = vld [vmem:[%s1597_s1 + $0x160] sm:$0xf0]  ;;  %v1016_v30 = vld [vmem:[%s1597_s1 + $0x164] sm:$0xf0]  ;;  %v885_v32 = vld [vmem:[%s1597_s1 + $0x168] sm:$0xf0] }
   0x9   :  { %438 = vmatpush.bf16.msra.mxu0 %v908_v16  ;;  %461 = vmatpush.bf16.msra.mxu1 %v912_v17  ;;  %v880_v33 = vor.u32 %v1011_v26, %v877_v27  ;;  %v884_v34 = vor.u32 %v1016_v30, %v883_v28  ;;  %v843_v35 = vld [vmem:[%s1597_s1 + $0x100] sm:$0xf]  ;;  %v1003_v37 = vld [vmem:[%s1597_s1 + $0x104] sm:$0xf]  ;;  %v888_v38 = vor.u32 %v1012_v31, %v885_v32  ;;  %v851_v40 = vld [vmem:[%s1597_s1 + $0x108] sm:$0xf] }
   0xa   :  { %484 = vmatpush.bf16.msra.mxu2 %v916_v21  ;;  %v1007_v36 = vld [vmem:[%s1597_s1 + $0x11c] sm:$0xf0]  ;;  %v845_v39 = vld [vmem:[%s1597_s1 + $0x120] sm:$0xf0]  ;;  %v1008_v41 = vld [vmem:[%s1597_s1 + $0x124] sm:$0xf0] }
   0xb   :  { %507 = vmatpush.bf16.msra.mxu3 %v920_v25  ;;  %v1004_v42 = vld [vmem:[%s1597_s1 + $0x10c] sm:$0xf]  ;;  %v844_v44 = vor.u32 %v1007_v36, %v843_v35  ;;  %v848_v45 = vor.u32 %v1003_v37, %v845_v39  ;;  %v852_v46 = vor.u32 %v1008_v41, %v851_v40  ;;  %v811_v47 = vld [vmem:[%s1597_s1 + $0xc0] sm:$0xf]  ;;  %v995_v49 = vld [vmem:[%s1597_s1 + $0xc4] sm:$0xf] }
   0xc   :  { %v853_v43 = vld [vmem:[%s1597_s1 + $0x128] sm:$0xf0]  ;;  %v999_v48 = vld [vmem:[%s1597_s1 + $0xdc] sm:$0xf0]  ;;  %v813_v51 = vld [vmem:[%s1597_s1 + $0xe0] sm:$0xf0] }
   0xd   :  { %439 = vmatpush.bf16.msra.mxu0 %v876_v29  ;;  %462 = vmatpush.bf16.msra.mxu1 %v880_v33  ;;  %v856_v50 = vor.u32 %v1004_v42, %v853_v43  ;;  %v819_v52 = vld [vmem:[%s1597_s1 + $0xc8] sm:$0xf]  ;;  %v996_v54 = vld [vmem:[%s1597_s1 + $0xcc] sm:$0xf]  ;;  %v812_v56 = vor.u32 %v999_v48, %v811_v47  ;;  %v816_v57 = vor.u32 %v995_v49, %v813_v51  ;;  %v779_v59 = vld [vmem:[%s1597_s1 + $0x80] sm:$0xf] }
   0xe   :  { %485 = vmatpush.bf16.msra.mxu2 %v884_v34  ;;  %v1000_v53 = vld [vmem:[%s1597_s1 + $0xe4] sm:$0xf0]  ;;  %v821_v55 = vld [vmem:[%s1597_s1 + $0xe8] sm:$0xf0]  ;;  %v991_v60 = vld [vmem:[%s1597_s1 + $0x9c] sm:$0xf0] }
   0xf   :  { %508 = vmatpush.bf16.msra.mxu3 %v888_v38  ;;  %v820_v58 = vor.u32 %v1000_v53, %v819_v52  ;;  %v987_v61 = vld [vmem:[%s1597_s1 + $0x84] sm:$0xf]  ;;  %v824_v62 = vor.u32 %v996_v54, %v821_v55  ;;  %v787_v0 = vld [vmem:[%s1597_s1 + $0x88] sm:$0xf]  ;;  %v988_v2 = vld [vmem:[%s1597_s1 + $0x8c] sm:$0xf]  ;;  %v780_v4 = vor.u32 %v991_v60, %v779_v59 }
  0x10   :  { %v781_v63 = vld [vmem:[%s1597_s1 + $0xa0] sm:$0xf0]  ;;  %v992_v1 = vld [vmem:[%s1597_s1 + $0xa4] sm:$0xf0]  ;;  %v789_v3 = vld [vmem:[%s1597_s1 + $0xa8] sm:$0xf0] }
  0x11   :  { %440 = vmatpush.bf16.msra.mxu0 %v844_v44  ;;  %463 = vmatpush.bf16.msra.mxu1 %v848_v45  ;;  %v784_v5 = vor.u32 %v987_v61, %v781_v63  ;;  %v788_v6 = vor.u32 %v992_v1, %v787_v0  ;;  %v747_v7 = vld [vmem:[%s1597_s1 + $0x40] sm:$0xf]  ;;  %v979_v9 = vld [vmem:[%s1597_s1 + $0x44] sm:$0xf]  ;;  %v792_v10 = vor.u32 %v988_v2, %v789_v3  ;;  %v755_v12 = vld [vmem:[%s1597_s1 + $0x48] sm:$0xf] }
  0x12   :  { %486 = vmatpush.bf16.msra.mxu2 %v852_v46  ;;  %v983_v8 = vld [vmem:[%s1597_s1 + $0x5c] sm:$0xf0]  ;;  %v749_v11 = vld [vmem:[%s1597_s1 + $0x60] sm:$0xf0]  ;;  %v984_v13 = vld [vmem:[%s1597_s1 + $0x64] sm:$0xf0] }
  0x13   :  { %509 = vmatpush.bf16.msra.mxu3 %v856_v50  ;;  %v980_v14 = vld [vmem:[%s1597_s1 + $0x4c] sm:$0xf]  ;;  %v748_v16 = vor.u32 %v983_v8, %v747_v7  ;;  %v715_v17 = vld [vmem:[%s1597_s1] sm:$0xf]  ;;  %v752_v18 = vor.u32 %v979_v9, %v749_v11  ;;  %v756_v19 = vor.u32 %v984_v13, %v755_v12  ;;  %v971_v21 = vld [vmem:[%s1597_s1 + $0x4] sm:$0xf] }
  0x14   :  { %v757_v15 = vld [vmem:[%s1597_s1 + $0x68] sm:$0xf0]  ;;  %v975_v20 = vld [vmem:[%s1597_s1 + $0x1c] sm:$0xf0]  ;;  %v717_v22 = vld [vmem:[%s1597_s1 + $0x20] sm:$0xf0] }
  0x15   :  { %441 = vmatpush.bf16.msra.mxu0 %v812_v56  ;;  %464 = vmatpush.bf16.msra.mxu1 %v816_v57  ;;  %v760_v23 = vor.u32 %v980_v14, %v757_v15  ;;  %v723_v24 = vld [vmem:[%s1597_s1 + $0x8] sm:$0xf]  ;;  %v972_v26 = vld [vmem:[%s1597_s1 + $0xc] sm:$0xf]  ;;  %v963_v28 = vld [vmem:[%s1597_s1 + $0x1d8] sm:$0xf]  ;;  %v716_v30 = vor.u32 %v975_v20, %v715_v17  ;;  %v720_v33 = vor.u32 %v971_v21, %v717_v22 }
  0x16   :  { %487 = vmatpush.bf16.msra.mxu2 %v820_v58  ;;  %v976_v25 = vld [vmem:[%s1597_s1 + $0x24] sm:$0xf0]  ;;  %v725_v27 = vld [vmem:[%s1597_s1 + $0x28] sm:$0xf0]  ;;  %v1034_v29 = vld [vmem:[%s1597_s1 + $0x1f4] sm:$0xf0] }
  0x17   :  { %510 = vmatpush.bf16.msra.mxu3 %v824_v62  ;;  %v1030_v31 = vld [vmem:[%s1597_s1 + $0x1dc] sm:$0xf]  ;;  %v724_v34 = vor.u32 %v976_v25, %v723_v24  ;;  %v1262_v35 = vld [vmem:[%s1598_s0] sm:$0xff]  ;;  %v728_v36 = vor.u32 %v972_v26, %v725_v27  ;;  %v964_v37 = vor.u32 %v1034_v29, %v963_v28  ;;  %v955_v38 = vld [vmem:[%s1597_s1 + $0x1d0] sm:$0xf] }
  0x18   :  { %v965_v32 = vld [vmem:[%s1597_s1 + $0x1f8] sm:$0xf0]  ;;  %v1033_v39 = vld [vmem:[%s1597_s1 + $0x1ec] sm:$0xf0]  ;;  %v1029_v40 = vld [vmem:[%s1597_s1 + $0x1d4] sm:$0xf] }
  0x19   :  { %442 = vmatpush.bf16.msra.mxu0 %v780_v4  ;;  %465 = vmatpush.bf16.msra.mxu1 %v784_v5  ;;  %v968_v41 = vor.u32 %v1030_v31, %v965_v32  ;;  %v957_v42 = vld [vmem:[%s1597_s1 + $0x1f0] sm:$0xf0]  ;;  %v931_v43 = vld [vmem:[%s1597_s1 + $0x198] sm:$0xf]  ;;  %v1022_v45 = vld [vmem:[%s1597_s1 + $0x19c] sm:$0xf]  ;;  %v956_v47 = vor.u32 %v1033_v39, %v955_v38 }
  0x1a   :  { %488 = vmatpush.bf16.msra.mxu2 %v788_v6  ;;  %v1026_v44 = vld [vmem:[%s1597_s1 + $0x1b4] sm:$0xf0]  ;;  %v933_v46 = vld [vmem:[%s1597_s1 + $0x1b8] sm:$0xf0]  ;;  %v960_v48 = vor.u32 %v1029_v40, %v957_v42  ;;  %v923_v50 = vld [vmem:[%s1597_s1 + $0x190] sm:$0xf] }
  0x1b   :  { %511 = vmatpush.bf16.msra.mxu3 %v792_v10  ;;  %v932_v49 = vor.u32 %v1026_v44, %v931_v43  ;;  %v1025_v51 = vld [vmem:[%s1597_s1 + $0x1ac] sm:$0xf0]  ;;  %v1021_v52 = vld [vmem:[%s1597_s1 + $0x194] sm:$0xf]  ;;  %v936_v53 = vor.u32 %v1022_v45, %v933_v46  ;;  %v899_v55 = vld [vmem:[%s1597_s1 + $0x158] sm:$0xf] }
  0x1c   :  { %v925_v54 = vld [vmem:[%s1597_s1 + $0x1b0] sm:$0xf0]  ;;  %v1018_v56 = vld [vmem:[%s1597_s1 + $0x174] sm:$0xf0]  ;;  %v1014_v57 = vld [vmem:[%s1597_s1 + $0x15c] sm:$0xf]  ;;  %v924_v59 = vor.u32 %v1025_v51, %v923_v50 }
  0x1d   :  { %443 = vmatpush.bf16.msra.mxu0 %v748_v16  ;;  %466 = vmatpush.bf16.msra.mxu1 %v752_v18  ;;  %v901_v58 = vld [vmem:[%s1597_s1 + $0x178] sm:$0xf0]  ;;  %v928_v60 = vor.u32 %v1021_v52, %v925_v54  ;;  %v900_v61 = vor.u32 %v1018_v56, %v899_v55  ;;  %v891_v62 = vld [vmem:[%s1597_s1 + $0x150] sm:$0xf]  ;;  %v1013_v0 = vld [vmem:[%s1597_s1 + $0x154] sm:$0xf] }
  0x1e   :  { %489 = vmatpush.bf16.msra.mxu2 %v756_v19  ;;  %v1017_v63 = vld [vmem:[%s1597_s1 + $0x16c] sm:$0xf0]  ;;  %v904_v1 = vor.u32 %v1014_v57, %v901_v58  ;;  %v893_v2 = vld [vmem:[%s1597_s1 + $0x170] sm:$0xf0]  ;;  %v867_v3 = vld [vmem:[%s1597_s1 + $0x118] sm:$0xf] }
  0x1f   :  { %512 = vmatpush.bf16.msra.mxu3 %v760_v23  ;;  %v1010_v4 = vld [vmem:[%s1597_s1 + $0x134] sm:$0xf0]  ;;  %v1006_v5 = vld [vmem:[%s1597_s1 + $0x11c] sm:$0xf]  ;;  %v892_v7 = vor.u32 %v1017_v63, %v891_v62  ;;  %v896_v8 = vor.u32 %v1013_v0, %v893_v2  ;;  %v859_v10 = vld [vmem:[%s1597_s1 + $0x110] sm:$0xf] }
  0x20   :  { %v869_v6 = vld [vmem:[%s1597_s1 + $0x138] sm:$0xf0]  ;;  %v868_v9 = vor.u32 %v1010_v4, %v867_v3  ;;  %v1009_v11 = vld [vmem:[%s1597_s1 + $0x12c] sm:$0xf0]  ;;  %v1005_v12 = vld [vmem:[%s1597_s1 + $0x114] sm:$0xf] }
  0x21   :  { %444 = vmatpush.bf16.msra.mxu0 %v716_v30  ;;  %467 = vmatpush.bf16.msra.mxu1 %v720_v33  ;;  %v872_v13 = vor.u32 %v1006_v5, %v869_v6  ;;  %v861_v14 = vld [vmem:[%s1597_s1 + $0x130] sm:$0xf0]  ;;  %v835_v15 = vld [vmem:[%s1597_s1 + $0xd8] sm:$0xf]  ;;  %v998_v17 = vld [vmem:[%s1597_s1 + $0xdc] sm:$0xf]  ;;  %v860_v20 = vor.u32 %v1009_v11, %v859_v10 }
  0x22   :  { %490 = vmatpush.bf16.msra.mxu2 %v724_v34  ;;  %v1002_v16 = vld [vmem:[%s1597_s1 + $0xf4] sm:$0xf0]  ;;  %v837_v18 = vld [vmem:[%s1597_s1 + $0xf8] sm:$0xf0]  ;;  %v1367_v19 = vld [vmem:[%s1598_s0 + $0x8] sm:$0xff]  ;;  %v864_v21 = vor.u32 %v1005_v12, %v861_v14 }
  0x23   :  { %513 = vmatpush.bf16.msra.mxu3 %v728_v36  ;;  %v836_v22 = vor.u32 %v1002_v16, %v835_v15  ;;  %v827_v23 = vld [vmem:[%s1597_s1 + $0xd0] sm:$0xf]  ;;  %v997_v25 = vld [vmem:[%s1597_s1 + $0xd4] sm:$0xf]  ;;  %v840_v26 = vor.u32 %v998_v17, %v837_v18  ;;  %v803_v28 = vld [vmem:[%s1597_s1 + $0x98] sm:$0xf] }
  0x24   :  { %445 = vmatmul.bf16.vlgmr.msra.gmra.mxu0 %v1262_v35  ;;  %468 = vmatmul.bf16.vlgmr.msra.gmra.mxu1 %v1262_v35  ;;  %v1001_v24 = vld [vmem:[%s1597_s1 + $0xec] sm:$0xf0]  ;;  %v829_v27 = vld [vmem:[%s1597_s1 + $0xf0] sm:$0xf0]  ;;  %v994_v29 = vld [vmem:[%s1597_s1 + $0xb4] sm:$0xf0] }
  0x25   :  { %491 = vmatmul.bf16.vlgmr.msra.gmra.mxu2 %v1262_v35  ;;  %529 = vmatpush.bf16.msrb.mxu0 %v956_v47  ;;  %v990_v30 = vld [vmem:[%s1597_s1 + $0x9c] sm:$0xf]  ;;  %v828_v32 = vor.u32 %v1001_v24, %v827_v23  ;;  %v832_v33 = vor.u32 %v997_v25, %v829_v27  ;;  %v804_v34 = vor.u32 %v994_v29, %v803_v28  ;;  %v795_v36 = vld [vmem:[%s1597_s1 + $0x90] sm:$0xf]  ;;  %v989_v38 = vld [vmem:[%s1597_s1 + $0x94] sm:$0xf] }
  0x26   :  { %575 = vmatpush.bf16.msrb.mxu2 %v964_v37  ;;  %514 = vmatmul.bf16.vlgmr.msra.gmra.mxu3 %v1262_v35  ;;  %v805_v31 = vld [vmem:[%s1597_s1 + $0xb8] sm:$0xf0]  ;;  %v993_v37 = vld [vmem:[%s1597_s1 + $0xac] sm:$0xf0]  ;;  %v797_v40 = vld [vmem:[%s1597_s1 + $0xb0] sm:$0xf0] }
  0x27   :  { %598 = vmatpush.bf16.msrb.mxu3 %v968_v41  ;;  %552 = vmatpush.bf16.msrb.mxu1 %v960_v48  ;;  %v808_v39 = vor.u32 %v990_v30, %v805_v31  ;;  %v771_v41 = vld [vmem:[%s1597_s1 + $0x58] sm:$0xf]  ;;  %v982_v43 = vld [vmem:[%s1597_s1 + $0x5c] sm:$0xf]  ;;  %v796_v45 = vor.u32 %v993_v37, %v795_v36  ;;  %v800_v46 = vor.u32 %v989_v38, %v797_v40  ;;  %v763_v48 = vld [vmem:[%s1597_s1 + $0x50] sm:$0xf] }
  0x28   :  { %v986_v42 = vld [vmem:[%s1597_s1 + $0x74] sm:$0xf0]  ;;  %v773_v44 = vld [vmem:[%s1597_s1 + $0x78] sm:$0xf0]  ;;  %v981_v50 = vld [vmem:[%s1597_s1 + $0x54] sm:$0xf] }
  0x29   :  { %530 = vmatpush.bf16.msrb.mxu0 %v924_v59  ;;  %v772_v47 = vor.u32 %v986_v42, %v771_v41  ;;  %v776_v51 = vor.u32 %v982_v43, %v773_v44  ;;  %v765_v52 = vld [vmem:[%s1597_s1 + $0x70] sm:$0xf0]  ;;  %v978_v54 = vld [vmem:[%s1597_s1 + $0x34] sm:$0xf0]  ;;  %v18_v55 = vld [vmem:[%s1598_s0 + $0x10] sm:$0xf] }
  0x2a   :  { %576 = vmatpush.bf16.msrb.mxu2 %v932_v49  ;;  %v985_v49 = vld [vmem:[%s1597_s1 + $0x6c] sm:$0xf0]  ;;  %v974_v56 = vld [vmem:[%s1597_s1 + $0x1c] sm:$0xf]  ;;  %v768_v59 = vor.u32 %v981_v50, %v765_v52  ;;  %v110_v63 = vunpack.c.l.b16 %v18_v55  ;;  %v733_v2 = vld [vmem:[%s1597_s1 + $0x30] sm:$0xf0] }
  0x2b   :  { %599 = vmatpush.bf16.msrb.mxu3 %v936_v53  ;;  %553 = vmatpush.bf16.msrb.mxu1 %v928_v60  ;;  %v739_v53 = vld [vmem:[%s1597_s1 + $0x18] sm:$0xf]  ;;  %v741_v57 = vld [vmem:[%s1597_s1 + $0x38] sm:$0xf0]  ;;  %v764_v58 = vor.u32 %v985_v49, %v763_v48  ;;  %v977_v62 = vld [vmem:[%s1597_s1 + $0x2c] sm:$0xf0] }
  0x2c   :  { %v740_v60 = vor.u32 %v978_v54, %v739_v53  ;;  %v744_v0 = vor.u32 %v974_v56, %v741_v57  ;;  %v113_v5 = vpack.c.b16 %v110_v63, %v110_v63  ;;  %v1471_v6 = vld [vmem:[%s1599_s2] sm:$0xff] }
  0x2d   :  { %531 = vmatpush.bf16.msrb.mxu0 %v892_v7  ;;  %v1474_v7 = vperm.slane %v1471_v6, 0  ;;  %v1482_v14 = vperm.slane %v1471_v6, 2  ;;  %v1485_v15 = vperm.slane %v1471_v6, 3 }
  0x2e   :  { %577 = vmatpush.bf16.msrb.mxu2 %v900_v61  ;;  %v731_v61 = vld [vmem:[%s1597_s1 + $0x10] sm:$0xf] }
  0x2f   :  { %600 = vmatpush.bf16.msrb.mxu3 %v904_v1  ;;  %554 = vmatpush.bf16.msrb.mxu1 %v896_v8  ;;  %v973_v1 = vld [vmem:[%s1597_s1 + $0x14] sm:$0xf]  ;;  %v732_v3 = vor.u32 %v977_v62, %v731_v61 }
  0x30   :  { %v736_v4 = vor.u32 %v973_v1, %v733_v2 }
  0x31   :  { %532 = vmatpush.bf16.msrb.mxu0 %v860_v20 }
  0x32   :  { %578 = vmatpush.bf16.msrb.mxu2 %v868_v9 }
  0x33   :  { %601 = vmatpush.bf16.msrb.mxu3 %v872_v13  ;;  %555 = vmatpush.bf16.msrb.mxu1 %v864_v21 }
  0x34   :  { %450 = vmatmul.bf16.gmra.mxu0 %v1367_v19  ;;  %473 = vmatmul.bf16.gmra.mxu1 %v1367_v19 }
  0x35   :  { %496 = vmatmul.bf16.gmra.mxu2 %v1367_v19  ;;  %533 = vmatpush.bf16.msrb.mxu0 %v828_v32 }
  0x36   :  { %579 = vmatpush.bf16.msrb.mxu2 %v836_v22  ;;  %519 = vmatmul.bf16.gmra.mxu3 %v1367_v19 }
  0x37   :  { %602 = vmatpush.bf16.msrb.mxu3 %v840_v26  ;;  %556 = vmatpush.bf16.msrb.mxu1 %v832_v33 }
  0x39   :  { %534 = vmatpush.bf16.msrb.mxu0 %v796_v45 }
  0x3a   :  { %580 = vmatpush.bf16.msrb.mxu2 %v804_v34 }
  0x3b   :  { %603 = vmatpush.bf16.msrb.mxu3 %v808_v39  ;;  %557 = vmatpush.bf16.msrb.mxu1 %v800_v46 }
  0x3d   :  { %535 = vmatpush.bf16.msrb.mxu0 %v764_v58 }
  0x3e   :  { %581 = vmatpush.bf16.msrb.mxu2 %v772_v47 }
  0x3f   :  { %604 = vmatpush.bf16.msrb.mxu3 %v776_v51  ;;  %558 = vmatpush.bf16.msrb.mxu1 %v768_v59 }
  0x41   :  { %536 = vmatpush.bf16.msrb.mxu0 %v732_v3 }
  0x42   :  { %582 = vmatpush.bf16.msrb.mxu2 %v740_v60 }
  0x43   :  { %605 = vmatpush.bf16.msrb.mxu3 %v744_v0  ;;  %559 = vmatpush.bf16.msrb.mxu1 %v736_v4 }
  0x44   :  { %455 = vmatmul.bf16.gmra.mxu0 %v113_v5  ;;  %478 = vmatmul.bf16.gmra.mxu1 %v113_v5 }
  0x45   :  { %501 = vmatmul.bf16.gmra.mxu2 %v113_v5 }
  0x46   :  { %524 = vmatmul.bf16.gmra.mxu3 %v113_v5 }
  0x54   :  { %537 = vmatmul.bf16.vlgmr.msrb.gmra.mxu0 %v1262_v35  ;;  %560 = vmatmul.bf16.vlgmr.msrb.gmra.mxu1 %v1262_v35 }
  0x55   :  { %583 = vmatmul.bf16.vlgmr.msrb.gmra.mxu2 %v1262_v35 }
  0x56   :  { %606 = vmatmul.bf16.vlgmr.msrb.gmra.mxu3 %v1262_v35  ;;  %v1477_v35 = vperm.slane %v1471_v6, 1 }
  0x64   :  { %542 = vmatmul.bf16.gmra.mxu0 %v1367_v19  ;;  %565 = vmatmul.bf16.gmra.mxu1 %v1367_v19 }
  0x65   :  { %588 = vmatmul.bf16.gmra.mxu2 %v1367_v19 }
  0x66   :  { %611 = vmatmul.bf16.gmra.mxu3 %v1367_v19 }
  0x74   :  { %547 = vmatmul.bf16.gmra.mxu0 %v113_v5  ;;  %570 = vmatmul.bf16.gmra.mxu1 %v113_v5 }
  0x75   :  { %593 = vmatmul.bf16.gmra.mxu2 %v113_v5 }
  0x76   :  { %616 = vmatmul.bf16.gmra.mxu3 %v113_v5 }
  0xa1   :  { %v446_v8 = vpop.f32.mrf.mxu0  ;;  %v469_v10 = vpop.f32.mrf.mxu1 }
  0xa2   :  { %v447_v9 = vadd.f32 %v446_v8, %v1474_v7  ;;  %v470_v11 = vadd.f32 %v469_v10, %v1477_v35 }
  0xa4   :  { %v621_v12 = vmax.f32 %v447_v9, 0.0  ;;  %v622_v13 = vmax.f32 %v470_v11, 0.0 }
  0xa6   :  { %v661_v16 = vpack.c.bf16 %v622_v13, %v621_v12 }
  0xa8   :  { %v492_v17 = vpop.f32.mrf.mxu2  ;;  %681 = vst [vmem:[%s1600_s3] sm:$0xff] %v661_v16 }
  0xa9   :  { %v493_v18 = vadd.f32 %v492_v17, %v1482_v14  ;;  %v515_v19 = vpop.f32.mrf.mxu3  ;;  %v448_v20 = vpop.f32.mrf.mxu0 }
  0xaa   :  { %v516_v21 = vadd.f32 %v515_v19, %v1485_v15  ;;  %v449_v22 = vadd.f32 %v448_v20, %v1474_v7  ;;  %v471_v23 = vpop.f32.mrf.mxu1 }
  0xab   :  { %v623_v24 = vmax.f32 %v493_v18, 0.0  ;;  %v472_v25 = vadd.f32 %v471_v23, %v1477_v35 }
  0xac   :  { %v624_v26 = vmax.f32 %v516_v21, 0.0  ;;  %v629_v27 = vmax.f32 %v449_v22, 0.0  ;;  %v1533_v21 = vperm.slane %v1471_v6, 4  ;;  %v1536_v22 = vperm.slane %v1471_v6, 5 }
  0xad   :  { %v630_v28 = vmax.f32 %v472_v25, 0.0 }
  0xae   :  { %v662_v29 = vpack.c.bf16 %v624_v26, %v623_v24 }
  0xaf   :  { %v665_v30 = vpack.c.bf16 %v630_v28, %v629_v27 }
  0xb0   :  { %682 = vst [vmem:[%s1600_s3 + $0x8] sm:$0xff] %v662_v29  ;;  %v494_v31 = vpop.f32.mrf.mxu2  ;;  %v1544_v29 = vperm.slane %v1471_v6, 6 }
  0xb1   :  { %685 = vst [vmem:[%s1600_s3 + $0x20] sm:$0xff] %v665_v30  ;;  %v495_v32 = vadd.f32 %v494_v31, %v1482_v14  ;;  %v517_v33 = vpop.f32.mrf.mxu3  ;;  %v451_v34 = vpop.f32.mrf.mxu0  ;;  %v1547_v30 = vperm.slane %v1471_v6, 7 }
  0xb2   :  { %v518_v36 = vadd.f32 %v517_v33, %v1485_v15  ;;  %v452_v37 = vadd.f32 %v451_v34, %v1474_v7  ;;  %v474_v38 = vpop.f32.mrf.mxu1 }
  0xb3   :  { %v631_v39 = vmax.f32 %v495_v32, 0.0  ;;  %v475_v40 = vadd.f32 %v474_v38, %v1477_v35 }
  0xb4   :  { %v632_v41 = vmax.f32 %v518_v36, 0.0  ;;  %v637_v42 = vmax.f32 %v452_v37, 0.0 }
  0xb5   :  { %v638_v43 = vmax.f32 %v475_v40, 0.0 }
  0xb6   :  { %v666_v44 = vpack.c.bf16 %v632_v41, %v631_v39 }
  0xb7   :  { %v669_v45 = vpack.c.bf16 %v638_v43, %v637_v42 }
  0xb8   :  { %686 = vst [vmem:[%s1600_s3 + $0x28] sm:$0xff] %v666_v44  ;;  %v497_v46 = vpop.f32.mrf.mxu2 }
  0xb9   :  { %689 = vst [vmem:[%s1600_s3 + $0x40] sm:$0xff] %v669_v45  ;;  %v498_v47 = vadd.f32 %v497_v46, %v1482_v14  ;;  %v520_v48 = vpop.f32.mrf.mxu3  ;;  %v453_v49 = vpop.f32.mrf.mxu0 }
  0xba   :  { %v521_v50 = vadd.f32 %v520_v48, %v1485_v15  ;;  %v454_v51 = vadd.f32 %v453_v49, %v1474_v7  ;;  %v476_v52 = vpop.f32.mrf.mxu1 }
  0xbb   :  { %v639_v53 = vmax.f32 %v498_v47, 0.0  ;;  %v477_v54 = vadd.f32 %v476_v52, %v1477_v35 }
  0xbc   :  { %v640_v55 = vmax.f32 %v521_v50, 0.0  ;;  %v645_v56 = vmax.f32 %v454_v51, 0.0 }
  0xbd   :  { %v646_v57 = vmax.f32 %v477_v54, 0.0 }
  0xbe   :  { %v670_v58 = vpack.c.bf16 %v640_v55, %v639_v53 }
  0xbf   :  { %v673_v59 = vpack.c.bf16 %v646_v57, %v645_v56 }
  0xc0   :  { %690 = vst [vmem:[%s1600_s3 + $0x48] sm:$0xff] %v670_v58  ;;  %v499_v60 = vpop.f32.mrf.mxu2 }
  0xc1   :  { %693 = vst [vmem:[%s1600_s3 + $0x60] sm:$0xff] %v673_v59  ;;  %v500_v61 = vadd.f32 %v499_v60, %v1482_v14  ;;  %v522_v62 = vpop.f32.mrf.mxu3  ;;  %v456_v63 = vpop.f32.mrf.mxu0 }
  0xc2   :  { %v523_v0 = vadd.f32 %v522_v62, %v1485_v15  ;;  %v457_v1 = vadd.f32 %v456_v63, %v1474_v7  ;;  %v479_v2 = vpop.f32.mrf.mxu1 }
  0xc3   :  { %v647_v3 = vmax.f32 %v500_v61, 0.0  ;;  %v480_v4 = vadd.f32 %v479_v2, %v1477_v35 }
  0xc4   :  { %v648_v5 = vmax.f32 %v523_v0, 0.0  ;;  %v653_v8 = vmax.f32 %v457_v1, 0.0 }
  0xc5   :  { %v654_v9 = vmax.f32 %v480_v4, 0.0 }
  0xc6   :  { %v674_v10 = vpack.c.bf16 %v648_v5, %v647_v3 }
  0xc7   :  { %v677_v11 = vpack.c.bf16 %v654_v9, %v653_v8 }
  0xc8   :  { %694 = vst [vmem:[%s1600_s3 + $0x68] sm:$0xff] %v674_v10  ;;  %v502_v12 = vpop.f32.mrf.mxu2 }
  0xc9   :  { %697 = vst [vmem:[%s1600_s3 + $0x80] sm:$0xff] %v677_v11  ;;  %v503_v7 = vadd.f32 %v502_v12, %v1482_v14  ;;  %v525_v13 = vpop.f32.mrf.mxu3  ;;  %v458_v16 = vpop.f32.mrf.mxu0 }
  0xca   :  { %v526_v35 = vadd.f32 %v525_v13, %v1485_v15  ;;  %v481_v17 = vpop.f32.mrf.mxu1 }
  0xcb   :  { %v655_v18 = vmax.f32 %v503_v7, 0.0 }
  0xcc   :  { %v656_v19 = vmax.f32 %v526_v35, 0.0 }
  0xce   :  { %v678_v20 = vpack.c.bf16 %v656_v19, %v655_v18 }
  0xd0   :  { %698 = vst [vmem:[%s1600_s3 + $0x88] sm:$0xff] %v678_v20  ;;  %v504_v23 = vpop.f32.mrf.mxu2 }
  0xd1   :  { %v527_v14 = vpop.f32.mrf.mxu3  ;;  %v538_v24 = vpop.f32.mrf.mxu0 }
  0xd2   :  { %v539_v25 = vadd.f32 %v538_v24, %v1533_v21  ;;  %v561_v15 = vpop.f32.mrf.mxu1 }
  0xd3   :  { %v562_v26 = vadd.f32 %v561_v15, %v1536_v22 }
  0xd4   :  { %v625_v27 = vmax.f32 %v539_v25, 0.0 }
  0xd5   :  { %v626_v28 = vmax.f32 %v562_v26, 0.0 }
  0xd7   :  { %v663_v31 = vpack.c.bf16 %v626_v28, %v625_v27 }
  0xd8   :  { %v584_v32 = vpop.f32.mrf.mxu2 }
  0xd9   :  { %683 = vst [vmem:[%s1600_s3 + $0x10] sm:$0xff] %v663_v31  ;;  %v585_v33 = vadd.f32 %v584_v32, %v1544_v29  ;;  %v607_v34 = vpop.f32.mrf.mxu3  ;;  %v540_v36 = vpop.f32.mrf.mxu0 }
  0xda   :  { %v608_v37 = vadd.f32 %v607_v34, %v1547_v30  ;;  %v541_v38 = vadd.f32 %v540_v36, %v1533_v21  ;;  %v563_v39 = vpop.f32.mrf.mxu1 }
  0xdb   :  { %v627_v40 = vmax.f32 %v585_v33, 0.0  ;;  %v564_v41 = vadd.f32 %v563_v39, %v1536_v22 }
  0xdc   :  { %v628_v6 = vmax.f32 %v608_v37, 0.0  ;;  %v633_v42 = vmax.f32 %v541_v38, 0.0 }
  0xdd   :  { %v634_v43 = vmax.f32 %v564_v41, 0.0 }
  0xde   :  { %v664_v44 = vpack.c.bf16 %v628_v6, %v627_v40 }
  0xdf   :  { %v667_v45 = vpack.c.bf16 %v634_v43, %v633_v42 }
  0xe0   :  { %684 = vst [vmem:[%s1600_s3 + $0x18] sm:$0xff] %v664_v44  ;;  %v586_v46 = vpop.f32.mrf.mxu2 }
  0xe1   :  { %687 = vst [vmem:[%s1600_s3 + $0x30] sm:$0xff] %v667_v45  ;;  %v587_v47 = vadd.f32 %v586_v46, %v1544_v29  ;;  %v609_v48 = vpop.f32.mrf.mxu3  ;;  %v543_v49 = vpop.f32.mrf.mxu0 }
  0xe2   :  { %v610_v50 = vadd.f32 %v609_v48, %v1547_v30  ;;  %v544_v51 = vadd.f32 %v543_v49, %v1533_v21  ;;  %v566_v52 = vpop.f32.mrf.mxu1 }
  0xe3   :  { %v635_v53 = vmax.f32 %v587_v47, 0.0  ;;  %v567_v54 = vadd.f32 %v566_v52, %v1536_v22 }
  0xe4   :  { %v636_v55 = vmax.f32 %v610_v50, 0.0  ;;  %v641_v56 = vmax.f32 %v544_v51, 0.0 }
  0xe5   :  { %v642_v57 = vmax.f32 %v567_v54, 0.0 }
  0xe6   :  { %v668_v58 = vpack.c.bf16 %v636_v55, %v635_v53 }
  0xe7   :  { %v671_v59 = vpack.c.bf16 %v642_v57, %v641_v56 }
  0xe8   :  { %688 = vst [vmem:[%s1600_s3 + $0x38] sm:$0xff] %v668_v58  ;;  %v589_v60 = vpop.f32.mrf.mxu2 }
  0xe9   :  { %691 = vst [vmem:[%s1600_s3 + $0x50] sm:$0xff] %v671_v59  ;;  %v590_v61 = vadd.f32 %v589_v60, %v1544_v29  ;;  %v612_v62 = vpop.f32.mrf.mxu3  ;;  %v545_v63 = vpop.f32.mrf.mxu0 }
  0xea   :  { %v613_v0 = vadd.f32 %v612_v62, %v1547_v30  ;;  %v546_v1 = vadd.f32 %v545_v63, %v1533_v21  ;;  %v568_v2 = vpop.f32.mrf.mxu1 }
  0xeb   :  { %v643_v3 = vmax.f32 %v590_v61, 0.0  ;;  %v569_v4 = vadd.f32 %v568_v2, %v1536_v22 }
  0xec   :  { %v644_v5 = vmax.f32 %v613_v0, 0.0  ;;  %v649_v8 = vmax.f32 %v546_v1, 0.0 }
  0xed   :  { %v650_v9 = vmax.f32 %v569_v4, 0.0 }
  0xee   :  { %v672_v10 = vpack.c.bf16 %v644_v5, %v643_v3 }
  0xef   :  { %v675_v11 = vpack.c.bf16 %v650_v9, %v649_v8 }
  0xf0   :  { %692 = vst [vmem:[%s1600_s3 + $0x58] sm:$0xff] %v672_v10  ;;  %v591_v12 = vpop.f32.mrf.mxu2 }
  0xf1   :  { %695 = vst [vmem:[%s1600_s3 + $0x70] sm:$0xff] %v675_v11  ;;  %v592_v7 = vadd.f32 %v591_v12, %v1544_v29  ;;  %v614_v13 = vpop.f32.mrf.mxu3  ;;  %v548_v16 = vpop.f32.mrf.mxu0 }
  0xf2   :  { %v615_v35 = vadd.f32 %v614_v13, %v1547_v30  ;;  %v549_v17 = vadd.f32 %v548_v16, %v1533_v21  ;;  %v571_v18 = vpop.f32.mrf.mxu1 }
  0xf3   :  { %v651_v19 = vmax.f32 %v592_v7, 0.0  ;;  %v572_v20 = vadd.f32 %v571_v18, %v1536_v22 }
  0xf4   :  { %v652_v23 = vmax.f32 %v615_v35, 0.0  ;;  %v657_v14 = vmax.f32 %v549_v17, 0.0 }
  0xf5   :  { %v658_v24 = vmax.f32 %v572_v20, 0.0 }
  0xf6   :  { %v676_v25 = vpack.c.bf16 %v652_v23, %v651_v19 }
  0xf7   :  { %v679_v15 = vpack.c.bf16 %v658_v24, %v657_v14 }
  0xf8   :  { %696 = vst [vmem:[%s1600_s3 + $0x78] sm:$0xff] %v676_v25  ;;  %v594_v26 = vpop.f32.mrf.mxu2 }
  0xf9   :  { %699 = vst [vmem:[%s1600_s3 + $0x90] sm:$0xff] %v679_v15  ;;  %v595_v21 = vadd.f32 %v594_v26, %v1544_v29  ;;  %v617_v27 = vpop.f32.mrf.mxu3  ;;  %v550_v28 = vpop.f32.mrf.mxu0 }
  0xfa   :  { %v618_v22 = vadd.f32 %v617_v27, %v1547_v30  ;;  %v573_v31 = vpop.f32.mrf.mxu1 }
  0xfb   :  { %v659_v32 = vmax.f32 %v595_v21, 0.0 }
  0xfc   :  { %v660_v33 = vmax.f32 %v618_v22, 0.0 }
  0xfe   :  { %v680_v34 = vpack.c.bf16 %v660_v33, %v659_v32 }
 0x100   :  { %700 = vst [vmem:[%s1600_s3 + $0x98] sm:$0xff] %v680_v34  ;;  %v596_v36 = vpop.f32.mrf.mxu2 }
 0x101   :  { %v619_v37 = vpop.f32.mrf.mxu3 }

// kernel: autoencoder_forward.15
= control target key start
LH: loop header
LB: loop body
LE: loop exit
PB: predicated region body
PF: predicated region fallthrough
CT: control target
= control target key end

     0   :  { %s927_s1 = inlined_call_operand.vmem [shape: bf16[256,128], index: 1, kind: input, shape index: {}]   ;;  %s928_s2 = inlined_call_operand.vmem [shape: f32[1,128], index: 2, kind: input, shape index: {}]   ;;  %s929_s0 = inlined_call_operand.vmem [shape: bf16[160,256], index: 0, kind: input, shape index: {}]   ;;  %s930_s3 = inlined_call_operand.vmem [shape: bf16[160,128], index: 3, kind: output, shape index: {}]  }
   0x1   :  { %v599_v0 = vld [vmem:[%s927_s1 + $0x38] sm:$0xff]  ;;  %v598_v2 = vld [vmem:[%s927_s1 + $0x30] sm:$0xff]  ;;  %v597_v4 = vld [vmem:[%s927_s1 + $0x28] sm:$0xff] }
   0x2   :  { %v607_v1 = vld [vmem:[%s927_s1 + $0x78] sm:$0xff]  ;;  %266 = vmatpush.bf16.msra.mxu0 %v599_v0  ;;  %667 = vmatpush.bf16.msra.mxu2 %v599_v0  ;;  %v606_v3 = vld [vmem:[%s927_s1 + $0x70] sm:$0xff]  ;;  %v605_v5 = vld [vmem:[%s927_s1 + $0x68] sm:$0xff] }
   0x3   :  { %325 = vmatpush.bf16.msra.mxu1 %v607_v1  ;;  %675 = vmatpush.bf16.msra.mxu3 %v607_v1  ;;  %v596_v6 = vld [vmem:[%s927_s1 + $0x20] sm:$0xff]  ;;  %v595_v8 = vld [vmem:[%s927_s1 + $0x18] sm:$0xff]  ;;  %v594_v10 = vld [vmem:[%s927_s1 + $0x10] sm:$0xff] }
   0x4   :  { %v604_v7 = vld [vmem:[%s927_s1 + $0x60] sm:$0xff]  ;;  %v603_v9 = vld [vmem:[%s927_s1 + $0x58] sm:$0xff]  ;;  %v602_v11 = vld [vmem:[%s927_s1 + $0x50] sm:$0xff] }
   0x5   :  { %v593_v12 = vld [vmem:[%s927_s1 + $0x8] sm:$0xff]  ;;  %v592_v14 = vld [vmem:[%s927_s1] sm:$0xff]  ;;  %v470_v18 = vld [vmem:[%s929_s0 + $0x50] sm:$0xf] }
   0x6   :  { %267 = vmatpush.bf16.msra.mxu0 %v598_v2  ;;  %668 = vmatpush.bf16.msra.mxu2 %v598_v2  ;;  %v601_v13 = vld [vmem:[%s927_s1 + $0x48] sm:$0xff]  ;;  %v600_v15 = vld [vmem:[%s927_s1 + $0x40] sm:$0xff]  ;;  %v583_v19 = vld [vmem:[%s929_s0 + $0x54] sm:$0xf0] }
   0x7   :  { %326 = vmatpush.bf16.msra.mxu1 %v606_v3  ;;  %676 = vmatpush.bf16.msra.mxu3 %v606_v3  ;;  %v430_v16 = vld [vmem:[%s929_s0] sm:$0xf]  ;;  %v573_v17 = vld [vmem:[%s929_s0 + $0x4] sm:$0xf0]  ;;  %v572_v20 = vld [vmem:[%s929_s0 + $0x4] sm:$0xf]  ;;  %v471_v25 = vor.u32 %v583_v19, %v470_v18 }
   0x8   :  { %v432_v21 = vld [vmem:[%s929_s0 + $0x8] sm:$0xf0]  ;;  %v582_v22 = vld [vmem:[%s929_s0 + $0x54] sm:$0xf]  ;;  %v472_v23 = vld [vmem:[%s929_s0 + $0x58] sm:$0xf0]  ;;  %v431_v24 = vor.u32 %v573_v17, %v430_v16 }
   0x9   :  { %v435_v26 = vor.u32 %v572_v20, %v432_v21  ;;  %v475_v27 = vor.u32 %v582_v22, %v472_v23  ;;  %v438_v28 = vld [vmem:[%s929_s0 + $0x10] sm:$0xf]  ;;  %v575_v29 = vld [vmem:[%s929_s0 + $0x14] sm:$0xf0]  ;;  %v478_v30 = vld [vmem:[%s929_s0 + $0x60] sm:$0xf] }
   0xa   :  { %268 = vmatpush.bf16.msra.mxu0 %v597_v4  ;;  %669 = vmatpush.bf16.msra.mxu2 %v597_v4  ;;  %v585_v31 = vld [vmem:[%s929_s0 + $0x64] sm:$0xf0]  ;;  %v574_v32 = vld [vmem:[%s929_s0 + $0x14] sm:$0xf]  ;;  %v440_v33 = vld [vmem:[%s929_s0 + $0x18] sm:$0xf0]  ;;  %v439_v36 = vor.u32 %v575_v29, %v438_v28 }
   0xb   :  { %327 = vmatpush.bf16.msra.mxu1 %v605_v5  ;;  %677 = vmatpush.bf16.msra.mxu3 %v605_v5  ;;  %v584_v34 = vld [vmem:[%s929_s0 + $0x64] sm:$0xf]  ;;  %v480_v35 = vld [vmem:[%s929_s0 + $0x68] sm:$0xf0]  ;;  %v479_v37 = vor.u32 %v585_v31, %v478_v30  ;;  %v443_v38 = vor.u32 %v574_v32, %v440_v33  ;;  %v446_v40 = vld [vmem:[%s929_s0 + $0x20] sm:$0xf] }
   0xc   :  { %v483_v39 = vor.u32 %v584_v34, %v480_v35  ;;  %v577_v41 = vld [vmem:[%s929_s0 + $0x24] sm:$0xf0]  ;;  %v486_v42 = vld [vmem:[%s929_s0 + $0x70] sm:$0xf]  ;;  %v587_v43 = vld [vmem:[%s929_s0 + $0x74] sm:$0xf0] }
   0xd   :  { %v576_v44 = vld [vmem:[%s929_s0 + $0x24] sm:$0xf]  ;;  %v448_v45 = vld [vmem:[%s929_s0 + $0x28] sm:$0xf0]  ;;  %v586_v46 = vld [vmem:[%s929_s0 + $0x74] sm:$0xf]  ;;  %v447_v48 = vor.u32 %v577_v41, %v446_v40  ;;  %v487_v49 = vor.u32 %v587_v43, %v486_v42 }
   0xe   :  { %269 = vmatpush.bf16.msra.mxu0 %v596_v6  ;;  %670 = vmatpush.bf16.msra.mxu2 %v596_v6  ;;  %v488_v47 = vld [vmem:[%s929_s0 + $0x78] sm:$0xf0]  ;;  %v451_v50 = vor.u32 %v576_v44, %v448_v45  ;;  %v454_v52 = vld [vmem:[%s929_s0 + $0x30] sm:$0xf]  ;;  %v579_v53 = vld [vmem:[%s929_s0 + $0x34] sm:$0xf0] }
   0xf   :  { %328 = vmatpush.bf16.msra.mxu1 %v604_v7  ;;  %678 = vmatpush.bf16.msra.mxu3 %v604_v7  ;;  %v491_v51 = vor.u32 %v586_v46, %v488_v47  ;;  %v494_v54 = vld [vmem:[%s929_s0 + $0x80] sm:$0xf]  ;;  %v589_v55 = vld [vmem:[%s929_s0 + $0x84] sm:$0xf0]  ;;  %v578_v56 = vld [vmem:[%s929_s0 + $0x34] sm:$0xf]  ;;  %v455_v60 = vor.u32 %v579_v53, %v454_v52 }
  0x10   :  { %v456_v57 = vld [vmem:[%s929_s0 + $0x38] sm:$0xf0]  ;;  %v588_v58 = vld [vmem:[%s929_s0 + $0x84] sm:$0xf]  ;;  %v496_v59 = vld [vmem:[%s929_s0 + $0x88] sm:$0xf0]  ;;  %v495_v61 = vor.u32 %v589_v55, %v494_v54 }
  0x11   :  { %v459_v62 = vor.u32 %v578_v56, %v456_v57  ;;  %v499_v63 = vor.u32 %v588_v58, %v496_v59  ;;  %v462_v0 = vld [vmem:[%s929_s0 + $0x40] sm:$0xf]  ;;  %v581_v1 = vld [vmem:[%s929_s0 + $0x44] sm:$0xf0]  ;;  %v502_v2 = vld [vmem:[%s929_s0 + $0x90] sm:$0xf] }
  0x12   :  { %270 = vmatpush.bf16.msra.mxu0 %v595_v8  ;;  %671 = vmatpush.bf16.msra.mxu2 %v595_v8  ;;  %v591_v3 = vld [vmem:[%s929_s0 + $0x94] sm:$0xf0]  ;;  %v580_v4 = vld [vmem:[%s929_s0 + $0x44] sm:$0xf]  ;;  %v464_v5 = vld [vmem:[%s929_s0 + $0x48] sm:$0xf0]  ;;  %v463_v8 = vor.u32 %v581_v1, %v462_v0 }
  0x13   :  { %329 = vmatpush.bf16.msra.mxu1 %v603_v9  ;;  %679 = vmatpush.bf16.msra.mxu3 %v603_v9  ;;  %v590_v6 = vld [vmem:[%s929_s0 + $0x94] sm:$0xf]  ;;  %v504_v7 = vld [vmem:[%s929_s0 + $0x98] sm:$0xf0]  ;;  %v503_v9 = vor.u32 %v591_v3, %v502_v2 }
  0x16   :  { %271 = vmatpush.bf16.msra.mxu0 %v594_v10  ;;  %672 = vmatpush.bf16.msra.mxu2 %v594_v10  ;;  %v467_v10 = vor.u32 %v580_v4, %v464_v5 }
  0x17   :  { %330 = vmatpush.bf16.msra.mxu1 %v602_v11  ;;  %680 = vmatpush.bf16.msra.mxu3 %v602_v11  ;;  %v507_v11 = vor.u32 %v590_v6, %v504_v7 }
  0x1a   :  { %272 = vmatpush.bf16.msra.mxu0 %v593_v12  ;;  %673 = vmatpush.bf16.msra.mxu2 %v593_v12 }
  0x1b   :  { %331 = vmatpush.bf16.msra.mxu1 %v601_v13  ;;  %681 = vmatpush.bf16.msra.mxu3 %v601_v13 }
  0x1e   :  { %273 = vmatpush.bf16.msra.mxu0 %v592_v14  ;;  %674 = vmatpush.bf16.msra.mxu2 %v592_v14  ;;  %v875_v14 = vld [vmem:[%s928_s2] ss:$0 sm:$0xff] }
  0x1f   :  { %332 = vmatpush.bf16.msra.mxu1 %v600_v15  ;;  %682 = vmatpush.bf16.msra.mxu3 %v600_v15 }
  0x21   :  { %274 = vmatmul.bf16.vlgmr.msra.gmra.mxu0 %v431_v24  ;;  %299 = vmatmul.bf16.vlgmr.msra.gmra.mxu2 %v471_v25 }
  0x22   :  { %333 = vmatmul.bf16.vlgmr.msra.gmra.mxu1 %v435_v26  ;;  %358 = vmatmul.bf16.vlgmr.msra.gmra.mxu3 %v475_v27 }
  0x31   :  { %279 = vmatmul.bf16.gmra.mxu0 %v439_v36  ;;  %304 = vmatmul.bf16.gmra.mxu2 %v479_v37 }
  0x32   :  { %338 = vmatmul.bf16.gmra.mxu1 %v443_v38  ;;  %363 = vmatmul.bf16.gmra.mxu3 %v483_v39 }
  0x41   :  { %284 = vmatmul.bf16.gmra.mxu0 %v447_v48  ;;  %309 = vmatmul.bf16.gmra.mxu2 %v487_v49 }
  0x42   :  { %343 = vmatmul.bf16.gmra.mxu1 %v451_v50  ;;  %368 = vmatmul.bf16.gmra.mxu3 %v491_v51 }
  0x51   :  { %289 = vmatmul.bf16.gmra.mxu0 %v455_v60  ;;  %314 = vmatmul.bf16.gmra.mxu2 %v495_v61 }
  0x52   :  { %348 = vmatmul.bf16.gmra.mxu1 %v459_v62  ;;  %373 = vmatmul.bf16.gmra.mxu3 %v499_v63 }
  0x61   :  { %294 = vmatmul.bf16.gmra.mxu0 %v463_v8  ;;  %319 = vmatmul.bf16.gmra.mxu2 %v503_v9 }
  0x62   :  { %353 = vmatmul.bf16.gmra.mxu1 %v467_v10  ;;  %378 = vmatmul.bf16.gmra.mxu3 %v507_v11 }
  0x9e   :  { %v275_v12 = vpop.f32.mrf.mxu0 }
  0x9f   :  { %v334_v13 = vpop.f32.mrf.mxu1  ;;  %v276_v16 = vadd.f32 %v875_v14, %v275_v12 }
  0xa1   :  { %v335_v21 = vadd.f32 %v334_v13, %v276_v16 }
  0xa4   :  { %v300_v15 = vpop.f32.mrf.mxu2 }
  0xa5   :  { %v359_v17 = vpop.f32.mrf.mxu3  ;;  %v301_v23 = vadd.f32 %v875_v14, %v300_v15 }
  0xa6   :  { %v277_v18 = vpop.f32.mrf.mxu0 }
  0xa7   :  { %v278_v19 = vadd.f32 %v875_v14, %v277_v18  ;;  %v336_v20 = vpop.f32.mrf.mxu1  ;;  %v360_v29 = vadd.f32 %v359_v17, %v301_v23 }
  0xa9   :  { %v337_v22 = vadd.f32 %v336_v20, %v278_v19 }
  0xab   :  { %v611_v24 = vpack.c.bf16 %v337_v22, %v335_v21 }
  0xac   :  { %v302_v25 = vpop.f32.mrf.mxu2 }
  0xad   :  { %612 = vst [vmem:[%s930_s3] sm:$0xff] %v611_v24   ;;  %v303_v26 = vadd.f32 %v875_v14, %v302_v25  ;;  %v361_v27 = vpop.f32.mrf.mxu3 }
  0xae   :  { %v280_v28 = vpop.f32.mrf.mxu0 }
  0xaf   :  { %v362_v30 = vadd.f32 %v361_v27, %v303_v26  ;;  %v339_v31 = vpop.f32.mrf.mxu1  ;;  %v281_v34 = vadd.f32 %v875_v14, %v280_v28 }
  0xb1   :  { %v636_v32 = vpack.c.bf16 %v362_v30, %v360_v29  ;;  %v340_v39 = vadd.f32 %v339_v31, %v281_v34 }
  0xb3   :  { %662 = vst [vmem:[%s930_s3 + $0x28] sm:$0xff] %v636_v32  }
  0xb4   :  { %v305_v33 = vpop.f32.mrf.mxu2 }
  0xb5   :  { %v364_v35 = vpop.f32.mrf.mxu3  ;;  %v306_v41 = vadd.f32 %v875_v14, %v305_v33 }
  0xb6   :  { %v282_v36 = vpop.f32.mrf.mxu0 }
  0xb7   :  { %v283_v37 = vadd.f32 %v875_v14, %v282_v36  ;;  %v341_v38 = vpop.f32.mrf.mxu1  ;;  %v365_v47 = vadd.f32 %v364_v35, %v306_v41 }
  0xb9   :  { %v342_v40 = vadd.f32 %v341_v38, %v283_v37 }
  0xbb   :  { %v616_v42 = vpack.c.bf16 %v342_v40, %v340_v39 }
  0xbc   :  { %v307_v43 = vpop.f32.mrf.mxu2 }
  0xbd   :  { %658 = vst [vmem:[%s930_s3 + $0x8] sm:$0xff] %v616_v42   ;;  %v308_v44 = vadd.f32 %v875_v14, %v307_v43  ;;  %v366_v45 = vpop.f32.mrf.mxu3 }
  0xbe   :  { %v285_v46 = vpop.f32.mrf.mxu0 }
  0xbf   :  { %v367_v48 = vadd.f32 %v366_v45, %v308_v44  ;;  %v344_v49 = vpop.f32.mrf.mxu1  ;;  %v286_v52 = vadd.f32 %v875_v14, %v285_v46 }
  0xc1   :  { %v641_v50 = vpack.c.bf16 %v367_v48, %v365_v47  ;;  %v345_v57 = vadd.f32 %v344_v49, %v286_v52 }
  0xc3   :  { %663 = vst [vmem:[%s930_s3 + $0x30] sm:$0xff] %v641_v50  }
  0xc4   :  { %v310_v51 = vpop.f32.mrf.mxu2 }
  0xc5   :  { %v369_v53 = vpop.f32.mrf.mxu3  ;;  %v311_v59 = vadd.f32 %v875_v14, %v310_v51 }
  0xc6   :  { %v287_v54 = vpop.f32.mrf.mxu0 }
  0xc7   :  { %v288_v55 = vadd.f32 %v875_v14, %v287_v54  ;;  %v346_v56 = vpop.f32.mrf.mxu1  ;;  %v370_v1 = vadd.f32 %v369_v53, %v311_v59 }
  0xc9   :  { %v347_v58 = vadd.f32 %v346_v56, %v288_v55 }
  0xcb   :  { %v621_v60 = vpack.c.bf16 %v347_v58, %v345_v57 }
  0xcc   :  { %v312_v61 = vpop.f32.mrf.mxu2 }
  0xcd   :  { %659 = vst [vmem:[%s930_s3 + $0x10] sm:$0xff] %v621_v60   ;;  %v313_v62 = vadd.f32 %v875_v14, %v312_v61  ;;  %v371_v63 = vpop.f32.mrf.mxu3 }
  0xce   :  { %v290_v0 = vpop.f32.mrf.mxu0 }
  0xcf   :  { %v372_v2 = vadd.f32 %v371_v63, %v313_v62  ;;  %v349_v3 = vpop.f32.mrf.mxu1  ;;  %v291_v6 = vadd.f32 %v875_v14, %v290_v0 }
  0xd1   :  { %v646_v4 = vpack.c.bf16 %v372_v2, %v370_v1  ;;  %v350_v11 = vadd.f32 %v349_v3, %v291_v6 }
  0xd3   :  { %664 = vst [vmem:[%s930_s3 + $0x38] sm:$0xff] %v646_v4  }
  0xd4   :  { %v315_v5 = vpop.f32.mrf.mxu2 }
  0xd5   :  { %v374_v7 = vpop.f32.mrf.mxu3  ;;  %v316_v13 = vadd.f32 %v875_v14, %v315_v5 }
  0xd6   :  { %v292_v8 = vpop.f32.mrf.mxu0 }
  0xd7   :  { %v293_v9 = vadd.f32 %v875_v14, %v292_v8  ;;  %v351_v10 = vpop.f32.mrf.mxu1  ;;  %v375_v20 = vadd.f32 %v374_v7, %v316_v13 }
  0xd9   :  { %v352_v12 = vadd.f32 %v351_v10, %v293_v9 }
  0xdb   :  { %v626_v15 = vpack.c.bf16 %v352_v12, %v350_v11 }
  0xdc   :  { %v317_v16 = vpop.f32.mrf.mxu2 }
  0xdd   :  { %660 = vst [vmem:[%s930_s3 + $0x18] sm:$0xff] %v626_v15   ;;  %v318_v17 = vadd.f32 %v875_v14, %v317_v16  ;;  %v376_v18 = vpop.f32.mrf.mxu3 }
  0xde   :  { %v295_v19 = vpop.f32.mrf.mxu0 }
  0xdf   :  { %v377_v21 = vadd.f32 %v376_v18, %v318_v17  ;;  %v354_v22 = vpop.f32.mrf.mxu1  ;;  %v296_v25 = vadd.f32 %v875_v14, %v295_v19 }
  0xe1   :  { %v651_v23 = vpack.c.bf16 %v377_v21, %v375_v20  ;;  %v355_v30 = vadd.f32 %v354_v22, %v296_v25 }
  0xe3   :  { %665 = vst [vmem:[%s930_s3 + $0x40] sm:$0xff] %v651_v23  }
  0xe4   :  { %v320_v24 = vpop.f32.mrf.mxu2 }
  0xe5   :  { %v379_v26 = vpop.f32.mrf.mxu3  ;;  %v321_v32 = vadd.f32 %v875_v14, %v320_v24 }
  0xe6   :  { %v297_v27 = vpop.f32.mrf.mxu0 }
  0xe7   :  { %v298_v28 = vadd.f32 %v875_v14, %v297_v27  ;;  %v356_v29 = vpop.f32.mrf.mxu1  ;;  %v380_v37 = vadd.f32 %v379_v26, %v321_v32 }
  0xe9   :  { %v357_v31 = vadd.f32 %v356_v29, %v298_v28 }
  0xeb   :  { %v631_v33 = vpack.c.bf16 %v357_v31, %v355_v30 }
  0xec   :  { %v322_v34 = vpop.f32.mrf.mxu2 }
  0xed   :  { %661 = vst [vmem:[%s930_s3 + $0x20] sm:$0xff] %v631_v33   ;;  %v323_v35 = vadd.f32 %v875_v14, %v322_v34  ;;  %v381_v36 = vpop.f32.mrf.mxu3 }
  0xef   :  { %v382_v38 = vadd.f32 %v381_v36, %v323_v35 }
  0xf1   :  { %v656_v39 = vpack.c.bf16 %v382_v38, %v380_v37 }
  0xf3   :  { %666 = vst [vmem:[%s930_s3 + $0x48] sm:$0xff] %v656_v39  }

</bundles_post_ra>
